<compile_context>
chip_gen: v5e
topology: v5e:2x2
jax: 0.10.0
libtpu: 0.0.40
codegen_flags: <defaults>
</compile_context>

<pallas_src>
from functools import partial

import jax
import jax.numpy as jnp
from jax.experimental import pallas as pl
from jax.experimental.pallas import tpu as pltpu

VOCAB = "0123456789abcdefghijklmnopqrstuvwxyzABCDEFGHIJKLMNOPQRSTUVWXYZ'-/ \t\n\r\x0b\x0c:"


# ------------------------------ fused kernel ------------------------------

def make_fused_kernel(T, B, Bp, H, L, V, Cpad):
    """One kernel: one-hot projection, L bidirectional LSTM layers, FC, log_softmax."""
    G4, G8 = 4 * H, 8 * H

    def kernel(*refs):
        ids_ref, len_ref = refs[0], refs[1]
        lyr = refs[2:2 + 3 * L]                     # per layer: wih_cat, b_cat, whh_bd
        h0_ref, c0_ref, fcw_ref, fcb_ref = refs[2 + 3 * L:6 + 3 * L]
        o_ref = refs[6 + 3 * L]
        sf_ref, sr_ref = refs[7 + 3 * L], refs[8 + 3 * L]   # VMEM streams (T*Bp, H)

        lens = len_ref[...]                          # (Bp, 1) int32; padded rows = 0

        for l in range(L):
            wih_ref, b_ref, whh_ref = lyr[3 * l], lyr[3 * l + 1], lyr[3 * l + 2]

            # ---- hoisted input projection for both directions (off the serial path)
            if l == 0:
                # one_hot(X) @ W_ih^T for fwd+rev at once: (T*Bp, V) @ (V, 8H)
                ids = ids_ref[...]                                       # (T*Bp, 1)
                col = jax.lax.broadcasted_iota(jnp.int32, (T * Bp, V), 1)
                onehot = (ids == col).astype(jnp.float32)
                xp_all = (jnp.dot(onehot, wih_ref[...],
                                  preferred_element_type=jnp.float32)
                          + b_ref[...])                                  # (T*Bp, 8H)
            else:
                sf = sf_ref[...]                                         # (T*Bp, H)
                sr = sr_ref[...]
                w = wih_ref[...]                                         # (2H, 8H)
                # [sf | sr] @ W  ==  sf @ W[:H] + sr @ W[H:]  (no concat materialized)
                xp_all = (jnp.dot(sf, w[0:H], preferred_element_type=jnp.float32)
                          + jnp.dot(sr, w[H:2 * H], preferred_element_type=jnp.float32)
                          + b_ref[...])
            xp_f = xp_all[:, 0:G4]                   # gate order i,f,g,o (PyTorch)
            xp_r = xp_all[:, G4:G8]

            whh = whh_ref[...]                       # (2H, 8H) block-diagonal
            h_f = h0_ref[2 * l]                      # (Bp, H)
            h_r = h0_ref[2 * l + 1]
            c_f = c0_ref[2 * l]
            c_r = c0_ref[2 * l + 1]

            # ---- serial recurrence, fully unrolled (T is small; see notes for large T)
            for i in range(T):
                tr = T - 1 - i
                h_cat = jnp.concatenate([h_f, h_r], axis=-1)             # (Bp, 2H)
                gates = (jnp.dot(h_cat, whh, preferred_element_type=jnp.float32)
                         + jnp.concatenate([xp_f[i * Bp:(i + 1) * Bp, :],
                                            xp_r[tr * Bp:(tr + 1) * Bp, :]],
                                           axis=-1))                      # (Bp, 8H)
                sg = jax.nn.sigmoid(gates)           # 1 EUP pass, both directions
                th = jnp.tanh(gates)                 # 1 EUP pass, both directions

                # forward direction, t = i: outputs past len[b] are zero
                cf = sg[:, H:2 * H] * c_f + sg[:, 0:H] * th[:, 2 * H:3 * H]
                hf = sg[:, 3 * H:4 * H] * jnp.tanh(cf)
                vf = i < lens
                h_f = jnp.where(vf, hf, h_f)
                c_f = jnp.where(vf, cf, c_f)
                sf_ref[i * Bp:(i + 1) * Bp, :] = jnp.where(vf, hf, 0.0)

                # reverse direction, t = tr: state frozen at init until t < len[b]
                cr = sg[:, 5 * H:6 * H] * c_r + sg[:, 4 * H:5 * H] * th[:, 6 * H:7 * H]
                hr = sg[:, 7 * H:8 * H] * jnp.tanh(cr)
                vr = tr < lens
                h_r = jnp.where(vr, hr, h_r)
                c_r = jnp.where(vr, cr, c_r)
                sr_ref[tr * Bp:(tr + 1) * Bp, :] = jnp.where(vr, hr, 0.0)

        # ---- FC + log_softmax (lane-dense: Cpad = 128 columns, pad bias ~ -1e30)
        sf = sf_ref[...]
        sr = sr_ref[...]
        w = fcw_ref[...]                             # (2H, Cpad)
        logits = (jnp.dot(sf, w[0:H], preferred_element_type=jnp.float32)
                  + jnp.dot(sr, w[H:2 * H], preferred_element_type=jnp.float32)
                  + fcb_ref[...])                    # (T*Bp, Cpad)
        m = jnp.max(logits, axis=-1, keepdims=True)
        z = logits - m
        lse = jnp.log(jnp.sum(jnp.exp(z), axis=-1, keepdims=True))
        logp = z - lse

        # batch-major emission (row = b*T + t), full-tile unmasked stores
        lp3 = logp.reshape(T, Bp, Cpad)
        for b in range(B):
            o_ref[b * T:(b + 1) * T, :] = lp3[:, b, :].astype(o_ref.dtype)

    return kernel


def _vmem_spec():
    return pl.BlockSpec(memory_space=pltpu.MemorySpace.VMEM)


# --------------------------- parameters & forward ---------------------------

def init_params(key, nb_layers, vocab_size, hidden, nb_tags):
    H = hidden
    scale = 1.0 / float(H ** 0.5)
    params = {'lstm': []}
    for layer in range(nb_layers):
        in_size = vocab_size if layer == 0 else 2 * H
        wih_t, whh_t, bias = [], [], []
        for _d in range(2):
            key, k1, k2, k3, k4 = jax.random.split(key, 5)
            w_ih = jax.random.uniform(k1, (4 * H, in_size), jnp.float32, -scale, scale)
            w_hh = jax.random.uniform(k2, (4 * H, H), jnp.float32, -scale, scale)
            b_ih = jax.random.uniform(k3, (4 * H,), jnp.float32, -scale, scale)
            b_hh = jax.random.uniform(k4, (4 * H,), jnp.float32, -scale, scale)
            wih_t.append(w_ih.T)                                 # (in, 4H)
            whh_t.append(w_hh.T)                                 # (H, 4H)
            bias.append((b_ih + b_hh).reshape(1, 4 * H))
        # both-direction input weights side by side -> one projection matmul
        wih_cat = jnp.concatenate(wih_t, axis=1)                 # (in, 8H)
        b_cat = jnp.concatenate(bias, axis=1)                    # (1, 8H)
        # block-diagonal recurrent weights: [h_f | h_r] @ whh_bd = [h_f@W_f | h_r@W_r]
        whh_bd = jnp.zeros((2 * H, 8 * H), jnp.float32)
        whh_bd = whh_bd.at[0:H, 0:4 * H].set(whh_t[0])
        whh_bd = whh_bd.at[H:2 * H, 4 * H:8 * H].set(whh_t[1])
        params['lstm'].append({'wih_cat': wih_cat, 'b_cat': b_cat, 'whh_bd': whh_bd})

    key, kw, kb = jax.random.split(key, 3)
    fscale = 1.0 / float((2 * H) ** 0.5)
    fc_w = jax.random.uniform(kw, (nb_tags, 2 * H), jnp.float32, -fscale, fscale)
    fc_b = jax.random.uniform(kb, (nb_tags,), jnp.float32, -fscale, fscale)
    # Lane-dense FC output: pad classes to 128; padded classes get a hugely
    # negative bias so they vanish under log_softmax (sliced off outside).
    c_pad = max(128, ((nb_tags + 127) // 128) * 128)
    params['fc_w_t_pad'] = (jnp.zeros((2 * H, c_pad), jnp.float32)
                            .at[:, :nb_tags].set(fc_w.T))
    params['fc_b_pad'] = (jnp.full((1, c_pad), -1e30, jnp.float32)
                          .at[0, :nb_tags].set(fc_b))
    return params


@partial(jax.jit, static_argnums=(5, 6, 7))
def dl_lstm_forward(params, h0, c0, X_ids, X_lengths, nb_layers, hidden, nb_tags):
    """X_ids: (B, T) int token ids; X_lengths: (B,), max(X_lengths) == T."""
    B, T = X_ids.shape
    H = hidden
    L = nb_layers
    V = params['lstm'][0]['wih_cat'].shape[0]
    Cpad = params['fc_w_t_pad'].shape[1]
    Bp = max(8, ((B + 7) // 8) * 8)          # pad batch to a full sublane group

    # Cheap jit-fused glue: batch-pad + time-major layout for ids/lengths/states.
    ids_p = jnp.zeros((Bp, T), jnp.int32).at[:B].set(X_ids.astype(jnp.int32))
    ids_tm = ids_p.T.reshape(T * Bp, 1)                      # row = t*Bp + b
    lens_p = jnp.zeros((Bp, 1), jnp.int32).at[:B, 0].set(X_lengths.astype(jnp.int32))
    h0_p = jnp.zeros((2 * L, Bp, H), jnp.float32).at[:, :B].set(h0)
    c0_p = jnp.zeros((2 * L, Bp, H), jnp.float32).at[:, :B].set(c0)

    args = [ids_tm, lens_p]
    for l in range(L):
        p = params['lstm'][l]
        args += [p['wih_cat'], p['b_cat'], p['whh_bd']]
    args += [h0_p, c0_p, params['fc_w_t_pad'], params['fc_b_pad']]

    logp = pl.pallas_call(
        make_fused_kernel(T, B, Bp, H, L, V, Cpad),
        out_shape=jax.ShapeDtypeStruct((B * T, Cpad), jnp.float32),
        in_specs=[_vmem_spec()] * len(args),
        out_specs=_vmem_spec(),
        scratch_shapes=[pltpu.VMEM((T * Bp, H), jnp.float32),   # fwd stream
                        pltpu.VMEM((T * Bp, H), jnp.float32)],  # rev stream
    )(*args)

    # Rows already ordered (batch, time) to match PyTorch batch_first .view(-1, C).
    return logp[:, :nb_tags]


# ----------------------------------- main -----------------------------------

if __name__ == "__main__":
    nb_layers = 2
    hidden = 32          # nb_lstm_units
    batch = 2
    seq = 8
    labels = {'PAD': 0, 'A': 1, 'B': 2, 'C': 3, 'D': 4, 'E': 5, 'F': 6, 'G': 7, 'H': 8}
    nb_tags = len(labels) - 1
    V = len(VOCAB)

    key = jax.random.PRNGKey(0)
    k_par, k_h, k_c, k_x = jax.random.split(key, 4)

    params = init_params(k_par, nb_layers, V, hidden, nb_tags)
    # init_hidden(): torch.randn each forward -> deterministic normal here.
    h0 = jax.random.normal(k_h, (nb_layers * 2, batch, hidden), jnp.float32)
    c0 = jax.random.normal(k_c, (nb_layers * 2, batch, hidden), jnp.float32)

    X = jax.random.randint(k_x, (batch, seq), 0, V, dtype=jnp.int32)
    X_lengths = jnp.array([seq, seq - 3], dtype=jnp.int32)   # sorted desc, max == seq

    out = dl_lstm_forward(params, h0, c0, X, X_lengths, nb_layers, hidden, nb_tags)
    out = jax.block_until_ready(out)

    assert out.shape == (batch * seq, nb_tags)
    # log_softmax sanity: rows exponentiate to a probability distribution.
    assert bool(jnp.allclose(jnp.sum(jnp.exp(out), axis=1), 1.0, atol=1e-4))
    print("KERNEL_OK")
</pallas_src>

<mosaic_0001>
module attributes {stable_mosaic.version = 11 : i64} {
  func.func @kernel(%arg0: memref<64x1xi32, #tpu.memory_space<vmem>>, %arg1: memref<8x1xi32, #tpu.memory_space<vmem>>, %arg2: memref<72x256xf32, #tpu.memory_space<vmem>>, %arg3: memref<1x256xf32, #tpu.memory_space<vmem>>, %arg4: memref<64x256xf32, #tpu.memory_space<vmem>>, %arg5: memref<64x256xf32, #tpu.memory_space<vmem>>, %arg6: memref<1x256xf32, #tpu.memory_space<vmem>>, %arg7: memref<64x256xf32, #tpu.memory_space<vmem>>, %arg8: memref<4x8x32xf32, #tpu.memory_space<vmem>>, %arg9: memref<4x8x32xf32, #tpu.memory_space<vmem>>, %arg10: memref<64x128xf32, #tpu.memory_space<vmem>>, %arg11: memref<1x128xf32, #tpu.memory_space<vmem>>, %arg12: memref<16x128xf32, #tpu.memory_space<vmem>>, %arg13: memref<64x32xf32, #tpu.memory_space<vmem>>, %arg14: memref<64x32xf32, #tpu.memory_space<vmem>>) attributes {dimension_semantics = [], scalar_prefetch = 0 : i64, scratch_operands = 2 : i64, tpu.core_type = #tpu.core_type<tc>} {
    %c0 = arith.constant 0 : index
    %c0_0 = arith.constant 0 : index
    %0 = vector.load %arg1[%c0, %c0_0] : memref<8x1xi32, #tpu.memory_space<vmem>>, vector<8x1xi32>
    %c0_1 = arith.constant 0 : index
    %c0_2 = arith.constant 0 : index
    %1 = vector.load %arg0[%c0_1, %c0_2] : memref<64x1xi32, #tpu.memory_space<vmem>>, vector<64x1xi32>
    %2 = tpu.iota {dimensions = array<i32: 1>} : vector<64x72xi32>
    %3 = vector.broadcast %1 : vector<64x1xi32> to vector<64x72xi32>
    %4 = arith.cmpi eq, %3, %2 : vector<64x72xi32>
    %5 = arith.extui %4 : vector<64x72xi1> to vector<64x72xi32>
    %6 = arith.sitofp %5 : vector<64x72xi32> to vector<64x72xf32>
    %c0_3 = arith.constant 0 : index
    %c0_4 = arith.constant 0 : index
    %7 = vector.load %arg2[%c0_3, %c0_4] : memref<72x256xf32, #tpu.memory_space<vmem>>, vector<72x256xf32>
    %cst = arith.constant dense<0.000000e+00> : vector<64x256xf32>
    %8 = tpu.matmul %6, %7, %cst {dimension_numbers = #tpu.dot_dimension_numbers<[1], [0], [0], [1], [0, 0, 1, 1], [], []>} : vector<64x72xf32>, vector<72x256xf32>, vector<64x256xf32> -> vector<64x256xf32>
    %c0_5 = arith.constant 0 : index
    %c0_6 = arith.constant 0 : index
    %9 = vector.load %arg3[%c0_5, %c0_6] : memref<1x256xf32, #tpu.memory_space<vmem>>, vector<1x256xf32>
    %10 = vector.broadcast %9 : vector<1x256xf32> to vector<64x256xf32>
    %11 = arith.addf %8, %10 : vector<64x256xf32>
    %12 = vector.extract_strided_slice %11 {offsets = [0, 0], sizes = [64, 128], strides = [1, 1]} : vector<64x256xf32> to vector<64x128xf32>
    %13 = vector.extract_strided_slice %11 {offsets = [0, 128], sizes = [64, 128], strides = [1, 1]} : vector<64x256xf32> to vector<64x128xf32>
    %c0_7 = arith.constant 0 : index
    %c0_8 = arith.constant 0 : index
    %14 = vector.load %arg4[%c0_7, %c0_8] : memref<64x256xf32, #tpu.memory_space<vmem>>, vector<64x256xf32>
    %c0_9 = arith.constant 0 : index
    %c0_10 = arith.constant 0 : index
    %c0_11 = arith.constant 0 : index
    %15 = vector.load %arg8[%c0_9, %c0_10, %c0_11] : memref<4x8x32xf32, #tpu.memory_space<vmem>>, vector<1x8x32xf32>
    %16 = vector.shape_cast %15 : vector<1x8x32xf32> to vector<8x32xf32>
    %c1 = arith.constant 1 : index
    %c0_12 = arith.constant 0 : index
    %c0_13 = arith.constant 0 : index
    %17 = vector.load %arg8[%c1, %c0_12, %c0_13] : memref<4x8x32xf32, #tpu.memory_space<vmem>>, vector<1x8x32xf32>
    %18 = vector.shape_cast %17 : vector<1x8x32xf32> to vector<8x32xf32>
    %c0_14 = arith.constant 0 : index
    %c0_15 = arith.constant 0 : index
    %c0_16 = arith.constant 0 : index
    %19 = vector.load %arg9[%c0_14, %c0_15, %c0_16] : memref<4x8x32xf32, #tpu.memory_space<vmem>>, vector<1x8x32xf32>
    %20 = vector.shape_cast %19 : vector<1x8x32xf32> to vector<8x32xf32>
    %c1_17 = arith.constant 1 : index
    %c0_18 = arith.constant 0 : index
    %c0_19 = arith.constant 0 : index
    %21 = vector.load %arg9[%c1_17, %c0_18, %c0_19] : memref<4x8x32xf32, #tpu.memory_space<vmem>>, vector<1x8x32xf32>
    %22 = vector.shape_cast %21 : vector<1x8x32xf32> to vector<8x32xf32>
    %23 = tpu.concatenate %16, %18 in 1 : vector<8x32xf32>, vector<8x32xf32> -> vector<8x64xf32>
    %cst_20 = arith.constant dense<0.000000e+00> : vector<8x256xf32>
    %24 = tpu.matmul %23, %14, %cst_20 {dimension_numbers = #tpu.dot_dimension_numbers<[1], [0], [0], [1], [0, 0, 1, 1], [], []>} : vector<8x64xf32>, vector<64x256xf32>, vector<8x256xf32> -> vector<8x256xf32>
    %25 = vector.extract_strided_slice %12 {offsets = [0, 0], sizes = [8, 128], strides = [1, 1]} : vector<64x128xf32> to vector<8x128xf32>
    %26 = vector.extract_strided_slice %13 {offsets = [56, 0], sizes = [8, 128], strides = [1, 1]} : vector<64x128xf32> to vector<8x128xf32>
    %27 = tpu.concatenate %25, %26 in 1 : vector<8x128xf32>, vector<8x128xf32> -> vector<8x256xf32>
    %28 = arith.addf %24, %27 : vector<8x256xf32>
    %29 = arith.negf %28 : vector<8x256xf32>
    %30 = math.exp %29 : vector<8x256xf32>
    %cst_21 = arith.constant 1.000000e+00 : f32
    %31 = vector.broadcast %cst_21 : f32 to vector<8x256xf32>
    %32 = arith.addf %31, %30 : vector<8x256xf32>
    %33 = arith.divf %31, %32 : vector<8x256xf32>
    %34 = math.tanh %28 : vector<8x256xf32>
    %35 = vector.extract_strided_slice %33 {offsets = [0, 32], sizes = [8, 32], strides = [1, 1]} : vector<8x256xf32> to vector<8x32xf32>
    %36 = arith.mulf %35, %20 : vector<8x32xf32>
    %37 = vector.extract_strided_slice %33 {offsets = [0, 0], sizes = [8, 32], strides = [1, 1]} : vector<8x256xf32> to vector<8x32xf32>
    %38 = vector.extract_strided_slice %34 {offsets = [0, 64], sizes = [8, 32], strides = [1, 1]} : vector<8x256xf32> to vector<8x32xf32>
    %39 = arith.mulf %37, %38 : vector<8x32xf32>
    %40 = arith.addf %36, %39 : vector<8x32xf32>
    %41 = vector.extract_strided_slice %33 {offsets = [0, 96], sizes = [8, 32], strides = [1, 1]} : vector<8x256xf32> to vector<8x32xf32>
    %42 = math.tanh %40 : vector<8x32xf32>
    %43 = arith.mulf %41, %42 : vector<8x32xf32>
    %c0_i32 = arith.constant 0 : i32
    %44 = vector.broadcast %c0_i32 : i32 to vector<8x1xi32>
    %45 = arith.cmpi sgt, %0, %44 : vector<8x1xi32>
    %46 = vector.shape_cast %45 : vector<8x1xi1> to vector<8x1xi1>
    %47 = vector.broadcast %46 : vector<8x1xi1> to vector<8x32xi1>
    %48 = arith.select %47, %43, %16 : vector<8x32xi1>, vector<8x32xf32>
    %49 = vector.shape_cast %45 : vector<8x1xi1> to vector<8x1xi1>
    %50 = vector.broadcast %49 : vector<8x1xi1> to vector<8x32xi1>
    %51 = arith.select %50, %40, %20 : vector<8x32xi1>, vector<8x32xf32>
    %cst_22 = arith.constant 0.000000e+00 : f32
    %52 = vector.shape_cast %45 : vector<8x1xi1> to vector<8x1xi1>
    %53 = vector.broadcast %52 : vector<8x1xi1> to vector<8x32xi1>
    %54 = vector.broadcast %cst_22 : f32 to vector<8x32xf32>
    %55 = arith.select %53, %43, %54 : vector<8x32xi1>, vector<8x32xf32>
    %c0_23 = arith.constant 0 : index
    %c0_24 = arith.constant 0 : index
    %56 = vector.load %arg13[%c0_23, %c0_24] : memref<64x32xf32, #tpu.memory_space<vmem>>, vector<8x32xf32>
    tpu.vector_store %arg13[%c0_23, %c0_24], %55 {strides = array<i32>} : memref<64x32xf32, #tpu.memory_space<vmem>>, vector<8x32xf32>,
    %57 = vector.extract_strided_slice %33 {offsets = [0, 160], sizes = [8, 32], strides = [1, 1]} : vector<8x256xf32> to vector<8x32xf32>
    %58 = arith.mulf %57, %22 : vector<8x32xf32>
    %59 = vector.extract_strided_slice %33 {offsets = [0, 128], sizes = [8, 32], strides = [1, 1]} : vector<8x256xf32> to vector<8x32xf32>
    %60 = vector.extract_strided_slice %34 {offsets = [0, 192], sizes = [8, 32], strides = [1, 1]} : vector<8x256xf32> to vector<8x32xf32>
    %61 = arith.mulf %59, %60 : vector<8x32xf32>
    %62 = arith.addf %58, %61 : vector<8x32xf32>
    %63 = vector.extract_strided_slice %33 {offsets = [0, 224], sizes = [8, 32], strides = [1, 1]} : vector<8x256xf32> to vector<8x32xf32>
    %64 = math.tanh %62 : vector<8x32xf32>
    %65 = arith.mulf %63, %64 : vector<8x32xf32>
    %c7_i32 = arith.constant 7 : i32
    %66 = vector.broadcast %c7_i32 : i32 to vector<8x1xi32>
    %67 = arith.cmpi sgt, %0, %66 : vector<8x1xi32>
    %68 = vector.shape_cast %67 : vector<8x1xi1> to vector<8x1xi1>
    %69 = vector.broadcast %68 : vector<8x1xi1> to vector<8x32xi1>
    %70 = arith.select %69, %65, %18 : vector<8x32xi1>, vector<8x32xf32>
    %71 = vector.shape_cast %67 : vector<8x1xi1> to vector<8x1xi1>
    %72 = vector.broadcast %71 : vector<8x1xi1> to vector<8x32xi1>
    %73 = arith.select %72, %62, %22 : vector<8x32xi1>, vector<8x32xf32>
    %cst_25 = arith.constant 0.000000e+00 : f32
    %74 = vector.shape_cast %67 : vector<8x1xi1> to vector<8x1xi1>
    %75 = vector.broadcast %74 : vector<8x1xi1> to vector<8x32xi1>
    %76 = vector.broadcast %cst_25 : f32 to vector<8x32xf32>
    %77 = arith.select %75, %65, %76 : vector<8x32xi1>, vector<8x32xf32>
    %c56 = arith.constant 56 : index
    %c0_26 = arith.constant 0 : index
    %78 = vector.load %arg14[%c56, %c0_26] : memref<64x32xf32, #tpu.memory_space<vmem>>, vector<8x32xf32>
    tpu.vector_store %arg14[%c56, %c0_26], %77 {strides = array<i32>} : memref<64x32xf32, #tpu.memory_space<vmem>>, vector<8x32xf32>,
    %79 = tpu.concatenate %48, %70 in 1 : vector<8x32xf32>, vector<8x32xf32> -> vector<8x64xf32>
    %cst_27 = arith.constant dense<0.000000e+00> : vector<8x256xf32>
    %80 = tpu.matmul %79, %14, %cst_27 {dimension_numbers = #tpu.dot_dimension_numbers<[1], [0], [0], [1], [0, 0, 1, 1], [], []>} : vector<8x64xf32>, vector<64x256xf32>, vector<8x256xf32> -> vector<8x256xf32>
    %81 = vector.extract_strided_slice %12 {offsets = [8, 0], sizes = [8, 128], strides = [1, 1]} : vector<64x128xf32> to vector<8x128xf32>
    %82 = vector.extract_strided_slice %13 {offsets = [48, 0], sizes = [8, 128], strides = [1, 1]} : vector<64x128xf32> to vector<8x128xf32>
    %83 = tpu.concatenate %81, %82 in 1 : vector<8x128xf32>, vector<8x128xf32> -> vector<8x256xf32>
    %84 = arith.addf %80, %83 : vector<8x256xf32>
    %85 = arith.negf %84 : vector<8x256xf32>
    %86 = math.exp %85 : vector<8x256xf32>
    %cst_28 = arith.constant 1.000000e+00 : f32
    %87 = vector.broadcast %cst_28 : f32 to vector<8x256xf32>
    %88 = arith.addf %87, %86 : vector<8x256xf32>
    %89 = arith.divf %87, %88 : vector<8x256xf32>
    %90 = math.tanh %84 : vector<8x256xf32>
    %91 = vector.extract_strided_slice %89 {offsets = [0, 32], sizes = [8, 32], strides = [1, 1]} : vector<8x256xf32> to vector<8x32xf32>
    %92 = arith.mulf %91, %51 : vector<8x32xf32>
    %93 = vector.extract_strided_slice %89 {offsets = [0, 0], sizes = [8, 32], strides = [1, 1]} : vector<8x256xf32> to vector<8x32xf32>
    %94 = vector.extract_strided_slice %90 {offsets = [0, 64], sizes = [8, 32], strides = [1, 1]} : vector<8x256xf32> to vector<8x32xf32>
    %95 = arith.mulf %93, %94 : vector<8x32xf32>
    %96 = arith.addf %92, %95 : vector<8x32xf32>
    %97 = vector.extract_strided_slice %89 {offsets = [0, 96], sizes = [8, 32], strides = [1, 1]} : vector<8x256xf32> to vector<8x32xf32>
    %98 = math.tanh %96 : vector<8x32xf32>
    %99 = arith.mulf %97, %98 : vector<8x32xf32>
    %c1_i32 = arith.constant 1 : i32
    %100 = vector.broadcast %c1_i32 : i32 to vector<8x1xi32>
    %101 = arith.cmpi sgt, %0, %100 : vector<8x1xi32>
    %102 = vector.shape_cast %101 : vector<8x1xi1> to vector<8x1xi1>
    %103 = vector.broadcast %102 : vector<8x1xi1> to vector<8x32xi1>
    %104 = arith.select %103, %99, %48 : vector<8x32xi1>, vector<8x32xf32>
    %105 = vector.shape_cast %101 : vector<8x1xi1> to vector<8x1xi1>
    %106 = vector.broadcast %105 : vector<8x1xi1> to vector<8x32xi1>
    %107 = arith.select %106, %96, %51 : vector<8x32xi1>, vector<8x32xf32>
    %cst_29 = arith.constant 0.000000e+00 : f32
    %108 = vector.shape_cast %101 : vector<8x1xi1> to vector<8x1xi1>
    %109 = vector.broadcast %108 : vector<8x1xi1> to vector<8x32xi1>
    %110 = vector.broadcast %cst_29 : f32 to vector<8x32xf32>
    %111 = arith.select %109, %99, %110 : vector<8x32xi1>, vector<8x32xf32>
    %c8 = arith.constant 8 : index
    %c0_30 = arith.constant 0 : index
    %112 = vector.load %arg13[%c8, %c0_30] : memref<64x32xf32, #tpu.memory_space<vmem>>, vector<8x32xf32>
    tpu.vector_store %arg13[%c8, %c0_30], %111 {strides = array<i32>} : memref<64x32xf32, #tpu.memory_space<vmem>>, vector<8x32xf32>,
    %113 = vector.extract_strided_slice %89 {offsets = [0, 160], sizes = [8, 32], strides = [1, 1]} : vector<8x256xf32> to vector<8x32xf32>
    %114 = arith.mulf %113, %73 : vector<8x32xf32>
    %115 = vector.extract_strided_slice %89 {offsets = [0, 128], sizes = [8, 32], strides = [1, 1]} : vector<8x256xf32> to vector<8x32xf32>
    %116 = vector.extract_strided_slice %90 {offsets = [0, 192], sizes = [8, 32], strides = [1, 1]} : vector<8x256xf32> to vector<8x32xf32>
    %117 = arith.mulf %115, %116 : vector<8x32xf32>
    %118 = arith.addf %114, %117 : vector<8x32xf32>
    %119 = vector.extract_strided_slice %89 {offsets = [0, 224], sizes = [8, 32], strides = [1, 1]} : vector<8x256xf32> to vector<8x32xf32>
    %120 = math.tanh %118 : vector<8x32xf32>
    %121 = arith.mulf %119, %120 : vector<8x32xf32>
    %c6_i32 = arith.constant 6 : i32
    %122 = vector.broadcast %c6_i32 : i32 to vector<8x1xi32>
    %123 = arith.cmpi sgt, %0, %122 : vector<8x1xi32>
    %124 = vector.shape_cast %123 : vector<8x1xi1> to vector<8x1xi1>
    %125 = vector.broadcast %124 : vector<8x1xi1> to vector<8x32xi1>
    %126 = arith.select %125, %121, %70 : vector<8x32xi1>, vector<8x32xf32>
    %127 = vector.shape_cast %123 : vector<8x1xi1> to vector<8x1xi1>
    %128 = vector.broadcast %127 : vector<8x1xi1> to vector<8x32xi1>
    %129 = arith.select %128, %118, %73 : vector<8x32xi1>, vector<8x32xf32>
    %cst_31 = arith.constant 0.000000e+00 : f32
    %130 = vector.shape_cast %123 : vector<8x1xi1> to vector<8x1xi1>
    %131 = vector.broadcast %130 : vector<8x1xi1> to vector<8x32xi1>
    %132 = vector.broadcast %cst_31 : f32 to vector<8x32xf32>
    %133 = arith.select %131, %121, %132 : vector<8x32xi1>, vector<8x32xf32>
    %c48 = arith.constant 48 : index
    %c0_32 = arith.constant 0 : index
    %134 = vector.load %arg14[%c48, %c0_32] : memref<64x32xf32, #tpu.memory_space<vmem>>, vector<8x32xf32>
    tpu.vector_store %arg14[%c48, %c0_32], %133 {strides = array<i32>} : memref<64x32xf32, #tpu.memory_space<vmem>>, vector<8x32xf32>,
    %135 = tpu.concatenate %104, %126 in 1 : vector<8x32xf32>, vector<8x32xf32> -> vector<8x64xf32>
    %cst_33 = arith.constant dense<0.000000e+00> : vector<8x256xf32>
    %136 = tpu.matmul %135, %14, %cst_33 {dimension_numbers = #tpu.dot_dimension_numbers<[1], [0], [0], [1], [0, 0, 1, 1], [], []>} : vector<8x64xf32>, vector<64x256xf32>, vector<8x256xf32> -> vector<8x256xf32>
    %137 = vector.extract_strided_slice %12 {offsets = [16, 0], sizes = [8, 128], strides = [1, 1]} : vector<64x128xf32> to vector<8x128xf32>
    %138 = vector.extract_strided_slice %13 {offsets = [40, 0], sizes = [8, 128], strides = [1, 1]} : vector<64x128xf32> to vector<8x128xf32>
    %139 = tpu.concatenate %137, %138 in 1 : vector<8x128xf32>, vector<8x128xf32> -> vector<8x256xf32>
    %140 = arith.addf %136, %139 : vector<8x256xf32>
    %141 = arith.negf %140 : vector<8x256xf32>
    %142 = math.exp %141 : vector<8x256xf32>
    %cst_34 = arith.constant 1.000000e+00 : f32
    %143 = vector.broadcast %cst_34 : f32 to vector<8x256xf32>
    %144 = arith.addf %143, %142 : vector<8x256xf32>
    %145 = arith.divf %143, %144 : vector<8x256xf32>
    %146 = math.tanh %140 : vector<8x256xf32>
    %147 = vector.extract_strided_slice %145 {offsets = [0, 32], sizes = [8, 32], strides = [1, 1]} : vector<8x256xf32> to vector<8x32xf32>
    %148 = arith.mulf %147, %107 : vector<8x32xf32>
    %149 = vector.extract_strided_slice %145 {offsets = [0, 0], sizes = [8, 32], strides = [1, 1]} : vector<8x256xf32> to vector<8x32xf32>
    %150 = vector.extract_strided_slice %146 {offsets = [0, 64], sizes = [8, 32], strides = [1, 1]} : vector<8x256xf32> to vector<8x32xf32>
    %151 = arith.mulf %149, %150 : vector<8x32xf32>
    %152 = arith.addf %148, %151 : vector<8x32xf32>
    %153 = vector.extract_strided_slice %145 {offsets = [0, 96], sizes = [8, 32], strides = [1, 1]} : vector<8x256xf32> to vector<8x32xf32>
    %154 = math.tanh %152 : vector<8x32xf32>
    %155 = arith.mulf %153, %154 : vector<8x32xf32>
    %c2_i32 = arith.constant 2 : i32
    %156 = vector.broadcast %c2_i32 : i32 to vector<8x1xi32>
    %157 = arith.cmpi sgt, %0, %156 : vector<8x1xi32>
    %158 = vector.shape_cast %157 : vector<8x1xi1> to vector<8x1xi1>
    %159 = vector.broadcast %158 : vector<8x1xi1> to vector<8x32xi1>
    %160 = arith.select %159, %155, %104 : vector<8x32xi1>, vector<8x32xf32>
    %161 = vector.shape_cast %157 : vector<8x1xi1> to vector<8x1xi1>
    %162 = vector.broadcast %161 : vector<8x1xi1> to vector<8x32xi1>
    %163 = arith.select %162, %152, %107 : vector<8x32xi1>, vector<8x32xf32>
    %cst_35 = arith.constant 0.000000e+00 : f32
    %164 = vector.shape_cast %157 : vector<8x1xi1> to vector<8x1xi1>
    %165 = vector.broadcast %164 : vector<8x1xi1> to vector<8x32xi1>
    %166 = vector.broadcast %cst_35 : f32 to vector<8x32xf32>
    %167 = arith.select %165, %155, %166 : vector<8x32xi1>, vector<8x32xf32>
    %c16 = arith.constant 16 : index
    %c0_36 = arith.constant 0 : index
    %168 = vector.load %arg13[%c16, %c0_36] : memref<64x32xf32, #tpu.memory_space<vmem>>, vector<8x32xf32>
    tpu.vector_store %arg13[%c16, %c0_36], %167 {strides = array<i32>} : memref<64x32xf32, #tpu.memory_space<vmem>>, vector<8x32xf32>,
    %169 = vector.extract_strided_slice %145 {offsets = [0, 160], sizes = [8, 32], strides = [1, 1]} : vector<8x256xf32> to vector<8x32xf32>
    %170 = arith.mulf %169, %129 : vector<8x32xf32>
    %171 = vector.extract_strided_slice %145 {offsets = [0, 128], sizes = [8, 32], strides = [1, 1]} : vector<8x256xf32> to vector<8x32xf32>
    %172 = vector.extract_strided_slice %146 {offsets = [0, 192], sizes = [8, 32], strides = [1, 1]} : vector<8x256xf32> to vector<8x32xf32>
    %173 = arith.mulf %171, %172 : vector<8x32xf32>
    %174 = arith.addf %170, %173 : vector<8x32xf32>
    %175 = vector.extract_strided_slice %145 {offsets = [0, 224], sizes = [8, 32], strides = [1, 1]} : vector<8x256xf32> to vector<8x32xf32>
    %176 = math.tanh %174 : vector<8x32xf32>
    %177 = arith.mulf %175, %176 : vector<8x32xf32>
    %c5_i32 = arith.constant 5 : i32
    %178 = vector.broadcast %c5_i32 : i32 to vector<8x1xi32>
    %179 = arith.cmpi sgt, %0, %178 : vector<8x1xi32>
    %180 = vector.shape_cast %179 : vector<8x1xi1> to vector<8x1xi1>
    %181 = vector.broadcast %180 : vector<8x1xi1> to vector<8x32xi1>
    %182 = arith.select %181, %177, %126 : vector<8x32xi1>, vector<8x32xf32>
    %183 = vector.shape_cast %179 : vector<8x1xi1> to vector<8x1xi1>
    %184 = vector.broadcast %183 : vector<8x1xi1> to vector<8x32xi1>
    %185 = arith.select %184, %174, %129 : vector<8x32xi1>, vector<8x32xf32>
    %cst_37 = arith.constant 0.000000e+00 : f32
    %186 = vector.shape_cast %179 : vector<8x1xi1> to vector<8x1xi1>
    %187 = vector.broadcast %186 : vector<8x1xi1> to vector<8x32xi1>
    %188 = vector.broadcast %cst_37 : f32 to vector<8x32xf32>
    %189 = arith.select %187, %177, %188 : vector<8x32xi1>, vector<8x32xf32>
    %c40 = arith.constant 40 : index
    %c0_38 = arith.constant 0 : index
    %190 = vector.load %arg14[%c40, %c0_38] : memref<64x32xf32, #tpu.memory_space<vmem>>, vector<8x32xf32>
    tpu.vector_store %arg14[%c40, %c0_38], %189 {strides = array<i32>} : memref<64x32xf32, #tpu.memory_space<vmem>>, vector<8x32xf32>,
    %191 = tpu.concatenate %160, %182 in 1 : vector<8x32xf32>, vector<8x32xf32> -> vector<8x64xf32>
    %cst_39 = arith.constant dense<0.000000e+00> : vector<8x256xf32>
    %192 = tpu.matmul %191, %14, %cst_39 {dimension_numbers = #tpu.dot_dimension_numbers<[1], [0], [0], [1], [0, 0, 1, 1], [], []>} : vector<8x64xf32>, vector<64x256xf32>, vector<8x256xf32> -> vector<8x256xf32>
    %193 = vector.extract_strided_slice %12 {offsets = [24, 0], sizes = [8, 128], strides = [1, 1]} : vector<64x128xf32> to vector<8x128xf32>
    %194 = vector.extract_strided_slice %13 {offsets = [32, 0], sizes = [8, 128], strides = [1, 1]} : vector<64x128xf32> to vector<8x128xf32>
    %195 = tpu.concatenate %193, %194 in 1 : vector<8x128xf32>, vector<8x128xf32> -> vector<8x256xf32>
    %196 = arith.addf %192, %195 : vector<8x256xf32>
    %197 = arith.negf %196 : vector<8x256xf32>
    %198 = math.exp %197 : vector<8x256xf32>
    %cst_40 = arith.constant 1.000000e+00 : f32
    %199 = vector.broadcast %cst_40 : f32 to vector<8x256xf32>
    %200 = arith.addf %199, %198 : vector<8x256xf32>
    %201 = arith.divf %199, %200 : vector<8x256xf32>
    %202 = math.tanh %196 : vector<8x256xf32>
    %203 = vector.extract_strided_slice %201 {offsets = [0, 32], sizes = [8, 32], strides = [1, 1]} : vector<8x256xf32> to vector<8x32xf32>
    %204 = arith.mulf %203, %163 : vector<8x32xf32>
    %205 = vector.extract_strided_slice %201 {offsets = [0, 0], sizes = [8, 32], strides = [1, 1]} : vector<8x256xf32> to vector<8x32xf32>
    %206 = vector.extract_strided_slice %202 {offsets = [0, 64], sizes = [8, 32], strides = [1, 1]} : vector<8x256xf32> to vector<8x32xf32>
    %207 = arith.mulf %205, %206 : vector<8x32xf32>
    %208 = arith.addf %204, %207 : vector<8x32xf32>
    %209 = vector.extract_strided_slice %201 {offsets = [0, 96], sizes = [8, 32], strides = [1, 1]} : vector<8x256xf32> to vector<8x32xf32>
    %210 = math.tanh %208 : vector<8x32xf32>
    %211 = arith.mulf %209, %210 : vector<8x32xf32>
    %c3_i32 = arith.constant 3 : i32
    %212 = vector.broadcast %c3_i32 : i32 to vector<8x1xi32>
    %213 = arith.cmpi sgt, %0, %212 : vector<8x1xi32>
    %214 = vector.shape_cast %213 : vector<8x1xi1> to vector<8x1xi1>
    %215 = vector.broadcast %214 : vector<8x1xi1> to vector<8x32xi1>
    %216 = arith.select %215, %211, %160 : vector<8x32xi1>, vector<8x32xf32>
    %217 = vector.shape_cast %213 : vector<8x1xi1> to vector<8x1xi1>
    %218 = vector.broadcast %217 : vector<8x1xi1> to vector<8x32xi1>
    %219 = arith.select %218, %208, %163 : vector<8x32xi1>, vector<8x32xf32>
    %cst_41 = arith.constant 0.000000e+00 : f32
    %220 = vector.shape_cast %213 : vector<8x1xi1> to vector<8x1xi1>
    %221 = vector.broadcast %220 : vector<8x1xi1> to vector<8x32xi1>
    %222 = vector.broadcast %cst_41 : f32 to vector<8x32xf32>
    %223 = arith.select %221, %211, %222 : vector<8x32xi1>, vector<8x32xf32>
    %c24 = arith.constant 24 : index
    %c0_42 = arith.constant 0 : index
    %224 = vector.load %arg13[%c24, %c0_42] : memref<64x32xf32, #tpu.memory_space<vmem>>, vector<8x32xf32>
    tpu.vector_store %arg13[%c24, %c0_42], %223 {strides = array<i32>} : memref<64x32xf32, #tpu.memory_space<vmem>>, vector<8x32xf32>,
    %225 = vector.extract_strided_slice %201 {offsets = [0, 160], sizes = [8, 32], strides = [1, 1]} : vector<8x256xf32> to vector<8x32xf32>
    %226 = arith.mulf %225, %185 : vector<8x32xf32>
    %227 = vector.extract_strided_slice %201 {offsets = [0, 128], sizes = [8, 32], strides = [1, 1]} : vector<8x256xf32> to vector<8x32xf32>
    %228 = vector.extract_strided_slice %202 {offsets = [0, 192], sizes = [8, 32], strides = [1, 1]} : vector<8x256xf32> to vector<8x32xf32>
    %229 = arith.mulf %227, %228 : vector<8x32xf32>
    %230 = arith.addf %226, %229 : vector<8x32xf32>
    %231 = vector.extract_strided_slice %201 {offsets = [0, 224], sizes = [8, 32], strides = [1, 1]} : vector<8x256xf32> to vector<8x32xf32>
    %232 = math.tanh %230 : vector<8x32xf32>
    %233 = arith.mulf %231, %232 : vector<8x32xf32>
    %c4_i32 = arith.constant 4 : i32
    %234 = vector.broadcast %c4_i32 : i32 to vector<8x1xi32>
    %235 = arith.cmpi sgt, %0, %234 : vector<8x1xi32>
    %236 = vector.shape_cast %235 : vector<8x1xi1> to vector<8x1xi1>
    %237 = vector.broadcast %236 : vector<8x1xi1> to vector<8x32xi1>
    %238 = arith.select %237, %233, %182 : vector<8x32xi1>, vector<8x32xf32>
    %239 = vector.shape_cast %235 : vector<8x1xi1> to vector<8x1xi1>
    %240 = vector.broadcast %239 : vector<8x1xi1> to vector<8x32xi1>
    %241 = arith.select %240, %230, %185 : vector<8x32xi1>, vector<8x32xf32>
    %cst_43 = arith.constant 0.000000e+00 : f32
    %242 = vector.shape_cast %235 : vector<8x1xi1> to vector<8x1xi1>
    %243 = vector.broadcast %242 : vector<8x1xi1> to vector<8x32xi1>
    %244 = vector.broadcast %cst_43 : f32 to vector<8x32xf32>
    %245 = arith.select %243, %233, %244 : vector<8x32xi1>, vector<8x32xf32>
    %c32 = arith.constant 32 : index
    %c0_44 = arith.constant 0 : index
    %246 = vector.load %arg14[%c32, %c0_44] : memref<64x32xf32, #tpu.memory_space<vmem>>, vector<8x32xf32>
    tpu.vector_store %arg14[%c32, %c0_44], %245 {strides = array<i32>} : memref<64x32xf32, #tpu.memory_space<vmem>>, vector<8x32xf32>,
    %247 = tpu.concatenate %216, %238 in 1 : vector<8x32xf32>, vector<8x32xf32> -> vector<8x64xf32>
    %cst_45 = arith.constant dense<0.000000e+00> : vector<8x256xf32>
    %248 = tpu.matmul %247, %14, %cst_45 {dimension_numbers = #tpu.dot_dimension_numbers<[1], [0], [0], [1], [0, 0, 1, 1], [], []>} : vector<8x64xf32>, vector<64x256xf32>, vector<8x256xf32> -> vector<8x256xf32>
    %249 = vector.extract_strided_slice %12 {offsets = [32, 0], sizes = [8, 128], strides = [1, 1]} : vector<64x128xf32> to vector<8x128xf32>
    %250 = vector.extract_strided_slice %13 {offsets = [24, 0], sizes = [8, 128], strides = [1, 1]} : vector<64x128xf32> to vector<8x128xf32>
    %251 = tpu.concatenate %249, %250 in 1 : vector<8x128xf32>, vector<8x128xf32> -> vector<8x256xf32>
    %252 = arith.addf %248, %251 : vector<8x256xf32>
    %253 = arith.negf %252 : vector<8x256xf32>
    %254 = math.exp %253 : vector<8x256xf32>
    %cst_46 = arith.constant 1.000000e+00 : f32
    %255 = vector.broadcast %cst_46 : f32 to vector<8x256xf32>
    %256 = arith.addf %255, %254 : vector<8x256xf32>
    %257 = arith.divf %255, %256 : vector<8x256xf32>
    %258 = math.tanh %252 : vector<8x256xf32>
    %259 = vector.extract_strided_slice %257 {offsets = [0, 32], sizes = [8, 32], strides = [1, 1]} : vector<8x256xf32> to vector<8x32xf32>
    %260 = arith.mulf %259, %219 : vector<8x32xf32>
    %261 = vector.extract_strided_slice %257 {offsets = [0, 0], sizes = [8, 32], strides = [1, 1]} : vector<8x256xf32> to vector<8x32xf32>
    %262 = vector.extract_strided_slice %258 {offsets = [0, 64], sizes = [8, 32], strides = [1, 1]} : vector<8x256xf32> to vector<8x32xf32>
    %263 = arith.mulf %261, %262 : vector<8x32xf32>
    %264 = arith.addf %260, %263 : vector<8x32xf32>
    %265 = vector.extract_strided_slice %257 {offsets = [0, 96], sizes = [8, 32], strides = [1, 1]} : vector<8x256xf32> to vector<8x32xf32>
    %266 = math.tanh %264 : vector<8x32xf32>
    %267 = arith.mulf %265, %266 : vector<8x32xf32>
    %c4_i32_47 = arith.constant 4 : i32
    %268 = vector.broadcast %c4_i32_47 : i32 to vector<8x1xi32>
    %269 = arith.cmpi sgt, %0, %268 : vector<8x1xi32>
    %270 = vector.shape_cast %269 : vector<8x1xi1> to vector<8x1xi1>
    %271 = vector.broadcast %270 : vector<8x1xi1> to vector<8x32xi1>
    %272 = arith.select %271, %267, %216 : vector<8x32xi1>, vector<8x32xf32>
    %273 = vector.shape_cast %269 : vector<8x1xi1> to vector<8x1xi1>
    %274 = vector.broadcast %273 : vector<8x1xi1> to vector<8x32xi1>
    %275 = arith.select %274, %264, %219 : vector<8x32xi1>, vector<8x32xf32>
    %cst_48 = arith.constant 0.000000e+00 : f32
    %276 = vector.shape_cast %269 : vector<8x1xi1> to vector<8x1xi1>
    %277 = vector.broadcast %276 : vector<8x1xi1> to vector<8x32xi1>
    %278 = vector.broadcast %cst_48 : f32 to vector<8x32xf32>
    %279 = arith.select %277, %267, %278 : vector<8x32xi1>, vector<8x32xf32>
    %c32_49 = arith.constant 32 : index
    %c0_50 = arith.constant 0 : index
    %280 = vector.load %arg13[%c32_49, %c0_50] : memref<64x32xf32, #tpu.memory_space<vmem>>, vector<8x32xf32>
    tpu.vector_store %arg13[%c32_49, %c0_50], %279 {strides = array<i32>} : memref<64x32xf32, #tpu.memory_space<vmem>>, vector<8x32xf32>,
    %281 = vector.extract_strided_slice %257 {offsets = [0, 160], sizes = [8, 32], strides = [1, 1]} : vector<8x256xf32> to vector<8x32xf32>
    %282 = arith.mulf %281, %241 : vector<8x32xf32>
    %283 = vector.extract_strided_slice %257 {offsets = [0, 128], sizes = [8, 32], strides = [1, 1]} : vector<8x256xf32> to vector<8x32xf32>
    %284 = vector.extract_strided_slice %258 {offsets = [0, 192], sizes = [8, 32], strides = [1, 1]} : vector<8x256xf32> to vector<8x32xf32>
    %285 = arith.mulf %283, %284 : vector<8x32xf32>
    %286 = arith.addf %282, %285 : vector<8x32xf32>
    %287 = vector.extract_strided_slice %257 {offsets = [0, 224], sizes = [8, 32], strides = [1, 1]} : vector<8x256xf32> to vector<8x32xf32>
    %288 = math.tanh %286 : vector<8x32xf32>
    %289 = arith.mulf %287, %288 : vector<8x32xf32>
    %c3_i32_51 = arith.constant 3 : i32
    %290 = vector.broadcast %c3_i32_51 : i32 to vector<8x1xi32>
    %291 = arith.cmpi sgt, %0, %290 : vector<8x1xi32>
    %292 = vector.shape_cast %291 : vector<8x1xi1> to vector<8x1xi1>
    %293 = vector.broadcast %292 : vector<8x1xi1> to vector<8x32xi1>
    %294 = arith.select %293, %289, %238 : vector<8x32xi1>, vector<8x32xf32>
    %295 = vector.shape_cast %291 : vector<8x1xi1> to vector<8x1xi1>
    %296 = vector.broadcast %295 : vector<8x1xi1> to vector<8x32xi1>
    %297 = arith.select %296, %286, %241 : vector<8x32xi1>, vector<8x32xf32>
    %cst_52 = arith.constant 0.000000e+00 : f32
    %298 = vector.shape_cast %291 : vector<8x1xi1> to vector<8x1xi1>
    %299 = vector.broadcast %298 : vector<8x1xi1> to vector<8x32xi1>
    %300 = vector.broadcast %cst_52 : f32 to vector<8x32xf32>
    %301 = arith.select %299, %289, %300 : vector<8x32xi1>, vector<8x32xf32>
    %c24_53 = arith.constant 24 : index
    %c0_54 = arith.constant 0 : index
    %302 = vector.load %arg14[%c24_53, %c0_54] : memref<64x32xf32, #tpu.memory_space<vmem>>, vector<8x32xf32>
    tpu.vector_store %arg14[%c24_53, %c0_54], %301 {strides = array<i32>} : memref<64x32xf32, #tpu.memory_space<vmem>>, vector<8x32xf32>,
    %303 = tpu.concatenate %272, %294 in 1 : vector<8x32xf32>, vector<8x32xf32> -> vector<8x64xf32>
    %cst_55 = arith.constant dense<0.000000e+00> : vector<8x256xf32>
    %304 = tpu.matmul %303, %14, %cst_55 {dimension_numbers = #tpu.dot_dimension_numbers<[1], [0], [0], [1], [0, 0, 1, 1], [], []>} : vector<8x64xf32>, vector<64x256xf32>, vector<8x256xf32> -> vector<8x256xf32>
    %305 = vector.extract_strided_slice %12 {offsets = [40, 0], sizes = [8, 128], strides = [1, 1]} : vector<64x128xf32> to vector<8x128xf32>
    %306 = vector.extract_strided_slice %13 {offsets = [16, 0], sizes = [8, 128], strides = [1, 1]} : vector<64x128xf32> to vector<8x128xf32>
    %307 = tpu.concatenate %305, %306 in 1 : vector<8x128xf32>, vector<8x128xf32> -> vector<8x256xf32>
    %308 = arith.addf %304, %307 : vector<8x256xf32>
    %309 = arith.negf %308 : vector<8x256xf32>
    %310 = math.exp %309 : vector<8x256xf32>
    %cst_56 = arith.constant 1.000000e+00 : f32
    %311 = vector.broadcast %cst_56 : f32 to vector<8x256xf32>
    %312 = arith.addf %311, %310 : vector<8x256xf32>
    %313 = arith.divf %311, %312 : vector<8x256xf32>
    %314 = math.tanh %308 : vector<8x256xf32>
    %315 = vector.extract_strided_slice %313 {offsets = [0, 32], sizes = [8, 32], strides = [1, 1]} : vector<8x256xf32> to vector<8x32xf32>
    %316 = arith.mulf %315, %275 : vector<8x32xf32>
    %317 = vector.extract_strided_slice %313 {offsets = [0, 0], sizes = [8, 32], strides = [1, 1]} : vector<8x256xf32> to vector<8x32xf32>
    %318 = vector.extract_strided_slice %314 {offsets = [0, 64], sizes = [8, 32], strides = [1, 1]} : vector<8x256xf32> to vector<8x32xf32>
    %319 = arith.mulf %317, %318 : vector<8x32xf32>
    %320 = arith.addf %316, %319 : vector<8x32xf32>
    %321 = vector.extract_strided_slice %313 {offsets = [0, 96], sizes = [8, 32], strides = [1, 1]} : vector<8x256xf32> to vector<8x32xf32>
    %322 = math.tanh %320 : vector<8x32xf32>
    %323 = arith.mulf %321, %322 : vector<8x32xf32>
    %c5_i32_57 = arith.constant 5 : i32
    %324 = vector.broadcast %c5_i32_57 : i32 to vector<8x1xi32>
    %325 = arith.cmpi sgt, %0, %324 : vector<8x1xi32>
    %326 = vector.shape_cast %325 : vector<8x1xi1> to vector<8x1xi1>
    %327 = vector.broadcast %326 : vector<8x1xi1> to vector<8x32xi1>
    %328 = arith.select %327, %323, %272 : vector<8x32xi1>, vector<8x32xf32>
    %329 = vector.shape_cast %325 : vector<8x1xi1> to vector<8x1xi1>
    %330 = vector.broadcast %329 : vector<8x1xi1> to vector<8x32xi1>
    %331 = arith.select %330, %320, %275 : vector<8x32xi1>, vector<8x32xf32>
    %cst_58 = arith.constant 0.000000e+00 : f32
    %332 = vector.shape_cast %325 : vector<8x1xi1> to vector<8x1xi1>
    %333 = vector.broadcast %332 : vector<8x1xi1> to vector<8x32xi1>
    %334 = vector.broadcast %cst_58 : f32 to vector<8x32xf32>
    %335 = arith.select %333, %323, %334 : vector<8x32xi1>, vector<8x32xf32>
    %c40_59 = arith.constant 40 : index
    %c0_60 = arith.constant 0 : index
    %336 = vector.load %arg13[%c40_59, %c0_60] : memref<64x32xf32, #tpu.memory_space<vmem>>, vector<8x32xf32>
    tpu.vector_store %arg13[%c40_59, %c0_60], %335 {strides = array<i32>} : memref<64x32xf32, #tpu.memory_space<vmem>>, vector<8x32xf32>,
    %337 = vector.extract_strided_slice %313 {offsets = [0, 160], sizes = [8, 32], strides = [1, 1]} : vector<8x256xf32> to vector<8x32xf32>
    %338 = arith.mulf %337, %297 : vector<8x32xf32>
    %339 = vector.extract_strided_slice %313 {offsets = [0, 128], sizes = [8, 32], strides = [1, 1]} : vector<8x256xf32> to vector<8x32xf32>
    %340 = vector.extract_strided_slice %314 {offsets = [0, 192], sizes = [8, 32], strides = [1, 1]} : vector<8x256xf32> to vector<8x32xf32>
    %341 = arith.mulf %339, %340 : vector<8x32xf32>
    %342 = arith.addf %338, %341 : vector<8x32xf32>
    %343 = vector.extract_strided_slice %313 {offsets = [0, 224], sizes = [8, 32], strides = [1, 1]} : vector<8x256xf32> to vector<8x32xf32>
    %344 = math.tanh %342 : vector<8x32xf32>
    %345 = arith.mulf %343, %344 : vector<8x32xf32>
    %c2_i32_61 = arith.constant 2 : i32
    %346 = vector.broadcast %c2_i32_61 : i32 to vector<8x1xi32>
    %347 = arith.cmpi sgt, %0, %346 : vector<8x1xi32>
    %348 = vector.shape_cast %347 : vector<8x1xi1> to vector<8x1xi1>
    %349 = vector.broadcast %348 : vector<8x1xi1> to vector<8x32xi1>
    %350 = arith.select %349, %345, %294 : vector<8x32xi1>, vector<8x32xf32>
    %351 = vector.shape_cast %347 : vector<8x1xi1> to vector<8x1xi1>
    %352 = vector.broadcast %351 : vector<8x1xi1> to vector<8x32xi1>
    %353 = arith.select %352, %342, %297 : vector<8x32xi1>, vector<8x32xf32>
    %cst_62 = arith.constant 0.000000e+00 : f32
    %354 = vector.shape_cast %347 : vector<8x1xi1> to vector<8x1xi1>
    %355 = vector.broadcast %354 : vector<8x1xi1> to vector<8x32xi1>
    %356 = vector.broadcast %cst_62 : f32 to vector<8x32xf32>
    %357 = arith.select %355, %345, %356 : vector<8x32xi1>, vector<8x32xf32>
    %c16_63 = arith.constant 16 : index
    %c0_64 = arith.constant 0 : index
    %358 = vector.load %arg14[%c16_63, %c0_64] : memref<64x32xf32, #tpu.memory_space<vmem>>, vector<8x32xf32>
    tpu.vector_store %arg14[%c16_63, %c0_64], %357 {strides = array<i32>} : memref<64x32xf32, #tpu.memory_space<vmem>>, vector<8x32xf32>,
    %359 = tpu.concatenate %328, %350 in 1 : vector<8x32xf32>, vector<8x32xf32> -> vector<8x64xf32>
    %cst_65 = arith.constant dense<0.000000e+00> : vector<8x256xf32>
    %360 = tpu.matmul %359, %14, %cst_65 {dimension_numbers = #tpu.dot_dimension_numbers<[1], [0], [0], [1], [0, 0, 1, 1], [], []>} : vector<8x64xf32>, vector<64x256xf32>, vector<8x256xf32> -> vector<8x256xf32>
    %361 = vector.extract_strided_slice %12 {offsets = [48, 0], sizes = [8, 128], strides = [1, 1]} : vector<64x128xf32> to vector<8x128xf32>
    %362 = vector.extract_strided_slice %13 {offsets = [8, 0], sizes = [8, 128], strides = [1, 1]} : vector<64x128xf32> to vector<8x128xf32>
    %363 = tpu.concatenate %361, %362 in 1 : vector<8x128xf32>, vector<8x128xf32> -> vector<8x256xf32>
    %364 = arith.addf %360, %363 : vector<8x256xf32>
    %365 = arith.negf %364 : vector<8x256xf32>
    %366 = math.exp %365 : vector<8x256xf32>
    %cst_66 = arith.constant 1.000000e+00 : f32
    %367 = vector.broadcast %cst_66 : f32 to vector<8x256xf32>
    %368 = arith.addf %367, %366 : vector<8x256xf32>
    %369 = arith.divf %367, %368 : vector<8x256xf32>
    %370 = math.tanh %364 : vector<8x256xf32>
    %371 = vector.extract_strided_slice %369 {offsets = [0, 32], sizes = [8, 32], strides = [1, 1]} : vector<8x256xf32> to vector<8x32xf32>
    %372 = arith.mulf %371, %331 : vector<8x32xf32>
    %373 = vector.extract_strided_slice %369 {offsets = [0, 0], sizes = [8, 32], strides = [1, 1]} : vector<8x256xf32> to vector<8x32xf32>
    %374 = vector.extract_strided_slice %370 {offsets = [0, 64], sizes = [8, 32], strides = [1, 1]} : vector<8x256xf32> to vector<8x32xf32>
    %375 = arith.mulf %373, %374 : vector<8x32xf32>
    %376 = arith.addf %372, %375 : vector<8x32xf32>
    %377 = vector.extract_strided_slice %369 {offsets = [0, 96], sizes = [8, 32], strides = [1, 1]} : vector<8x256xf32> to vector<8x32xf32>
    %378 = math.tanh %376 : vector<8x32xf32>
    %379 = arith.mulf %377, %378 : vector<8x32xf32>
    %c6_i32_67 = arith.constant 6 : i32
    %380 = vector.broadcast %c6_i32_67 : i32 to vector<8x1xi32>
    %381 = arith.cmpi sgt, %0, %380 : vector<8x1xi32>
    %382 = vector.shape_cast %381 : vector<8x1xi1> to vector<8x1xi1>
    %383 = vector.broadcast %382 : vector<8x1xi1> to vector<8x32xi1>
    %384 = arith.select %383, %379, %328 : vector<8x32xi1>, vector<8x32xf32>
    %385 = vector.shape_cast %381 : vector<8x1xi1> to vector<8x1xi1>
    %386 = vector.broadcast %385 : vector<8x1xi1> to vector<8x32xi1>
    %387 = arith.select %386, %376, %331 : vector<8x32xi1>, vector<8x32xf32>
    %cst_68 = arith.constant 0.000000e+00 : f32
    %388 = vector.shape_cast %381 : vector<8x1xi1> to vector<8x1xi1>
    %389 = vector.broadcast %388 : vector<8x1xi1> to vector<8x32xi1>
    %390 = vector.broadcast %cst_68 : f32 to vector<8x32xf32>
    %391 = arith.select %389, %379, %390 : vector<8x32xi1>, vector<8x32xf32>
    %c48_69 = arith.constant 48 : index
    %c0_70 = arith.constant 0 : index
    %392 = vector.load %arg13[%c48_69, %c0_70] : memref<64x32xf32, #tpu.memory_space<vmem>>, vector<8x32xf32>
    tpu.vector_store %arg13[%c48_69, %c0_70], %391 {strides = array<i32>} : memref<64x32xf32, #tpu.memory_space<vmem>>, vector<8x32xf32>,
    %393 = vector.extract_strided_slice %369 {offsets = [0, 160], sizes = [8, 32], strides = [1, 1]} : vector<8x256xf32> to vector<8x32xf32>
    %394 = arith.mulf %393, %353 : vector<8x32xf32>
    %395 = vector.extract_strided_slice %369 {offsets = [0, 128], sizes = [8, 32], strides = [1, 1]} : vector<8x256xf32> to vector<8x32xf32>
    %396 = vector.extract_strided_slice %370 {offsets = [0, 192], sizes = [8, 32], strides = [1, 1]} : vector<8x256xf32> to vector<8x32xf32>
    %397 = arith.mulf %395, %396 : vector<8x32xf32>
    %398 = arith.addf %394, %397 : vector<8x32xf32>
    %399 = vector.extract_strided_slice %369 {offsets = [0, 224], sizes = [8, 32], strides = [1, 1]} : vector<8x256xf32> to vector<8x32xf32>
    %400 = math.tanh %398 : vector<8x32xf32>
    %401 = arith.mulf %399, %400 : vector<8x32xf32>
    %c1_i32_71 = arith.constant 1 : i32
    %402 = vector.broadcast %c1_i32_71 : i32 to vector<8x1xi32>
    %403 = arith.cmpi sgt, %0, %402 : vector<8x1xi32>
    %404 = vector.shape_cast %403 : vector<8x1xi1> to vector<8x1xi1>
    %405 = vector.broadcast %404 : vector<8x1xi1> to vector<8x32xi1>
    %406 = arith.select %405, %401, %350 : vector<8x32xi1>, vector<8x32xf32>
    %407 = vector.shape_cast %403 : vector<8x1xi1> to vector<8x1xi1>
    %408 = vector.broadcast %407 : vector<8x1xi1> to vector<8x32xi1>
    %409 = arith.select %408, %398, %353 : vector<8x32xi1>, vector<8x32xf32>
    %cst_72 = arith.constant 0.000000e+00 : f32
    %410 = vector.shape_cast %403 : vector<8x1xi1> to vector<8x1xi1>
    %411 = vector.broadcast %410 : vector<8x1xi1> to vector<8x32xi1>
    %412 = vector.broadcast %cst_72 : f32 to vector<8x32xf32>
    %413 = arith.select %411, %401, %412 : vector<8x32xi1>, vector<8x32xf32>
    %c8_73 = arith.constant 8 : index
    %c0_74 = arith.constant 0 : index
    %414 = vector.load %arg14[%c8_73, %c0_74] : memref<64x32xf32, #tpu.memory_space<vmem>>, vector<8x32xf32>
    tpu.vector_store %arg14[%c8_73, %c0_74], %413 {strides = array<i32>} : memref<64x32xf32, #tpu.memory_space<vmem>>, vector<8x32xf32>,
    %415 = tpu.concatenate %384, %406 in 1 : vector<8x32xf32>, vector<8x32xf32> -> vector<8x64xf32>
    %cst_75 = arith.constant dense<0.000000e+00> : vector<8x256xf32>
    %416 = tpu.matmul %415, %14, %cst_75 {dimension_numbers = #tpu.dot_dimension_numbers<[1], [0], [0], [1], [0, 0, 1, 1], [], []>} : vector<8x64xf32>, vector<64x256xf32>, vector<8x256xf32> -> vector<8x256xf32>
    %417 = vector.extract_strided_slice %12 {offsets = [56, 0], sizes = [8, 128], strides = [1, 1]} : vector<64x128xf32> to vector<8x128xf32>
    %418 = vector.extract_strided_slice %13 {offsets = [0, 0], sizes = [8, 128], strides = [1, 1]} : vector<64x128xf32> to vector<8x128xf32>
    %419 = tpu.concatenate %417, %418 in 1 : vector<8x128xf32>, vector<8x128xf32> -> vector<8x256xf32>
    %420 = arith.addf %416, %419 : vector<8x256xf32>
    %421 = arith.negf %420 : vector<8x256xf32>
    %422 = math.exp %421 : vector<8x256xf32>
    %cst_76 = arith.constant 1.000000e+00 : f32
    %423 = vector.broadcast %cst_76 : f32 to vector<8x256xf32>
    %424 = arith.addf %423, %422 : vector<8x256xf32>
    %425 = arith.divf %423, %424 : vector<8x256xf32>
    %426 = math.tanh %420 : vector<8x256xf32>
    %427 = vector.extract_strided_slice %425 {offsets = [0, 32], sizes = [8, 32], strides = [1, 1]} : vector<8x256xf32> to vector<8x32xf32>
    %428 = arith.mulf %427, %387 : vector<8x32xf32>
    %429 = vector.extract_strided_slice %425 {offsets = [0, 0], sizes = [8, 32], strides = [1, 1]} : vector<8x256xf32> to vector<8x32xf32>
    %430 = vector.extract_strided_slice %426 {offsets = [0, 64], sizes = [8, 32], strides = [1, 1]} : vector<8x256xf32> to vector<8x32xf32>
    %431 = arith.mulf %429, %430 : vector<8x32xf32>
    %432 = arith.addf %428, %431 : vector<8x32xf32>
    %433 = vector.extract_strided_slice %425 {offsets = [0, 96], sizes = [8, 32], strides = [1, 1]} : vector<8x256xf32> to vector<8x32xf32>
    %434 = math.tanh %432 : vector<8x32xf32>
    %435 = arith.mulf %433, %434 : vector<8x32xf32>
    %c7_i32_77 = arith.constant 7 : i32
    %436 = vector.broadcast %c7_i32_77 : i32 to vector<8x1xi32>
    %437 = arith.cmpi sgt, %0, %436 : vector<8x1xi32>
    %cst_78 = arith.constant 0.000000e+00 : f32
    %438 = vector.shape_cast %437 : vector<8x1xi1> to vector<8x1xi1>
    %439 = vector.broadcast %438 : vector<8x1xi1> to vector<8x32xi1>
    %440 = vector.broadcast %cst_78 : f32 to vector<8x32xf32>
    %441 = arith.select %439, %435, %440 : vector<8x32xi1>, vector<8x32xf32>
    %c56_79 = arith.constant 56 : index
    %c0_80 = arith.constant 0 : index
    %442 = vector.load %arg13[%c56_79, %c0_80] : memref<64x32xf32, #tpu.memory_space<vmem>>, vector<8x32xf32>
    tpu.vector_store %arg13[%c56_79, %c0_80], %441 {strides = array<i32>} : memref<64x32xf32, #tpu.memory_space<vmem>>, vector<8x32xf32>,
    %443 = vector.extract_strided_slice %425 {offsets = [0, 160], sizes = [8, 32], strides = [1, 1]} : vector<8x256xf32> to vector<8x32xf32>
    %444 = arith.mulf %443, %409 : vector<8x32xf32>
    %445 = vector.extract_strided_slice %425 {offsets = [0, 128], sizes = [8, 32], strides = [1, 1]} : vector<8x256xf32> to vector<8x32xf32>
    %446 = vector.extract_strided_slice %426 {offsets = [0, 192], sizes = [8, 32], strides = [1, 1]} : vector<8x256xf32> to vector<8x32xf32>
    %447 = arith.mulf %445, %446 : vector<8x32xf32>
    %448 = arith.addf %444, %447 : vector<8x32xf32>
    %449 = vector.extract_strided_slice %425 {offsets = [0, 224], sizes = [8, 32], strides = [1, 1]} : vector<8x256xf32> to vector<8x32xf32>
    %450 = math.tanh %448 : vector<8x32xf32>
    %451 = arith.mulf %449, %450 : vector<8x32xf32>
    %c0_i32_81 = arith.constant 0 : i32
    %452 = vector.broadcast %c0_i32_81 : i32 to vector<8x1xi32>
    %453 = arith.cmpi sgt, %0, %452 : vector<8x1xi32>
    %cst_82 = arith.constant 0.000000e+00 : f32
    %454 = vector.shape_cast %453 : vector<8x1xi1> to vector<8x1xi1>
    %455 = vector.broadcast %454 : vector<8x1xi1> to vector<8x32xi1>
    %456 = vector.broadcast %cst_82 : f32 to vector<8x32xf32>
    %457 = arith.select %455, %451, %456 : vector<8x32xi1>, vector<8x32xf32>
    %c0_83 = arith.constant 0 : index
    %c0_84 = arith.constant 0 : index
    %458 = vector.load %arg14[%c0_83, %c0_84] : memref<64x32xf32, #tpu.memory_space<vmem>>, vector<8x32xf32>
    tpu.vector_store %arg14[%c0_83, %c0_84], %457 {strides = array<i32>} : memref<64x32xf32, #tpu.memory_space<vmem>>, vector<8x32xf32>,
    %c0_85 = arith.constant 0 : index
    %c0_86 = arith.constant 0 : index
    %459 = vector.load %arg13[%c0_85, %c0_86] : memref<64x32xf32, #tpu.memory_space<vmem>>, vector<64x32xf32>
    %c0_87 = arith.constant 0 : index
    %c0_88 = arith.constant 0 : index
    %460 = vector.load %arg14[%c0_87, %c0_88] : memref<64x32xf32, #tpu.memory_space<vmem>>, vector<64x32xf32>
    %c0_89 = arith.constant 0 : index
    %c0_90 = arith.constant 0 : index
    %461 = vector.load %arg5[%c0_89, %c0_90] : memref<64x256xf32, #tpu.memory_space<vmem>>, vector<64x256xf32>
    %462 = vector.extract_strided_slice %461 {offsets = [0, 0], sizes = [32, 256], strides = [1, 1]} : vector<64x256xf32> to vector<32x256xf32>
    %cst_91 = arith.constant dense<0.000000e+00> : vector<64x256xf32>
    %463 = tpu.matmul %459, %462, %cst_91 {dimension_numbers = #tpu.dot_dimension_numbers<[1], [0], [0], [1], [0, 0, 1, 1], [], []>} : vector<64x32xf32>, vector<32x256xf32>, vector<64x256xf32> -> vector<64x256xf32>
    %464 = vector.extract_strided_slice %461 {offsets = [32, 0], sizes = [32, 256], strides = [1, 1]} : vector<64x256xf32> to vector<32x256xf32>
    %cst_92 = arith.constant dense<0.000000e+00> : vector<64x256xf32>
    %465 = tpu.matmul %460, %464, %cst_92 {dimension_numbers = #tpu.dot_dimension_numbers<[1], [0], [0], [1], [0, 0, 1, 1], [], []>} : vector<64x32xf32>, vector<32x256xf32>, vector<64x256xf32> -> vector<64x256xf32>
    %466 = arith.addf %463, %465 : vector<64x256xf32>
    %c0_93 = arith.constant 0 : index
    %c0_94 = arith.constant 0 : index
    %467 = vector.load %arg6[%c0_93, %c0_94] : memref<1x256xf32, #tpu.memory_space<vmem>>, vector<1x256xf32>
    %468 = vector.broadcast %467 : vector<1x256xf32> to vector<64x256xf32>
    %469 = arith.addf %466, %468 : vector<64x256xf32>
    %470 = vector.extract_strided_slice %469 {offsets = [0, 0], sizes = [64, 128], strides = [1, 1]} : vector<64x256xf32> to vector<64x128xf32>
    %471 = vector.extract_strided_slice %469 {offsets = [0, 128], sizes = [64, 128], strides = [1, 1]} : vector<64x256xf32> to vector<64x128xf32>
    %c0_95 = arith.constant 0 : index
    %c0_96 = arith.constant 0 : index
    %472 = vector.load %arg7[%c0_95, %c0_96] : memref<64x256xf32, #tpu.memory_space<vmem>>, vector<64x256xf32>
    %c2 = arith.constant 2 : index
    %c0_97 = arith.constant 0 : index
    %c0_98 = arith.constant 0 : index
    %473 = vector.load %arg8[%c2, %c0_97, %c0_98] : memref<4x8x32xf32, #tpu.memory_space<vmem>>, vector<1x8x32xf32>
    %474 = vector.shape_cast %473 : vector<1x8x32xf32> to vector<8x32xf32>
    %c3 = arith.constant 3 : index
    %c0_99 = arith.constant 0 : index
    %c0_100 = arith.constant 0 : index
    %475 = vector.load %arg8[%c3, %c0_99, %c0_100] : memref<4x8x32xf32, #tpu.memory_space<vmem>>, vector<1x8x32xf32>
    %476 = vector.shape_cast %475 : vector<1x8x32xf32> to vector<8x32xf32>
    %c2_101 = arith.constant 2 : index
    %c0_102 = arith.constant 0 : index
    %c0_103 = arith.constant 0 : index
    %477 = vector.load %arg9[%c2_101, %c0_102, %c0_103] : memref<4x8x32xf32, #tpu.memory_space<vmem>>, vector<1x8x32xf32>
    %478 = vector.shape_cast %477 : vector<1x8x32xf32> to vector<8x32xf32>
    %c3_104 = arith.constant 3 : index
    %c0_105 = arith.constant 0 : index
    %c0_106 = arith.constant 0 : index
    %479 = vector.load %arg9[%c3_104, %c0_105, %c0_106] : memref<4x8x32xf32, #tpu.memory_space<vmem>>, vector<1x8x32xf32>
    %480 = vector.shape_cast %479 : vector<1x8x32xf32> to vector<8x32xf32>
    %481 = tpu.concatenate %474, %476 in 1 : vector<8x32xf32>, vector<8x32xf32> -> vector<8x64xf32>
    %cst_107 = arith.constant dense<0.000000e+00> : vector<8x256xf32>
    %482 = tpu.matmul %481, %472, %cst_107 {dimension_numbers = #tpu.dot_dimension_numbers<[1], [0], [0], [1], [0, 0, 1, 1], [], []>} : vector<8x64xf32>, vector<64x256xf32>, vector<8x256xf32> -> vector<8x256xf32>
    %483 = vector.extract_strided_slice %470 {offsets = [0, 0], sizes = [8, 128], strides = [1, 1]} : vector<64x128xf32> to vector<8x128xf32>
    %484 = vector.extract_strided_slice %471 {offsets = [56, 0], sizes = [8, 128], strides = [1, 1]} : vector<64x128xf32> to vector<8x128xf32>
    %485 = tpu.concatenate %483, %484 in 1 : vector<8x128xf32>, vector<8x128xf32> -> vector<8x256xf32>
    %486 = arith.addf %482, %485 : vector<8x256xf32>
    %487 = arith.negf %486 : vector<8x256xf32>
    %488 = math.exp %487 : vector<8x256xf32>
    %cst_108 = arith.constant 1.000000e+00 : f32
    %489 = vector.broadcast %cst_108 : f32 to vector<8x256xf32>
    %490 = arith.addf %489, %488 : vector<8x256xf32>
    %491 = arith.divf %489, %490 : vector<8x256xf32>
    %492 = math.tanh %486 : vector<8x256xf32>
    %493 = vector.extract_strided_slice %491 {offsets = [0, 32], sizes = [8, 32], strides = [1, 1]} : vector<8x256xf32> to vector<8x32xf32>
    %494 = arith.mulf %493, %478 : vector<8x32xf32>
    %495 = vector.extract_strided_slice %491 {offsets = [0, 0], sizes = [8, 32], strides = [1, 1]} : vector<8x256xf32> to vector<8x32xf32>
    %496 = vector.extract_strided_slice %492 {offsets = [0, 64], sizes = [8, 32], strides = [1, 1]} : vector<8x256xf32> to vector<8x32xf32>
    %497 = arith.mulf %495, %496 : vector<8x32xf32>
    %498 = arith.addf %494, %497 : vector<8x32xf32>
    %499 = vector.extract_strided_slice %491 {offsets = [0, 96], sizes = [8, 32], strides = [1, 1]} : vector<8x256xf32> to vector<8x32xf32>
    %500 = math.tanh %498 : vector<8x32xf32>
    %501 = arith.mulf %499, %500 : vector<8x32xf32>
    %c0_i32_109 = arith.constant 0 : i32
    %502 = vector.broadcast %c0_i32_109 : i32 to vector<8x1xi32>
    %503 = arith.cmpi sgt, %0, %502 : vector<8x1xi32>
    %504 = vector.shape_cast %503 : vector<8x1xi1> to vector<8x1xi1>
    %505 = vector.broadcast %504 : vector<8x1xi1> to vector<8x32xi1>
    %506 = arith.select %505, %501, %474 : vector<8x32xi1>, vector<8x32xf32>
    %507 = vector.shape_cast %503 : vector<8x1xi1> to vector<8x1xi1>
    %508 = vector.broadcast %507 : vector<8x1xi1> to vector<8x32xi1>
    %509 = arith.select %508, %498, %478 : vector<8x32xi1>, vector<8x32xf32>
    %cst_110 = arith.constant 0.000000e+00 : f32
    %510 = vector.shape_cast %503 : vector<8x1xi1> to vector<8x1xi1>
    %511 = vector.broadcast %510 : vector<8x1xi1> to vector<8x32xi1>
    %512 = vector.broadcast %cst_110 : f32 to vector<8x32xf32>
    %513 = arith.select %511, %501, %512 : vector<8x32xi1>, vector<8x32xf32>
    %c0_111 = arith.constant 0 : index
    %c0_112 = arith.constant 0 : index
    %514 = vector.load %arg13[%c0_111, %c0_112] : memref<64x32xf32, #tpu.memory_space<vmem>>, vector<8x32xf32>
    tpu.vector_store %arg13[%c0_111, %c0_112], %513 {strides = array<i32>} : memref<64x32xf32, #tpu.memory_space<vmem>>, vector<8x32xf32>,
    %515 = vector.extract_strided_slice %491 {offsets = [0, 160], sizes = [8, 32], strides = [1, 1]} : vector<8x256xf32> to vector<8x32xf32>
    %516 = arith.mulf %515, %480 : vector<8x32xf32>
    %517 = vector.extract_strided_slice %491 {offsets = [0, 128], sizes = [8, 32], strides = [1, 1]} : vector<8x256xf32> to vector<8x32xf32>
    %518 = vector.extract_strided_slice %492 {offsets = [0, 192], sizes = [8, 32], strides = [1, 1]} : vector<8x256xf32> to vector<8x32xf32>
    %519 = arith.mulf %517, %518 : vector<8x32xf32>
    %520 = arith.addf %516, %519 : vector<8x32xf32>
    %521 = vector.extract_strided_slice %491 {offsets = [0, 224], sizes = [8, 32], strides = [1, 1]} : vector<8x256xf32> to vector<8x32xf32>
    %522 = math.tanh %520 : vector<8x32xf32>
    %523 = arith.mulf %521, %522 : vector<8x32xf32>
    %c7_i32_113 = arith.constant 7 : i32
    %524 = vector.broadcast %c7_i32_113 : i32 to vector<8x1xi32>
    %525 = arith.cmpi sgt, %0, %524 : vector<8x1xi32>
    %526 = vector.shape_cast %525 : vector<8x1xi1> to vector<8x1xi1>
    %527 = vector.broadcast %526 : vector<8x1xi1> to vector<8x32xi1>
    %528 = arith.select %527, %523, %476 : vector<8x32xi1>, vector<8x32xf32>
    %529 = vector.shape_cast %525 : vector<8x1xi1> to vector<8x1xi1>
    %530 = vector.broadcast %529 : vector<8x1xi1> to vector<8x32xi1>
    %531 = arith.select %530, %520, %480 : vector<8x32xi1>, vector<8x32xf32>
    %cst_114 = arith.constant 0.000000e+00 : f32
    %532 = vector.shape_cast %525 : vector<8x1xi1> to vector<8x1xi1>
    %533 = vector.broadcast %532 : vector<8x1xi1> to vector<8x32xi1>
    %534 = vector.broadcast %cst_114 : f32 to vector<8x32xf32>
    %535 = arith.select %533, %523, %534 : vector<8x32xi1>, vector<8x32xf32>
    %c56_115 = arith.constant 56 : index
    %c0_116 = arith.constant 0 : index
    %536 = vector.load %arg14[%c56_115, %c0_116] : memref<64x32xf32, #tpu.memory_space<vmem>>, vector<8x32xf32>
    tpu.vector_store %arg14[%c56_115, %c0_116], %535 {strides = array<i32>} : memref<64x32xf32, #tpu.memory_space<vmem>>, vector<8x32xf32>,
    %537 = tpu.concatenate %506, %528 in 1 : vector<8x32xf32>, vector<8x32xf32> -> vector<8x64xf32>
    %cst_117 = arith.constant dense<0.000000e+00> : vector<8x256xf32>
    %538 = tpu.matmul %537, %472, %cst_117 {dimension_numbers = #tpu.dot_dimension_numbers<[1], [0], [0], [1], [0, 0, 1, 1], [], []>} : vector<8x64xf32>, vector<64x256xf32>, vector<8x256xf32> -> vector<8x256xf32>
    %539 = vector.extract_strided_slice %470 {offsets = [8, 0], sizes = [8, 128], strides = [1, 1]} : vector<64x128xf32> to vector<8x128xf32>
    %540 = vector.extract_strided_slice %471 {offsets = [48, 0], sizes = [8, 128], strides = [1, 1]} : vector<64x128xf32> to vector<8x128xf32>
    %541 = tpu.concatenate %539, %540 in 1 : vector<8x128xf32>, vector<8x128xf32> -> vector<8x256xf32>
    %542 = arith.addf %538, %541 : vector<8x256xf32>
    %543 = arith.negf %542 : vector<8x256xf32>
    %544 = math.exp %543 : vector<8x256xf32>
    %cst_118 = arith.constant 1.000000e+00 : f32
    %545 = vector.broadcast %cst_118 : f32 to vector<8x256xf32>
    %546 = arith.addf %545, %544 : vector<8x256xf32>
    %547 = arith.divf %545, %546 : vector<8x256xf32>
    %548 = math.tanh %542 : vector<8x256xf32>
    %549 = vector.extract_strided_slice %547 {offsets = [0, 32], sizes = [8, 32], strides = [1, 1]} : vector<8x256xf32> to vector<8x32xf32>
    %550 = arith.mulf %549, %509 : vector<8x32xf32>
    %551 = vector.extract_strided_slice %547 {offsets = [0, 0], sizes = [8, 32], strides = [1, 1]} : vector<8x256xf32> to vector<8x32xf32>
    %552 = vector.extract_strided_slice %548 {offsets = [0, 64], sizes = [8, 32], strides = [1, 1]} : vector<8x256xf32> to vector<8x32xf32>
    %553 = arith.mulf %551, %552 : vector<8x32xf32>
    %554 = arith.addf %550, %553 : vector<8x32xf32>
    %555 = vector.extract_strided_slice %547 {offsets = [0, 96], sizes = [8, 32], strides = [1, 1]} : vector<8x256xf32> to vector<8x32xf32>
    %556 = math.tanh %554 : vector<8x32xf32>
    %557 = arith.mulf %555, %556 : vector<8x32xf32>
    %c1_i32_119 = arith.constant 1 : i32
    %558 = vector.broadcast %c1_i32_119 : i32 to vector<8x1xi32>
    %559 = arith.cmpi sgt, %0, %558 : vector<8x1xi32>
    %560 = vector.shape_cast %559 : vector<8x1xi1> to vector<8x1xi1>
    %561 = vector.broadcast %560 : vector<8x1xi1> to vector<8x32xi1>
    %562 = arith.select %561, %557, %506 : vector<8x32xi1>, vector<8x32xf32>
    %563 = vector.shape_cast %559 : vector<8x1xi1> to vector<8x1xi1>
    %564 = vector.broadcast %563 : vector<8x1xi1> to vector<8x32xi1>
    %565 = arith.select %564, %554, %509 : vector<8x32xi1>, vector<8x32xf32>
    %cst_120 = arith.constant 0.000000e+00 : f32
    %566 = vector.shape_cast %559 : vector<8x1xi1> to vector<8x1xi1>
    %567 = vector.broadcast %566 : vector<8x1xi1> to vector<8x32xi1>
    %568 = vector.broadcast %cst_120 : f32 to vector<8x32xf32>
    %569 = arith.select %567, %557, %568 : vector<8x32xi1>, vector<8x32xf32>
    %c8_121 = arith.constant 8 : index
    %c0_122 = arith.constant 0 : index
    %570 = vector.load %arg13[%c8_121, %c0_122] : memref<64x32xf32, #tpu.memory_space<vmem>>, vector<8x32xf32>
    tpu.vector_store %arg13[%c8_121, %c0_122], %569 {strides = array<i32>} : memref<64x32xf32, #tpu.memory_space<vmem>>, vector<8x32xf32>,
    %571 = vector.extract_strided_slice %547 {offsets = [0, 160], sizes = [8, 32], strides = [1, 1]} : vector<8x256xf32> to vector<8x32xf32>
    %572 = arith.mulf %571, %531 : vector<8x32xf32>
    %573 = vector.extract_strided_slice %547 {offsets = [0, 128], sizes = [8, 32], strides = [1, 1]} : vector<8x256xf32> to vector<8x32xf32>
    %574 = vector.extract_strided_slice %548 {offsets = [0, 192], sizes = [8, 32], strides = [1, 1]} : vector<8x256xf32> to vector<8x32xf32>
    %575 = arith.mulf %573, %574 : vector<8x32xf32>
    %576 = arith.addf %572, %575 : vector<8x32xf32>
    %577 = vector.extract_strided_slice %547 {offsets = [0, 224], sizes = [8, 32], strides = [1, 1]} : vector<8x256xf32> to vector<8x32xf32>
    %578 = math.tanh %576 : vector<8x32xf32>
    %579 = arith.mulf %577, %578 : vector<8x32xf32>
    %c6_i32_123 = arith.constant 6 : i32
    %580 = vector.broadcast %c6_i32_123 : i32 to vector<8x1xi32>
    %581 = arith.cmpi sgt, %0, %580 : vector<8x1xi32>
    %582 = vector.shape_cast %581 : vector<8x1xi1> to vector<8x1xi1>
    %583 = vector.broadcast %582 : vector<8x1xi1> to vector<8x32xi1>
    %584 = arith.select %583, %579, %528 : vector<8x32xi1>, vector<8x32xf32>
    %585 = vector.shape_cast %581 : vector<8x1xi1> to vector<8x1xi1>
    %586 = vector.broadcast %585 : vector<8x1xi1> to vector<8x32xi1>
    %587 = arith.select %586, %576, %531 : vector<8x32xi1>, vector<8x32xf32>
    %cst_124 = arith.constant 0.000000e+00 : f32
    %588 = vector.shape_cast %581 : vector<8x1xi1> to vector<8x1xi1>
    %589 = vector.broadcast %588 : vector<8x1xi1> to vector<8x32xi1>
    %590 = vector.broadcast %cst_124 : f32 to vector<8x32xf32>
    %591 = arith.select %589, %579, %590 : vector<8x32xi1>, vector<8x32xf32>
    %c48_125 = arith.constant 48 : index
    %c0_126 = arith.constant 0 : index
    %592 = vector.load %arg14[%c48_125, %c0_126] : memref<64x32xf32, #tpu.memory_space<vmem>>, vector<8x32xf32>
    tpu.vector_store %arg14[%c48_125, %c0_126], %591 {strides = array<i32>} : memref<64x32xf32, #tpu.memory_space<vmem>>, vector<8x32xf32>,
    %593 = tpu.concatenate %562, %584 in 1 : vector<8x32xf32>, vector<8x32xf32> -> vector<8x64xf32>
    %cst_127 = arith.constant dense<0.000000e+00> : vector<8x256xf32>
    %594 = tpu.matmul %593, %472, %cst_127 {dimension_numbers = #tpu.dot_dimension_numbers<[1], [0], [0], [1], [0, 0, 1, 1], [], []>} : vector<8x64xf32>, vector<64x256xf32>, vector<8x256xf32> -> vector<8x256xf32>
    %595 = vector.extract_strided_slice %470 {offsets = [16, 0], sizes = [8, 128], strides = [1, 1]} : vector<64x128xf32> to vector<8x128xf32>
    %596 = vector.extract_strided_slice %471 {offsets = [40, 0], sizes = [8, 128], strides = [1, 1]} : vector<64x128xf32> to vector<8x128xf32>
    %597 = tpu.concatenate %595, %596 in 1 : vector<8x128xf32>, vector<8x128xf32> -> vector<8x256xf32>
    %598 = arith.addf %594, %597 : vector<8x256xf32>
    %599 = arith.negf %598 : vector<8x256xf32>
    %600 = math.exp %599 : vector<8x256xf32>
    %cst_128 = arith.constant 1.000000e+00 : f32
    %601 = vector.broadcast %cst_128 : f32 to vector<8x256xf32>
    %602 = arith.addf %601, %600 : vector<8x256xf32>
    %603 = arith.divf %601, %602 : vector<8x256xf32>
    %604 = math.tanh %598 : vector<8x256xf32>
    %605 = vector.extract_strided_slice %603 {offsets = [0, 32], sizes = [8, 32], strides = [1, 1]} : vector<8x256xf32> to vector<8x32xf32>
    %606 = arith.mulf %605, %565 : vector<8x32xf32>
    %607 = vector.extract_strided_slice %603 {offsets = [0, 0], sizes = [8, 32], strides = [1, 1]} : vector<8x256xf32> to vector<8x32xf32>
    %608 = vector.extract_strided_slice %604 {offsets = [0, 64], sizes = [8, 32], strides = [1, 1]} : vector<8x256xf32> to vector<8x32xf32>
    %609 = arith.mulf %607, %608 : vector<8x32xf32>
    %610 = arith.addf %606, %609 : vector<8x32xf32>
    %611 = vector.extract_strided_slice %603 {offsets = [0, 96], sizes = [8, 32], strides = [1, 1]} : vector<8x256xf32> to vector<8x32xf32>
    %612 = math.tanh %610 : vector<8x32xf32>
    %613 = arith.mulf %611, %612 : vector<8x32xf32>
    %c2_i32_129 = arith.constant 2 : i32
    %614 = vector.broadcast %c2_i32_129 : i32 to vector<8x1xi32>
    %615 = arith.cmpi sgt, %0, %614 : vector<8x1xi32>
    %616 = vector.shape_cast %615 : vector<8x1xi1> to vector<8x1xi1>
    %617 = vector.broadcast %616 : vector<8x1xi1> to vector<8x32xi1>
    %618 = arith.select %617, %613, %562 : vector<8x32xi1>, vector<8x32xf32>
    %619 = vector.shape_cast %615 : vector<8x1xi1> to vector<8x1xi1>
    %620 = vector.broadcast %619 : vector<8x1xi1> to vector<8x32xi1>
    %621 = arith.select %620, %610, %565 : vector<8x32xi1>, vector<8x32xf32>
    %cst_130 = arith.constant 0.000000e+00 : f32
    %622 = vector.shape_cast %615 : vector<8x1xi1> to vector<8x1xi1>
    %623 = vector.broadcast %622 : vector<8x1xi1> to vector<8x32xi1>
    %624 = vector.broadcast %cst_130 : f32 to vector<8x32xf32>
    %625 = arith.select %623, %613, %624 : vector<8x32xi1>, vector<8x32xf32>
    %c16_131 = arith.constant 16 : index
    %c0_132 = arith.constant 0 : index
    %626 = vector.load %arg13[%c16_131, %c0_132] : memref<64x32xf32, #tpu.memory_space<vmem>>, vector<8x32xf32>
    tpu.vector_store %arg13[%c16_131, %c0_132], %625 {strides = array<i32>} : memref<64x32xf32, #tpu.memory_space<vmem>>, vector<8x32xf32>,
    %627 = vector.extract_strided_slice %603 {offsets = [0, 160], sizes = [8, 32], strides = [1, 1]} : vector<8x256xf32> to vector<8x32xf32>
    %628 = arith.mulf %627, %587 : vector<8x32xf32>
    %629 = vector.extract_strided_slice %603 {offsets = [0, 128], sizes = [8, 32], strides = [1, 1]} : vector<8x256xf32> to vector<8x32xf32>
    %630 = vector.extract_strided_slice %604 {offsets = [0, 192], sizes = [8, 32], strides = [1, 1]} : vector<8x256xf32> to vector<8x32xf32>
    %631 = arith.mulf %629, %630 : vector<8x32xf32>
    %632 = arith.addf %628, %631 : vector<8x32xf32>
    %633 = vector.extract_strided_slice %603 {offsets = [0, 224], sizes = [8, 32], strides = [1, 1]} : vector<8x256xf32> to vector<8x32xf32>
    %634 = math.tanh %632 : vector<8x32xf32>
    %635 = arith.mulf %633, %634 : vector<8x32xf32>
    %c5_i32_133 = arith.constant 5 : i32
    %636 = vector.broadcast %c5_i32_133 : i32 to vector<8x1xi32>
    %637 = arith.cmpi sgt, %0, %636 : vector<8x1xi32>
    %638 = vector.shape_cast %637 : vector<8x1xi1> to vector<8x1xi1>
    %639 = vector.broadcast %638 : vector<8x1xi1> to vector<8x32xi1>
    %640 = arith.select %639, %635, %584 : vector<8x32xi1>, vector<8x32xf32>
    %641 = vector.shape_cast %637 : vector<8x1xi1> to vector<8x1xi1>
    %642 = vector.broadcast %641 : vector<8x1xi1> to vector<8x32xi1>
    %643 = arith.select %642, %632, %587 : vector<8x32xi1>, vector<8x32xf32>
    %cst_134 = arith.constant 0.000000e+00 : f32
    %644 = vector.shape_cast %637 : vector<8x1xi1> to vector<8x1xi1>
    %645 = vector.broadcast %644 : vector<8x1xi1> to vector<8x32xi1>
    %646 = vector.broadcast %cst_134 : f32 to vector<8x32xf32>
    %647 = arith.select %645, %635, %646 : vector<8x32xi1>, vector<8x32xf32>
    %c40_135 = arith.constant 40 : index
    %c0_136 = arith.constant 0 : index
    %648 = vector.load %arg14[%c40_135, %c0_136] : memref<64x32xf32, #tpu.memory_space<vmem>>, vector<8x32xf32>
    tpu.vector_store %arg14[%c40_135, %c0_136], %647 {strides = array<i32>} : memref<64x32xf32, #tpu.memory_space<vmem>>, vector<8x32xf32>,
    %649 = tpu.concatenate %618, %640 in 1 : vector<8x32xf32>, vector<8x32xf32> -> vector<8x64xf32>
    %cst_137 = arith.constant dense<0.000000e+00> : vector<8x256xf32>
    %650 = tpu.matmul %649, %472, %cst_137 {dimension_numbers = #tpu.dot_dimension_numbers<[1], [0], [0], [1], [0, 0, 1, 1], [], []>} : vector<8x64xf32>, vector<64x256xf32>, vector<8x256xf32> -> vector<8x256xf32>
    %651 = vector.extract_strided_slice %470 {offsets = [24, 0], sizes = [8, 128], strides = [1, 1]} : vector<64x128xf32> to vector<8x128xf32>
    %652 = vector.extract_strided_slice %471 {offsets = [32, 0], sizes = [8, 128], strides = [1, 1]} : vector<64x128xf32> to vector<8x128xf32>
    %653 = tpu.concatenate %651, %652 in 1 : vector<8x128xf32>, vector<8x128xf32> -> vector<8x256xf32>
    %654 = arith.addf %650, %653 : vector<8x256xf32>
    %655 = arith.negf %654 : vector<8x256xf32>
    %656 = math.exp %655 : vector<8x256xf32>
    %cst_138 = arith.constant 1.000000e+00 : f32
    %657 = vector.broadcast %cst_138 : f32 to vector<8x256xf32>
    %658 = arith.addf %657, %656 : vector<8x256xf32>
    %659 = arith.divf %657, %658 : vector<8x256xf32>
    %660 = math.tanh %654 : vector<8x256xf32>
    %661 = vector.extract_strided_slice %659 {offsets = [0, 32], sizes = [8, 32], strides = [1, 1]} : vector<8x256xf32> to vector<8x32xf32>
    %662 = arith.mulf %661, %621 : vector<8x32xf32>
    %663 = vector.extract_strided_slice %659 {offsets = [0, 0], sizes = [8, 32], strides = [1, 1]} : vector<8x256xf32> to vector<8x32xf32>
    %664 = vector.extract_strided_slice %660 {offsets = [0, 64], sizes = [8, 32], strides = [1, 1]} : vector<8x256xf32> to vector<8x32xf32>
    %665 = arith.mulf %663, %664 : vector<8x32xf32>
    %666 = arith.addf %662, %665 : vector<8x32xf32>
    %667 = vector.extract_strided_slice %659 {offsets = [0, 96], sizes = [8, 32], strides = [1, 1]} : vector<8x256xf32> to vector<8x32xf32>
    %668 = math.tanh %666 : vector<8x32xf32>
    %669 = arith.mulf %667, %668 : vector<8x32xf32>
    %c3_i32_139 = arith.constant 3 : i32
    %670 = vector.broadcast %c3_i32_139 : i32 to vector<8x1xi32>
    %671 = arith.cmpi sgt, %0, %670 : vector<8x1xi32>
    %672 = vector.shape_cast %671 : vector<8x1xi1> to vector<8x1xi1>
    %673 = vector.broadcast %672 : vector<8x1xi1> to vector<8x32xi1>
    %674 = arith.select %673, %669, %618 : vector<8x32xi1>, vector<8x32xf32>
    %675 = vector.shape_cast %671 : vector<8x1xi1> to vector<8x1xi1>
    %676 = vector.broadcast %675 : vector<8x1xi1> to vector<8x32xi1>
    %677 = arith.select %676, %666, %621 : vector<8x32xi1>, vector<8x32xf32>
    %cst_140 = arith.constant 0.000000e+00 : f32
    %678 = vector.shape_cast %671 : vector<8x1xi1> to vector<8x1xi1>
    %679 = vector.broadcast %678 : vector<8x1xi1> to vector<8x32xi1>
    %680 = vector.broadcast %cst_140 : f32 to vector<8x32xf32>
    %681 = arith.select %679, %669, %680 : vector<8x32xi1>, vector<8x32xf32>
    %c24_141 = arith.constant 24 : index
    %c0_142 = arith.constant 0 : index
    %682 = vector.load %arg13[%c24_141, %c0_142] : memref<64x32xf32, #tpu.memory_space<vmem>>, vector<8x32xf32>
    tpu.vector_store %arg13[%c24_141, %c0_142], %681 {strides = array<i32>} : memref<64x32xf32, #tpu.memory_space<vmem>>, vector<8x32xf32>,
    %683 = vector.extract_strided_slice %659 {offsets = [0, 160], sizes = [8, 32], strides = [1, 1]} : vector<8x256xf32> to vector<8x32xf32>
    %684 = arith.mulf %683, %643 : vector<8x32xf32>
    %685 = vector.extract_strided_slice %659 {offsets = [0, 128], sizes = [8, 32], strides = [1, 1]} : vector<8x256xf32> to vector<8x32xf32>
    %686 = vector.extract_strided_slice %660 {offsets = [0, 192], sizes = [8, 32], strides = [1, 1]} : vector<8x256xf32> to vector<8x32xf32>
    %687 = arith.mulf %685, %686 : vector<8x32xf32>
    %688 = arith.addf %684, %687 : vector<8x32xf32>
    %689 = vector.extract_strided_slice %659 {offsets = [0, 224], sizes = [8, 32], strides = [1, 1]} : vector<8x256xf32> to vector<8x32xf32>
    %690 = math.tanh %688 : vector<8x32xf32>
    %691 = arith.mulf %689, %690 : vector<8x32xf32>
    %c4_i32_143 = arith.constant 4 : i32
    %692 = vector.broadcast %c4_i32_143 : i32 to vector<8x1xi32>
    %693 = arith.cmpi sgt, %0, %692 : vector<8x1xi32>
    %694 = vector.shape_cast %693 : vector<8x1xi1> to vector<8x1xi1>
    %695 = vector.broadcast %694 : vector<8x1xi1> to vector<8x32xi1>
    %696 = arith.select %695, %691, %640 : vector<8x32xi1>, vector<8x32xf32>
    %697 = vector.shape_cast %693 : vector<8x1xi1> to vector<8x1xi1>
    %698 = vector.broadcast %697 : vector<8x1xi1> to vector<8x32xi1>
    %699 = arith.select %698, %688, %643 : vector<8x32xi1>, vector<8x32xf32>
    %cst_144 = arith.constant 0.000000e+00 : f32
    %700 = vector.shape_cast %693 : vector<8x1xi1> to vector<8x1xi1>
    %701 = vector.broadcast %700 : vector<8x1xi1> to vector<8x32xi1>
    %702 = vector.broadcast %cst_144 : f32 to vector<8x32xf32>
    %703 = arith.select %701, %691, %702 : vector<8x32xi1>, vector<8x32xf32>
    %c32_145 = arith.constant 32 : index
    %c0_146 = arith.constant 0 : index
    %704 = vector.load %arg14[%c32_145, %c0_146] : memref<64x32xf32, #tpu.memory_space<vmem>>, vector<8x32xf32>
    tpu.vector_store %arg14[%c32_145, %c0_146], %703 {strides = array<i32>} : memref<64x32xf32, #tpu.memory_space<vmem>>, vector<8x32xf32>,
    %705 = tpu.concatenate %674, %696 in 1 : vector<8x32xf32>, vector<8x32xf32> -> vector<8x64xf32>
    %cst_147 = arith.constant dense<0.000000e+00> : vector<8x256xf32>
    %706 = tpu.matmul %705, %472, %cst_147 {dimension_numbers = #tpu.dot_dimension_numbers<[1], [0], [0], [1], [0, 0, 1, 1], [], []>} : vector<8x64xf32>, vector<64x256xf32>, vector<8x256xf32> -> vector<8x256xf32>
    %707 = vector.extract_strided_slice %470 {offsets = [32, 0], sizes = [8, 128], strides = [1, 1]} : vector<64x128xf32> to vector<8x128xf32>
    %708 = vector.extract_strided_slice %471 {offsets = [24, 0], sizes = [8, 128], strides = [1, 1]} : vector<64x128xf32> to vector<8x128xf32>
    %709 = tpu.concatenate %707, %708 in 1 : vector<8x128xf32>, vector<8x128xf32> -> vector<8x256xf32>
    %710 = arith.addf %706, %709 : vector<8x256xf32>
    %711 = arith.negf %710 : vector<8x256xf32>
    %712 = math.exp %711 : vector<8x256xf32>
    %cst_148 = arith.constant 1.000000e+00 : f32
    %713 = vector.broadcast %cst_148 : f32 to vector<8x256xf32>
    %714 = arith.addf %713, %712 : vector<8x256xf32>
    %715 = arith.divf %713, %714 : vector<8x256xf32>
    %716 = math.tanh %710 : vector<8x256xf32>
    %717 = vector.extract_strided_slice %715 {offsets = [0, 32], sizes = [8, 32], strides = [1, 1]} : vector<8x256xf32> to vector<8x32xf32>
    %718 = arith.mulf %717, %677 : vector<8x32xf32>
    %719 = vector.extract_strided_slice %715 {offsets = [0, 0], sizes = [8, 32], strides = [1, 1]} : vector<8x256xf32> to vector<8x32xf32>
    %720 = vector.extract_strided_slice %716 {offsets = [0, 64], sizes = [8, 32], strides = [1, 1]} : vector<8x256xf32> to vector<8x32xf32>
    %721 = arith.mulf %719, %720 : vector<8x32xf32>
    %722 = arith.addf %718, %721 : vector<8x32xf32>
    %723 = vector.extract_strided_slice %715 {offsets = [0, 96], sizes = [8, 32], strides = [1, 1]} : vector<8x256xf32> to vector<8x32xf32>
    %724 = math.tanh %722 : vector<8x32xf32>
    %725 = arith.mulf %723, %724 : vector<8x32xf32>
    %c4_i32_149 = arith.constant 4 : i32
    %726 = vector.broadcast %c4_i32_149 : i32 to vector<8x1xi32>
    %727 = arith.cmpi sgt, %0, %726 : vector<8x1xi32>
    %728 = vector.shape_cast %727 : vector<8x1xi1> to vector<8x1xi1>
    %729 = vector.broadcast %728 : vector<8x1xi1> to vector<8x32xi1>
    %730 = arith.select %729, %725, %674 : vector<8x32xi1>, vector<8x32xf32>
    %731 = vector.shape_cast %727 : vector<8x1xi1> to vector<8x1xi1>
    %732 = vector.broadcast %731 : vector<8x1xi1> to vector<8x32xi1>
    %733 = arith.select %732, %722, %677 : vector<8x32xi1>, vector<8x32xf32>
    %cst_150 = arith.constant 0.000000e+00 : f32
    %734 = vector.shape_cast %727 : vector<8x1xi1> to vector<8x1xi1>
    %735 = vector.broadcast %734 : vector<8x1xi1> to vector<8x32xi1>
    %736 = vector.broadcast %cst_150 : f32 to vector<8x32xf32>
    %737 = arith.select %735, %725, %736 : vector<8x32xi1>, vector<8x32xf32>
    %c32_151 = arith.constant 32 : index
    %c0_152 = arith.constant 0 : index
    %738 = vector.load %arg13[%c32_151, %c0_152] : memref<64x32xf32, #tpu.memory_space<vmem>>, vector<8x32xf32>
    tpu.vector_store %arg13[%c32_151, %c0_152], %737 {strides = array<i32>} : memref<64x32xf32, #tpu.memory_space<vmem>>, vector<8x32xf32>,
    %739 = vector.extract_strided_slice %715 {offsets = [0, 160], sizes = [8, 32], strides = [1, 1]} : vector<8x256xf32> to vector<8x32xf32>
    %740 = arith.mulf %739, %699 : vector<8x32xf32>
    %741 = vector.extract_strided_slice %715 {offsets = [0, 128], sizes = [8, 32], strides = [1, 1]} : vector<8x256xf32> to vector<8x32xf32>
    %742 = vector.extract_strided_slice %716 {offsets = [0, 192], sizes = [8, 32], strides = [1, 1]} : vector<8x256xf32> to vector<8x32xf32>
    %743 = arith.mulf %741, %742 : vector<8x32xf32>
    %744 = arith.addf %740, %743 : vector<8x32xf32>
    %745 = vector.extract_strided_slice %715 {offsets = [0, 224], sizes = [8, 32], strides = [1, 1]} : vector<8x256xf32> to vector<8x32xf32>
    %746 = math.tanh %744 : vector<8x32xf32>
    %747 = arith.mulf %745, %746 : vector<8x32xf32>
    %c3_i32_153 = arith.constant 3 : i32
    %748 = vector.broadcast %c3_i32_153 : i32 to vector<8x1xi32>
    %749 = arith.cmpi sgt, %0, %748 : vector<8x1xi32>
    %750 = vector.shape_cast %749 : vector<8x1xi1> to vector<8x1xi1>
    %751 = vector.broadcast %750 : vector<8x1xi1> to vector<8x32xi1>
    %752 = arith.select %751, %747, %696 : vector<8x32xi1>, vector<8x32xf32>
    %753 = vector.shape_cast %749 : vector<8x1xi1> to vector<8x1xi1>
    %754 = vector.broadcast %753 : vector<8x1xi1> to vector<8x32xi1>
    %755 = arith.select %754, %744, %699 : vector<8x32xi1>, vector<8x32xf32>
    %cst_154 = arith.constant 0.000000e+00 : f32
    %756 = vector.shape_cast %749 : vector<8x1xi1> to vector<8x1xi1>
    %757 = vector.broadcast %756 : vector<8x1xi1> to vector<8x32xi1>
    %758 = vector.broadcast %cst_154 : f32 to vector<8x32xf32>
    %759 = arith.select %757, %747, %758 : vector<8x32xi1>, vector<8x32xf32>
    %c24_155 = arith.constant 24 : index
    %c0_156 = arith.constant 0 : index
    %760 = vector.load %arg14[%c24_155, %c0_156] : memref<64x32xf32, #tpu.memory_space<vmem>>, vector<8x32xf32>
    tpu.vector_store %arg14[%c24_155, %c0_156], %759 {strides = array<i32>} : memref<64x32xf32, #tpu.memory_space<vmem>>, vector<8x32xf32>,
    %761 = tpu.concatenate %730, %752 in 1 : vector<8x32xf32>, vector<8x32xf32> -> vector<8x64xf32>
    %cst_157 = arith.constant dense<0.000000e+00> : vector<8x256xf32>
    %762 = tpu.matmul %761, %472, %cst_157 {dimension_numbers = #tpu.dot_dimension_numbers<[1], [0], [0], [1], [0, 0, 1, 1], [], []>} : vector<8x64xf32>, vector<64x256xf32>, vector<8x256xf32> -> vector<8x256xf32>
    %763 = vector.extract_strided_slice %470 {offsets = [40, 0], sizes = [8, 128], strides = [1, 1]} : vector<64x128xf32> to vector<8x128xf32>
    %764 = vector.extract_strided_slice %471 {offsets = [16, 0], sizes = [8, 128], strides = [1, 1]} : vector<64x128xf32> to vector<8x128xf32>
    %765 = tpu.concatenate %763, %764 in 1 : vector<8x128xf32>, vector<8x128xf32> -> vector<8x256xf32>
    %766 = arith.addf %762, %765 : vector<8x256xf32>
    %767 = arith.negf %766 : vector<8x256xf32>
    %768 = math.exp %767 : vector<8x256xf32>
    %cst_158 = arith.constant 1.000000e+00 : f32
    %769 = vector.broadcast %cst_158 : f32 to vector<8x256xf32>
    %770 = arith.addf %769, %768 : vector<8x256xf32>
    %771 = arith.divf %769, %770 : vector<8x256xf32>
    %772 = math.tanh %766 : vector<8x256xf32>
    %773 = vector.extract_strided_slice %771 {offsets = [0, 32], sizes = [8, 32], strides = [1, 1]} : vector<8x256xf32> to vector<8x32xf32>
    %774 = arith.mulf %773, %733 : vector<8x32xf32>
    %775 = vector.extract_strided_slice %771 {offsets = [0, 0], sizes = [8, 32], strides = [1, 1]} : vector<8x256xf32> to vector<8x32xf32>
    %776 = vector.extract_strided_slice %772 {offsets = [0, 64], sizes = [8, 32], strides = [1, 1]} : vector<8x256xf32> to vector<8x32xf32>
    %777 = arith.mulf %775, %776 : vector<8x32xf32>
    %778 = arith.addf %774, %777 : vector<8x32xf32>
    %779 = vector.extract_strided_slice %771 {offsets = [0, 96], sizes = [8, 32], strides = [1, 1]} : vector<8x256xf32> to vector<8x32xf32>
    %780 = math.tanh %778 : vector<8x32xf32>
    %781 = arith.mulf %779, %780 : vector<8x32xf32>
    %c5_i32_159 = arith.constant 5 : i32
    %782 = vector.broadcast %c5_i32_159 : i32 to vector<8x1xi32>
    %783 = arith.cmpi sgt, %0, %782 : vector<8x1xi32>
    %784 = vector.shape_cast %783 : vector<8x1xi1> to vector<8x1xi1>
    %785 = vector.broadcast %784 : vector<8x1xi1> to vector<8x32xi1>
    %786 = arith.select %785, %781, %730 : vector<8x32xi1>, vector<8x32xf32>
    %787 = vector.shape_cast %783 : vector<8x1xi1> to vector<8x1xi1>
    %788 = vector.broadcast %787 : vector<8x1xi1> to vector<8x32xi1>
    %789 = arith.select %788, %778, %733 : vector<8x32xi1>, vector<8x32xf32>
    %cst_160 = arith.constant 0.000000e+00 : f32
    %790 = vector.shape_cast %783 : vector<8x1xi1> to vector<8x1xi1>
    %791 = vector.broadcast %790 : vector<8x1xi1> to vector<8x32xi1>
    %792 = vector.broadcast %cst_160 : f32 to vector<8x32xf32>
    %793 = arith.select %791, %781, %792 : vector<8x32xi1>, vector<8x32xf32>
    %c40_161 = arith.constant 40 : index
    %c0_162 = arith.constant 0 : index
    %794 = vector.load %arg13[%c40_161, %c0_162] : memref<64x32xf32, #tpu.memory_space<vmem>>, vector<8x32xf32>
    tpu.vector_store %arg13[%c40_161, %c0_162], %793 {strides = array<i32>} : memref<64x32xf32, #tpu.memory_space<vmem>>, vector<8x32xf32>,
    %795 = vector.extract_strided_slice %771 {offsets = [0, 160], sizes = [8, 32], strides = [1, 1]} : vector<8x256xf32> to vector<8x32xf32>
    %796 = arith.mulf %795, %755 : vector<8x32xf32>
    %797 = vector.extract_strided_slice %771 {offsets = [0, 128], sizes = [8, 32], strides = [1, 1]} : vector<8x256xf32> to vector<8x32xf32>
    %798 = vector.extract_strided_slice %772 {offsets = [0, 192], sizes = [8, 32], strides = [1, 1]} : vector<8x256xf32> to vector<8x32xf32>
    %799 = arith.mulf %797, %798 : vector<8x32xf32>
    %800 = arith.addf %796, %799 : vector<8x32xf32>
    %801 = vector.extract_strided_slice %771 {offsets = [0, 224], sizes = [8, 32], strides = [1, 1]} : vector<8x256xf32> to vector<8x32xf32>
    %802 = math.tanh %800 : vector<8x32xf32>
    %803 = arith.mulf %801, %802 : vector<8x32xf32>
    %c2_i32_163 = arith.constant 2 : i32
    %804 = vector.broadcast %c2_i32_163 : i32 to vector<8x1xi32>
    %805 = arith.cmpi sgt, %0, %804 : vector<8x1xi32>
    %806 = vector.shape_cast %805 : vector<8x1xi1> to vector<8x1xi1>
    %807 = vector.broadcast %806 : vector<8x1xi1> to vector<8x32xi1>
    %808 = arith.select %807, %803, %752 : vector<8x32xi1>, vector<8x32xf32>
    %809 = vector.shape_cast %805 : vector<8x1xi1> to vector<8x1xi1>
    %810 = vector.broadcast %809 : vector<8x1xi1> to vector<8x32xi1>
    %811 = arith.select %810, %800, %755 : vector<8x32xi1>, vector<8x32xf32>
    %cst_164 = arith.constant 0.000000e+00 : f32
    %812 = vector.shape_cast %805 : vector<8x1xi1> to vector<8x1xi1>
    %813 = vector.broadcast %812 : vector<8x1xi1> to vector<8x32xi1>
    %814 = vector.broadcast %cst_164 : f32 to vector<8x32xf32>
    %815 = arith.select %813, %803, %814 : vector<8x32xi1>, vector<8x32xf32>
    %c16_165 = arith.constant 16 : index
    %c0_166 = arith.constant 0 : index
    %816 = vector.load %arg14[%c16_165, %c0_166] : memref<64x32xf32, #tpu.memory_space<vmem>>, vector<8x32xf32>
    tpu.vector_store %arg14[%c16_165, %c0_166], %815 {strides = array<i32>} : memref<64x32xf32, #tpu.memory_space<vmem>>, vector<8x32xf32>,
    %817 = tpu.concatenate %786, %808 in 1 : vector<8x32xf32>, vector<8x32xf32> -> vector<8x64xf32>
    %cst_167 = arith.constant dense<0.000000e+00> : vector<8x256xf32>
    %818 = tpu.matmul %817, %472, %cst_167 {dimension_numbers = #tpu.dot_dimension_numbers<[1], [0], [0], [1], [0, 0, 1, 1], [], []>} : vector<8x64xf32>, vector<64x256xf32>, vector<8x256xf32> -> vector<8x256xf32>
    %819 = vector.extract_strided_slice %470 {offsets = [48, 0], sizes = [8, 128], strides = [1, 1]} : vector<64x128xf32> to vector<8x128xf32>
    %820 = vector.extract_strided_slice %471 {offsets = [8, 0], sizes = [8, 128], strides = [1, 1]} : vector<64x128xf32> to vector<8x128xf32>
    %821 = tpu.concatenate %819, %820 in 1 : vector<8x128xf32>, vector<8x128xf32> -> vector<8x256xf32>
    %822 = arith.addf %818, %821 : vector<8x256xf32>
    %823 = arith.negf %822 : vector<8x256xf32>
    %824 = math.exp %823 : vector<8x256xf32>
    %cst_168 = arith.constant 1.000000e+00 : f32
    %825 = vector.broadcast %cst_168 : f32 to vector<8x256xf32>
    %826 = arith.addf %825, %824 : vector<8x256xf32>
    %827 = arith.divf %825, %826 : vector<8x256xf32>
    %828 = math.tanh %822 : vector<8x256xf32>
    %829 = vector.extract_strided_slice %827 {offsets = [0, 32], sizes = [8, 32], strides = [1, 1]} : vector<8x256xf32> to vector<8x32xf32>
    %830 = arith.mulf %829, %789 : vector<8x32xf32>
    %831 = vector.extract_strided_slice %827 {offsets = [0, 0], sizes = [8, 32], strides = [1, 1]} : vector<8x256xf32> to vector<8x32xf32>
    %832 = vector.extract_strided_slice %828 {offsets = [0, 64], sizes = [8, 32], strides = [1, 1]} : vector<8x256xf32> to vector<8x32xf32>
    %833 = arith.mulf %831, %832 : vector<8x32xf32>
    %834 = arith.addf %830, %833 : vector<8x32xf32>
    %835 = vector.extract_strided_slice %827 {offsets = [0, 96], sizes = [8, 32], strides = [1, 1]} : vector<8x256xf32> to vector<8x32xf32>
    %836 = math.tanh %834 : vector<8x32xf32>
    %837 = arith.mulf %835, %836 : vector<8x32xf32>
    %c6_i32_169 = arith.constant 6 : i32
    %838 = vector.broadcast %c6_i32_169 : i32 to vector<8x1xi32>
    %839 = arith.cmpi sgt, %0, %838 : vector<8x1xi32>
    %840 = vector.shape_cast %839 : vector<8x1xi1> to vector<8x1xi1>
    %841 = vector.broadcast %840 : vector<8x1xi1> to vector<8x32xi1>
    %842 = arith.select %841, %837, %786 : vector<8x32xi1>, vector<8x32xf32>
    %843 = vector.shape_cast %839 : vector<8x1xi1> to vector<8x1xi1>
    %844 = vector.broadcast %843 : vector<8x1xi1> to vector<8x32xi1>
    %845 = arith.select %844, %834, %789 : vector<8x32xi1>, vector<8x32xf32>
    %cst_170 = arith.constant 0.000000e+00 : f32
    %846 = vector.shape_cast %839 : vector<8x1xi1> to vector<8x1xi1>
    %847 = vector.broadcast %846 : vector<8x1xi1> to vector<8x32xi1>
    %848 = vector.broadcast %cst_170 : f32 to vector<8x32xf32>
    %849 = arith.select %847, %837, %848 : vector<8x32xi1>, vector<8x32xf32>
    %c48_171 = arith.constant 48 : index
    %c0_172 = arith.constant 0 : index
    %850 = vector.load %arg13[%c48_171, %c0_172] : memref<64x32xf32, #tpu.memory_space<vmem>>, vector<8x32xf32>
    tpu.vector_store %arg13[%c48_171, %c0_172], %849 {strides = array<i32>} : memref<64x32xf32, #tpu.memory_space<vmem>>, vector<8x32xf32>,
    %851 = vector.extract_strided_slice %827 {offsets = [0, 160], sizes = [8, 32], strides = [1, 1]} : vector<8x256xf32> to vector<8x32xf32>
    %852 = arith.mulf %851, %811 : vector<8x32xf32>
    %853 = vector.extract_strided_slice %827 {offsets = [0, 128], sizes = [8, 32], strides = [1, 1]} : vector<8x256xf32> to vector<8x32xf32>
    %854 = vector.extract_strided_slice %828 {offsets = [0, 192], sizes = [8, 32], strides = [1, 1]} : vector<8x256xf32> to vector<8x32xf32>
    %855 = arith.mulf %853, %854 : vector<8x32xf32>
    %856 = arith.addf %852, %855 : vector<8x32xf32>
    %857 = vector.extract_strided_slice %827 {offsets = [0, 224], sizes = [8, 32], strides = [1, 1]} : vector<8x256xf32> to vector<8x32xf32>
    %858 = math.tanh %856 : vector<8x32xf32>
    %859 = arith.mulf %857, %858 : vector<8x32xf32>
    %c1_i32_173 = arith.constant 1 : i32
    %860 = vector.broadcast %c1_i32_173 : i32 to vector<8x1xi32>
    %861 = arith.cmpi sgt, %0, %860 : vector<8x1xi32>
    %862 = vector.shape_cast %861 : vector<8x1xi1> to vector<8x1xi1>
    %863 = vector.broadcast %862 : vector<8x1xi1> to vector<8x32xi1>
    %864 = arith.select %863, %859, %808 : vector<8x32xi1>, vector<8x32xf32>
    %865 = vector.shape_cast %861 : vector<8x1xi1> to vector<8x1xi1>
    %866 = vector.broadcast %865 : vector<8x1xi1> to vector<8x32xi1>
    %867 = arith.select %866, %856, %811 : vector<8x32xi1>, vector<8x32xf32>
    %cst_174 = arith.constant 0.000000e+00 : f32
    %868 = vector.shape_cast %861 : vector<8x1xi1> to vector<8x1xi1>
    %869 = vector.broadcast %868 : vector<8x1xi1> to vector<8x32xi1>
    %870 = vector.broadcast %cst_174 : f32 to vector<8x32xf32>
    %871 = arith.select %869, %859, %870 : vector<8x32xi1>, vector<8x32xf32>
    %c8_175 = arith.constant 8 : index
    %c0_176 = arith.constant 0 : index
    %872 = vector.load %arg14[%c8_175, %c0_176] : memref<64x32xf32, #tpu.memory_space<vmem>>, vector<8x32xf32>
    tpu.vector_store %arg14[%c8_175, %c0_176], %871 {strides = array<i32>} : memref<64x32xf32, #tpu.memory_space<vmem>>, vector<8x32xf32>,
    %873 = tpu.concatenate %842, %864 in 1 : vector<8x32xf32>, vector<8x32xf32> -> vector<8x64xf32>
    %cst_177 = arith.constant dense<0.000000e+00> : vector<8x256xf32>
    %874 = tpu.matmul %873, %472, %cst_177 {dimension_numbers = #tpu.dot_dimension_numbers<[1], [0], [0], [1], [0, 0, 1, 1], [], []>} : vector<8x64xf32>, vector<64x256xf32>, vector<8x256xf32> -> vector<8x256xf32>
    %875 = vector.extract_strided_slice %470 {offsets = [56, 0], sizes = [8, 128], strides = [1, 1]} : vector<64x128xf32> to vector<8x128xf32>
    %876 = vector.extract_strided_slice %471 {offsets = [0, 0], sizes = [8, 128], strides = [1, 1]} : vector<64x128xf32> to vector<8x128xf32>
    %877 = tpu.concatenate %875, %876 in 1 : vector<8x128xf32>, vector<8x128xf32> -> vector<8x256xf32>
    %878 = arith.addf %874, %877 : vector<8x256xf32>
    %879 = arith.negf %878 : vector<8x256xf32>
    %880 = math.exp %879 : vector<8x256xf32>
    %cst_178 = arith.constant 1.000000e+00 : f32
    %881 = vector.broadcast %cst_178 : f32 to vector<8x256xf32>
    %882 = arith.addf %881, %880 : vector<8x256xf32>
    %883 = arith.divf %881, %882 : vector<8x256xf32>
    %884 = math.tanh %878 : vector<8x256xf32>
    %885 = vector.extract_strided_slice %883 {offsets = [0, 32], sizes = [8, 32], strides = [1, 1]} : vector<8x256xf32> to vector<8x32xf32>
    %886 = arith.mulf %885, %845 : vector<8x32xf32>
    %887 = vector.extract_strided_slice %883 {offsets = [0, 0], sizes = [8, 32], strides = [1, 1]} : vector<8x256xf32> to vector<8x32xf32>
    %888 = vector.extract_strided_slice %884 {offsets = [0, 64], sizes = [8, 32], strides = [1, 1]} : vector<8x256xf32> to vector<8x32xf32>
    %889 = arith.mulf %887, %888 : vector<8x32xf32>
    %890 = arith.addf %886, %889 : vector<8x32xf32>
    %891 = vector.extract_strided_slice %883 {offsets = [0, 96], sizes = [8, 32], strides = [1, 1]} : vector<8x256xf32> to vector<8x32xf32>
    %892 = math.tanh %890 : vector<8x32xf32>
    %893 = arith.mulf %891, %892 : vector<8x32xf32>
    %c7_i32_179 = arith.constant 7 : i32
    %894 = vector.broadcast %c7_i32_179 : i32 to vector<8x1xi32>
    %895 = arith.cmpi sgt, %0, %894 : vector<8x1xi32>
    %cst_180 = arith.constant 0.000000e+00 : f32
    %896 = vector.shape_cast %895 : vector<8x1xi1> to vector<8x1xi1>
    %897 = vector.broadcast %896 : vector<8x1xi1> to vector<8x32xi1>
    %898 = vector.broadcast %cst_180 : f32 to vector<8x32xf32>
    %899 = arith.select %897, %893, %898 : vector<8x32xi1>, vector<8x32xf32>
    %c56_181 = arith.constant 56 : index
    %c0_182 = arith.constant 0 : index
    %900 = vector.load %arg13[%c56_181, %c0_182] : memref<64x32xf32, #tpu.memory_space<vmem>>, vector<8x32xf32>
    tpu.vector_store %arg13[%c56_181, %c0_182], %899 {strides = array<i32>} : memref<64x32xf32, #tpu.memory_space<vmem>>, vector<8x32xf32>,
    %901 = vector.extract_strided_slice %883 {offsets = [0, 160], sizes = [8, 32], strides = [1, 1]} : vector<8x256xf32> to vector<8x32xf32>
    %902 = arith.mulf %901, %867 : vector<8x32xf32>
    %903 = vector.extract_strided_slice %883 {offsets = [0, 128], sizes = [8, 32], strides = [1, 1]} : vector<8x256xf32> to vector<8x32xf32>
    %904 = vector.extract_strided_slice %884 {offsets = [0, 192], sizes = [8, 32], strides = [1, 1]} : vector<8x256xf32> to vector<8x32xf32>
    %905 = arith.mulf %903, %904 : vector<8x32xf32>
    %906 = arith.addf %902, %905 : vector<8x32xf32>
    %907 = vector.extract_strided_slice %883 {offsets = [0, 224], sizes = [8, 32], strides = [1, 1]} : vector<8x256xf32> to vector<8x32xf32>
    %908 = math.tanh %906 : vector<8x32xf32>
    %909 = arith.mulf %907, %908 : vector<8x32xf32>
    %c0_i32_183 = arith.constant 0 : i32
    %910 = vector.broadcast %c0_i32_183 : i32 to vector<8x1xi32>
    %911 = arith.cmpi sgt, %0, %910 : vector<8x1xi32>
    %cst_184 = arith.constant 0.000000e+00 : f32
    %912 = vector.shape_cast %911 : vector<8x1xi1> to vector<8x1xi1>
    %913 = vector.broadcast %912 : vector<8x1xi1> to vector<8x32xi1>
    %914 = vector.broadcast %cst_184 : f32 to vector<8x32xf32>
    %915 = arith.select %913, %909, %914 : vector<8x32xi1>, vector<8x32xf32>
    %c0_185 = arith.constant 0 : index
    %c0_186 = arith.constant 0 : index
    %916 = vector.load %arg14[%c0_185, %c0_186] : memref<64x32xf32, #tpu.memory_space<vmem>>, vector<8x32xf32>
    tpu.vector_store %arg14[%c0_185, %c0_186], %915 {strides = array<i32>} : memref<64x32xf32, #tpu.memory_space<vmem>>, vector<8x32xf32>,
    %c0_187 = arith.constant 0 : index
    %c0_188 = arith.constant 0 : index
    %917 = vector.load %arg13[%c0_187, %c0_188] : memref<64x32xf32, #tpu.memory_space<vmem>>, vector<64x32xf32>
    %c0_189 = arith.constant 0 : index
    %c0_190 = arith.constant 0 : index
    %918 = vector.load %arg14[%c0_189, %c0_190] : memref<64x32xf32, #tpu.memory_space<vmem>>, vector<64x32xf32>
    %c0_191 = arith.constant 0 : index
    %c0_192 = arith.constant 0 : index
    %919 = vector.load %arg10[%c0_191, %c0_192] : memref<64x128xf32, #tpu.memory_space<vmem>>, vector<64x128xf32>
    %920 = vector.extract_strided_slice %919 {offsets = [0, 0], sizes = [32, 128], strides = [1, 1]} : vector<64x128xf32> to vector<32x128xf32>
    %cst_193 = arith.constant dense<0.000000e+00> : vector<64x128xf32>
    %921 = tpu.matmul %917, %920, %cst_193 {dimension_numbers = #tpu.dot_dimension_numbers<[1], [0], [0], [1], [0, 0, 1, 1], [], []>} : vector<64x32xf32>, vector<32x128xf32>, vector<64x128xf32> -> vector<64x128xf32>
    %922 = vector.extract_strided_slice %919 {offsets = [32, 0], sizes = [32, 128], strides = [1, 1]} : vector<64x128xf32> to vector<32x128xf32>
    %cst_194 = arith.constant dense<0.000000e+00> : vector<64x128xf32>
    %923 = tpu.matmul %918, %922, %cst_194 {dimension_numbers = #tpu.dot_dimension_numbers<[1], [0], [0], [1], [0, 0, 1, 1], [], []>} : vector<64x32xf32>, vector<32x128xf32>, vector<64x128xf32> -> vector<64x128xf32>
    %924 = arith.addf %921, %923 : vector<64x128xf32>
    %c0_195 = arith.constant 0 : index
    %c0_196 = arith.constant 0 : index
    %925 = vector.load %arg11[%c0_195, %c0_196] : memref<1x128xf32, #tpu.memory_space<vmem>>, vector<1x128xf32>
    %926 = vector.broadcast %925 : vector<1x128xf32> to vector<64x128xf32>
    %927 = arith.addf %924, %926 : vector<64x128xf32>
    %cst_197 = arith.constant dense<0xFF800000> : vector<64xf32>
    %928 = vector.multi_reduction <maximumf>, %927, %cst_197 [1] : vector<64x128xf32> to vector<64xf32>
    %929 = vector.shape_cast %928 : vector<64xf32> to vector<64x1xf32>
    %930 = vector.broadcast %929 : vector<64x1xf32> to vector<64x128xf32>
    %931 = arith.subf %927, %930 : vector<64x128xf32>
    %932 = math.exp %931 : vector<64x128xf32>
    %cst_198 = arith.constant dense<0.000000e+00> : vector<64xf32>
    %933 = vector.multi_reduction <add>, %932, %cst_198 [1] : vector<64x128xf32> to vector<64xf32>
    %934 = vector.shape_cast %933 : vector<64xf32> to vector<64x1xf32>
    %935 = math.log %934 : vector<64x1xf32>
    %936 = vector.broadcast %935 : vector<64x1xf32> to vector<64x128xf32>
    %937 = arith.subf %931, %936 : vector<64x128xf32>
    %938 = vector.shape_cast %937 : vector<64x128xf32> to vector<8x8x128xf32>
    %939 = vector.extract_strided_slice %938 {offsets = [0, 0, 0], sizes = [8, 1, 128], strides = [1, 1, 1]} : vector<8x8x128xf32> to vector<8x1x128xf32>
    %940 = vector.shape_cast %939 : vector<8x1x128xf32> to vector<8x128xf32>
    %c0_199 = arith.constant 0 : index
    %c0_200 = arith.constant 0 : index
    %941 = vector.load %arg12[%c0_199, %c0_200] : memref<16x128xf32, #tpu.memory_space<vmem>>, vector<8x128xf32>
    tpu.vector_store %arg12[%c0_199, %c0_200], %940 {strides = array<i32>} : memref<16x128xf32, #tpu.memory_space<vmem>>, vector<8x128xf32>,
    %942 = vector.extract_strided_slice %938 {offsets = [0, 1, 0], sizes = [8, 1, 128], strides = [1, 1, 1]} : vector<8x8x128xf32> to vector<8x1x128xf32>
    %943 = vector.shape_cast %942 : vector<8x1x128xf32> to vector<8x128xf32>
    %c8_201 = arith.constant 8 : index
    %c0_202 = arith.constant 0 : index
    %944 = vector.load %arg12[%c8_201, %c0_202] : memref<16x128xf32, #tpu.memory_space<vmem>>, vector<8x128xf32>
    tpu.vector_store %arg12[%c8_201, %c0_202], %943 {strides = array<i32>} : memref<16x128xf32, #tpu.memory_space<vmem>>, vector<8x128xf32>,
    return
  }
}

</mosaic_0001>

<bundles_post_ra>
// kernel: dl_lstm_forward.1
= control target key start
LH: loop header
LB: loop body
LE: loop exit
PB: predicated region body
PF: predicated region fallthrough
CT: control target
= control target key end

     0   :  { %17 = vsyncpa [#allocation5], 0  ;;  %s5503_s0 = inlined_call_operand.vmem [shape: s32[64,1], index: 0, kind: input, shape index: {}]   ;;  %s5504_s1 = inlined_call_operand.vmem [shape: s32[8,1], index: 1, kind: input, shape index: {}]   ;;  %s5505_s2 = inlined_call_operand.vmem [shape: f32[72,256], index: 2, kind: input, shape index: {}]   ;;  %s5506_s3 = inlined_call_operand.vmem [shape: f32[1,256], index: 3, kind: input, shape index: {}]   ;;  %s5507_s4 = inlined_call_operand.hbm [shape: f32[64,256], index: 4, kind: input, shape index: {}]   ;;  %s5508_s5 = inlined_call_operand.hbm [shape: f32[64,256], index: 5, kind: input, shape index: {}]   ;;  %s5509_s6 = inlined_call_operand.vmem [shape: f32[1,256], index: 6, kind: input, shape index: {}]   ;;  %s5510_s7 = inlined_call_operand.hbm [shape: f32[64,256], index: 7, kind: input, shape index: {}]   ;;  %s5511_s8 = inlined_call_operand.vmem [shape: f32[4,8,32], index: 8, kind: input, shape index: {}]   ;;  %s5512_s9 = inlined_call_operand.vmem [shape: f32[4,8,32], index: 9, kind: input, shape index: {}]   ;;  %s5513_s10 = inlined_call_operand.hbm [shape: f32[64,128], index: 10, kind: input, shape index: {}]   ;;  %s5514_s11 = inlined_call_operand.vmem [shape: f32[1,128], index: 11, kind: input, shape index: {}]   ;;  %s5515_s12 = inlined_call_operand.vmem [shape: f32[16,128], index: 12, kind: output, shape index: {}]  }
   0x1   :  { %18 = vsyncpa [#allocation7], 0 }
   0x2   :  { %19 = vsyncpa [#allocation10], 0  ;;  %s45_s23 = sshll.u32 %s5508_s5, 4  ;;  %s3793_s24 = smov [#allocation6]   ;;  %s46_s23 = int_to_ptr.hbm [resolvable:$true] %s45_s23 }
   0x3   :  { %s47_s25 = sshll.u32 %s3793_s24, 4  ;;  %s32_s28 = sshll.u32 %s5507_s4, 4  ;;  %s48_s25 = int_to_ptr.vmem [resolvable:$true] %s47_s25  ;;  %s33_s28 = int_to_ptr.hbm [resolvable:$true] %s32_s28 }
   0x4   :  { %s3794_s29 = smov 256   ;;  %s3795_s30 = smov 16  }
   0x5   :  { %53 = dma.hbm_to_vmem [thread:$0]  %s46_s23, 2048, %s48_s25, [#allocation7], %s3794_s29, %s3794_s29, %s3795_s30  }
   0x6   :  { %s3796_s13 = smov [#allocation4]   ;;  %s60_s17 = sshll.u32 %s5510_s7, 4  ;;  %s61_s17 = int_to_ptr.hbm [resolvable:$true] %s60_s17 }
   0x7   :  { %s34_s14 = sshll.u32 %s3796_s13, 4  ;;  %s77_s19 = sshll.u32 %s5513_s10, 4  ;;  %s35_s14 = int_to_ptr.vmem [resolvable:$true] %s34_s14  ;;  %s78_s19 = int_to_ptr.hbm [resolvable:$true] %s77_s19 }
   0x8   :  { %40 = dma.hbm_to_vmem [thread:$0]  %s33_s28, 2048, %s35_s14, [#allocation5], %s3794_s29, %s3794_s29, %s3795_s30  }
   0x9   :  { %s3797_s20 = smov [#allocation8]   ;;  %s3798_s4 = smov [#allocation9]  }
   0xa   :  { %s62_s21 = sshll.u32 %s3797_s20, 4  ;;  %s79_s22 = sshll.u32 %s3798_s4, 4  ;;  %s63_s21 = int_to_ptr.vmem [resolvable:$true] %s62_s21  ;;  %s80_s22 = int_to_ptr.vmem [resolvable:$true] %s79_s22 }
   0xb   :  { %68 = dma.hbm_to_vmem [thread:$0]  %s61_s17, 2048, %s63_s21, [#allocation7], %s3794_s29, %s3794_s29, %s3795_s30  }
   0xc   :  { %s3799_s23 = smov 128   ;;  %s3800_s24 = smov 8  }
   0xd   :  { %85 = dma.hbm_to_vmem [thread:$0]  %s78_s19, 1024, %s80_s22, [#allocation10], %s3799_s23, %s3799_s23, %s3800_s24  }
   0xe   :  { %3787 = dma.done.wait [#allocation5], 2048  }
   0xf   :  { %3788 = vsyncadd [#allocation5], 4294965248 }
  0x10   :  { %3789 = dma.done.wait [#allocation7], 4096  }
  0x11   :  { %3790 = vsyncadd [#allocation7], 4294963200 }
  0x12   :  { %3791 = dma.done.wait [#allocation10], 1024  }
  0x13   :  { %3792 = vsyncadd [#allocation10], 4294966272  ;;  %v3801_v0 = vmov 0   ;;  %v107_v1 = vld [vmem:[%s5503_s0 + $0x10] sm:$0xff]  ;;  %v105_v2 = vld [vmem:[%s5503_s0] sm:$0xff]  ;;  %s3802_s29 = smov 32   ;;  %v113_v42 = vlaneseq }
  0x14   :  { %3400 = vset.pattern.permute.xlu1 %v3801_v0  ;;  %3399 = vset.pattern.permute.xlu0 %v3801_v0  ;;  %v109_v3 = vld [vmem:[%s5503_s0 + $0x20] sm:$0xff]  ;;  %v180_v5 = vld [vmem:[%s5505_s2 + $0x88] sm:$0xff]  ;;  %v177_v6 = vld [vmem:[%s5505_s2 + $0x70] sm:$0xff]  ;;  %vm187_vm0 = vcmask 588800   ;;  %v3803_v48 = vmov 0.0   ;;  %vm320_vm3 = vcmask 261120  }
  0x15   :  { %3401 = vset.pattern.permute.xlu2 %v3801_v0  ;;  %122 = vperm.xlu1 %3400, %v107_v1   ;;  %v179_v4 = vld [vmem:[%s5505_s2 + $0x80] sm:$0xff]  ;;  %v178_v7 = vld [vmem:[%s5505_s2 + $0x78] sm:$0xff]  ;;  %v176_v9 = vld [vmem:[%s5505_s2 + $0x68] sm:$0xff]  ;;  %v4039_v45 = vand.u32 127, %v113_v42  ;;  %vm322_vm5 = vcmask 523264   ;;  %s3805_s22 = smov 96  }
  0x16   :  { %116 = vperm.xlu0 %3399, %v105_v2   ;;  %128 = vperm.xlu2 %3401, %v109_v3   ;;  %v175_v8 = vld [vmem:[%s5505_s2 + $0x60] sm:$0xff]  ;;  %v108_v10 = vld [vmem:[%s5503_s0 + $0x18] sm:$0xff]  ;;  %v106_v11 = vld [vmem:[%s5503_s0 + $0x8] sm:$0xff] }
  0x17   :  { %219 = vmatpush.msra.mxu0 %v179_v4  ;;  %260 = vmatpush.msra.mxu1 %v180_v5  ;;  %v173_v12 = vld [vmem:[%s5505_s2 + $0x50] sm:$0xff]  ;;  %v174_v13 = vld [vmem:[%s5505_s2 + $0x58] sm:$0xff]  ;;  %v110_v14 = vld [vmem:[%s5503_s0 + $0x28] sm:$0xff] }
  0x18   :  { %v171_v15 = vld [vmem:[%s5505_s2 + $0x40] sm:$0xff]  ;;  %v172_v16 = vld [vmem:[%s5505_s2 + $0x48] sm:$0xff]  ;;  %v169_v17 = vld [vmem:[%s5505_s2 + $0x30] sm:$0xff] }
  0x19   :  { %220 = vmatpush.msra.mxu0 %v177_v6  ;;  %261 = vmatpush.msra.mxu1 %v178_v7  ;;  %v170_v18 = vld [vmem:[%s5505_s2 + $0x38] sm:$0xff]  ;;  %v167_v19 = vld [vmem:[%s5505_s2 + $0x20] sm:$0xff]  ;;  %v168_v20 = vld [vmem:[%s5505_s2 + $0x28] sm:$0xff] }
  0x1a   :  { %v3949_v21 = vld [vmem:[%s5511_s8 + $0x8] sm:$0xff]  ;;  %v111_v22 = vld [vmem:[%s5503_s0 + $0x30] sm:$0xff]  ;;  %v166_v24 = vld [vmem:[%s5505_s2 + $0x18] sm:$0xff] }
  0x1b   :  { %221 = vmatpush.msra.mxu0 %v175_v8  ;;  %262 = vmatpush.msra.mxu1 %v176_v9  ;;  %v165_v23 = vld [vmem:[%s5505_s2 + $0x10] sm:$0xff]  ;;  %v112_v25 = vld [vmem:[%s5503_s0 + $0x38] sm:$0xff]  ;;  %v163_v26 = vld [vmem:[%s5505_s2] sm:$0xff] }
  0x1c   :  { %v164_v27 = vld [vmem:[%s5505_s2 + $0x8] sm:$0xff]  ;;  %v3971_v28 = vld [vmem:[#allocation4 + $0x70] sm:$0xff]  ;;  %v3974_v29 = vld [vmem:[#allocation4 + $0x60] sm:$0xff] }
  0x1d   :  { %125 = vperm.xlu1 %3400, %v108_v10   ;;  %222 = vmatpush.msra.mxu0 %v173_v12  ;;  %v3977_v30 = vld [vmem:[#allocation4 + $0x50] sm:$0xff]  ;;  %v3983_v31 = vld [vmem:[#allocation4 + $0x40] sm:$0xff]  ;;  %v3992_v34 = vld [vmem:[#allocation4 + $0x78] sm:$0xff] }
  0x1e   :  { %119 = vperm.xlu0 %3399, %v106_v11   ;;  %263 = vmatpush.msra.mxu1 %v174_v13  ;;  %v3987_v32 = vld [vmem:[#allocation4 + $0x30] sm:$0xff]  ;;  %v3990_v33 = vld [vmem:[#allocation4 + $0x20] sm:$0xff]  ;;  %v4005_v37 = vld [vmem:[#allocation4 + $0x68] sm:$0xff] }
  0x1f   :  { %131 = vperm.xlu2 %3401, %v110_v14   ;;  %223 = vmatpush.msra.mxu0 %v171_v15  ;;  %v3995_v35 = vld [vmem:[#allocation4 + $0x10] sm:$0xff]  ;;  %v4003_v36 = vld [vmem:[#allocation4] sm:$0xff]  ;;  %v4009_v38 = vld [vmem:[#allocation4 + $0x58] sm:$0xff] }
  0x20   :  { %264 = vmatpush.msra.mxu1 %v172_v16  ;;  %334 = vmatpush.msra.mxu2 %v3971_v28  ;;  %v4014_v39 = vld [vmem:[#allocation4 + $0x48] sm:$0xff]  ;;  %v4017_v40 = vld [vmem:[#allocation4 + $0x38] sm:$0xff]  ;;  %v4073_v53 = vld [vmem:[%s5511_s8] sm:$0xff] }
  0x21   :  { %224 = vmatpush.msra.mxu0 %v169_v17  ;;  %354 = vmatpush.msra.mxu3 %v3992_v34  ;;  %v4022_v41 = vld [vmem:[#allocation4 + $0x28] sm:$0xff]  ;;  %v4030_v43 = vld [vmem:[#allocation4 + $0x18] sm:$0xff]  ;;  %v313_v58 = vld [vmem:[%s5512_s9] sm:$0xff] }
  0x22   :  { %265 = vmatpush.msra.mxu1 %v170_v18  ;;  %335 = vmatpush.msra.mxu2 %v3974_v29  ;;  %v4035_v44 = vld [vmem:[#allocation4 + $0x8] sm:$0xff]  ;;  %v181_v6 = vld [vmem:[%s5506_s3] sm:$0x3]  ;;  %s3804_s3 = smov 64  }
  0x23   :  { %225 = vmatpush.msra.mxu0 %v167_v19  ;;  %355 = vmatpush.msra.mxu3 %v4005_v37  ;;  %v4135_v7 = vperm.slane %v181_v6, 1  ;;  %v4142_v11 = vperm.slane %v181_v6, 0 }
  0x24   :  { %266 = vmatpush.msra.mxu1 %v168_v20  ;;  %336 = vmatpush.msra.mxu2 %v3977_v30 }
  0x25   :  { %317 = vrot.lane.b32.xlu1 %v3949_v21, %s3802_s29  ;;  %226 = vmatpush.msra.mxu0 %v165_v23 }
  0x26   :  { %134 = vperm.xlu0 %3399, %v111_v22   ;;  %267 = vmatpush.msra.mxu1 %v166_v24 }
  0x27   :  { %137 = vperm.xlu2 %3401, %v112_v25   ;;  %227 = vmatpush.msra.mxu0 %v163_v26  ;;  %v3261_v26 = vld [vmem:[%s5512_s9 + $0x8] sm:$0xff] }
  0x28   :  { %268 = vmatpush.msra.mxu1 %v164_v27  ;;  %337 = vmatpush.msra.mxu2 %v3983_v31 }
  0x29   :  { %1107 = vmatpush.msrb.mxu0 %v3971_v28  ;;  %356 = vmatpush.msra.mxu3 %v4009_v38 }
  0x2a   :  { %338 = vmatpush.msra.mxu2 %v3987_v32  ;;  %1127 = vmatpush.msrb.mxu1 %v3992_v34 }
  0x2b   :  { %1108 = vmatpush.msrb.mxu0 %v3974_v29  ;;  %357 = vmatpush.msra.mxu3 %v4014_v39 }
  0x2c   :  { %339 = vmatpush.msra.mxu2 %v3990_v33  ;;  %1128 = vmatpush.msrb.mxu1 %v4005_v37 }
  0x2d   :  { %1109 = vmatpush.msrb.mxu0 %v3977_v30  ;;  %358 = vmatpush.msra.mxu3 %v4017_v40 }
  0x2e   :  { %340 = vmatpush.msra.mxu2 %v3995_v35  ;;  %1129 = vmatpush.msrb.mxu1 %v4009_v38 }
  0x2f   :  { %1110 = vmatpush.msrb.mxu0 %v3983_v31  ;;  %359 = vmatpush.msra.mxu3 %v4022_v41 }
  0x30   :  { %341 = vmatpush.msra.mxu2 %v4003_v36  ;;  %1130 = vmatpush.msrb.mxu1 %v4014_v39 }
  0x31   :  { %1111 = vmatpush.msrb.mxu0 %v3987_v32  ;;  %360 = vmatpush.msra.mxu3 %v4030_v43 }
  0x32   :  { %503 = vmatpush.msrb.mxu2 %v3971_v28  ;;  %1131 = vmatpush.msrb.mxu1 %v4017_v40 }
  0x33   :  { %1112 = vmatpush.msrb.mxu0 %v3990_v33  ;;  %361 = vmatpush.msra.mxu3 %v4035_v44 }
  0x34   :  { %504 = vmatpush.msrb.mxu2 %v3974_v29  ;;  %1132 = vmatpush.msrb.mxu1 %v4022_v41 }
  0x35   :  { %1113 = vmatpush.msrb.mxu0 %v3995_v35  ;;  %523 = vmatpush.msrb.mxu3 %v3992_v34 }
  0x36   :  { %505 = vmatpush.msrb.mxu2 %v3977_v30  ;;  %1133 = vmatpush.msrb.mxu1 %v4030_v43 }
  0x37   :  { %1114 = vmatpush.msrb.mxu0 %v4003_v36  ;;  %524 = vmatpush.msrb.mxu3 %v4005_v37 }
  0x38   :  { %506 = vmatpush.msrb.mxu2 %v3983_v31  ;;  %1134 = vmatpush.msrb.mxu1 %v4035_v44 }
  0x39   :  { %525 = vmatpush.msrb.mxu3 %v4009_v38  ;;  %407 = vrot.lane.b32.xlu2 %v313_v58, %s3802_s29 }
  0x3a   :  { %507 = vmatpush.msrb.mxu2 %v3987_v32 }
  0x3b   :  { %526 = vmatpush.msrb.mxu3 %v4014_v39 }
  0x3c   :  { %508 = vmatpush.msrb.mxu2 %v3990_v33 }
  0x3d   :  { %527 = vmatpush.msrb.mxu3 %v4017_v40 }
  0x3e   :  { %509 = vmatpush.msrb.mxu2 %v3995_v35 }
  0x3f   :  { %528 = vmatpush.msrb.mxu3 %v4022_v41 }
  0x40   :  { %510 = vmatpush.msrb.mxu2 %v4003_v36 }
  0x41   :  { %529 = vmatpush.msrb.mxu3 %v4030_v43 }
  0x43   :  { %530 = vmatpush.msrb.mxu3 %v4035_v44 }
  0x70   :  { %v129_v59 = vpop.permute.xlu2 %128 }
  0x71   :  { %vm143_vm7 = vcmp.eq.s32.totalorder %v129_v59, %v4039_v45 }
  0x72   :  { %v3240_v60 = vsel %vm143_vm7, 1.0, %v3803_v48 }
  0x79   :  { %v132_v61 = vpop.permute.xlu2 %131 }
  0x7a   :  { %vm144_vm8 = vcmp.eq.s32.totalorder %v132_v61, %v4039_v45 }
  0x7b   :  { %v3241_v62 = vsel %vm144_vm8, 1.0, %v3803_v48 }
  0x81   :  { %v138_v2 = vpop.permute.xlu2 %137 }
  0x82   :  { %vm146_vm10 = vcmp.eq.s32.totalorder %v138_v2, %v4039_v45 }
  0x83   :  { %v3243_v3 = vsel %vm146_vm10, 1.0, %v3803_v48 }
  0x87   :  { %v123_v46 = vpop.permute.xlu1 %122 }
  0x88   :  { %v117_v47 = vpop.permute.xlu0 %116  ;;  %vm141_vm4 = vcmp.eq.s32.totalorder %v123_v46, %v4039_v45 }
  0x89   :  { %vm139_vm1 = vcmp.eq.s32.totalorder %v117_v47, %v4039_v45  ;;  %v3238_v56 = vsel %vm141_vm4, 1.0, %v3803_v48 }
  0x8a   :  { %v3236_v49 = vsel %vm139_vm1, 1.0, %v3803_v48 }
  0x8b   :  { %3244 = vmatmul.msk.f32.vlgmr.msra.gmra.mxu0 %vm187_vm0, %v3236_v49  ;;  %3252 = vmatmul.msk.f32.vlgmr.msra.gmra.mxu1 %vm187_vm0, %v3236_v49 }
  0x8c   :  { %1391 = vmatpush.msra.mxu0 %v3971_v28  ;;  %1411 = vmatpush.msra.mxu1 %v3992_v34 }
  0x8e   :  { %1392 = vmatpush.msra.mxu0 %v3974_v29  ;;  %1412 = vmatpush.msra.mxu1 %v4005_v37 }
  0x8f   :  { %v126_v50 = vpop.permute.xlu1 %125 }
  0x90   :  { %v120_v51 = vpop.permute.xlu0 %119  ;;  %1393 = vmatpush.msra.mxu0 %v3977_v30  ;;  %1413 = vmatpush.msra.mxu1 %v4009_v38  ;;  %vm142_vm6 = vcmp.eq.s32.totalorder %v126_v50, %v4039_v45 }
  0x91   :  { %vm140_vm2 = vcmp.eq.s32.totalorder %v120_v51, %v4039_v45  ;;  %v3239_v57 = vsel %vm142_vm6, 1.0, %v3803_v48 }
  0x92   :  { %v3237_v52 = vsel %vm140_vm2, 1.0, %v3803_v48  ;;  %1394 = vmatpush.msra.mxu0 %v3983_v31  ;;  %1414 = vmatpush.msra.mxu1 %v4014_v39 }
  0x93   :  { %3245 = vmatmul.msk.f32.gmra.mxu0 %vm187_vm0, %v3237_v52  ;;  %3253 = vmatmul.msk.f32.gmra.mxu1 %vm187_vm0, %v3237_v52 }
  0x94   :  { %1395 = vmatpush.msra.mxu0 %v3987_v32  ;;  %1415 = vmatpush.msra.mxu1 %v4017_v40 }
  0x96   :  { %1396 = vmatpush.msra.mxu0 %v3990_v33  ;;  %1416 = vmatpush.msra.mxu1 %v4022_v41 }
  0x97   :  { %v318_v54 = vpop.permute.xlu1 %317 }
  0x98   :  { %v321_v55 = vsel %vm320_vm3, %v4073_v53, %v318_v54  ;;  %1397 = vmatpush.msra.mxu0 %v3995_v35  ;;  %1417 = vmatpush.msra.mxu1 %v4030_v43  ;;  %v135_v63 = vpop.permute.xlu0 %134 }
  0x99   :  { %3262 = vmatmul.msk.f32.vlgmr.msra.gmra.mxu2 %vm322_vm5, %v321_v55  ;;  %3263 = vmatmul.msk.f32.vlgmr.msra.gmra.mxu3 %vm322_vm5, %v321_v55  ;;  %vm145_vm9 = vcmp.eq.s32.totalorder %v135_v63, %v4039_v45 }
  0x9a   :  { %657 = vmatpush.msra.mxu2 %v3971_v28  ;;  %677 = vmatpush.msra.mxu3 %v3992_v34  ;;  %v3242_v1 = vsel %vm145_vm9, 1.0, %v3803_v48 }
  0x9b   :  { %3246 = vmatmul.msk.f32.gmra.mxu0 %vm187_vm0, %v3238_v56  ;;  %3254 = vmatmul.msk.f32.gmra.mxu1 %vm187_vm0, %v3238_v56 }
  0x9c   :  { %1398 = vmatpush.msra.mxu0 %v4003_v36  ;;  %658 = vmatpush.msra.mxu2 %v3974_v29 }
  0x9d   :  { %678 = vmatpush.msra.mxu3 %v4005_v37  ;;  %1418 = vmatpush.msra.mxu1 %v4035_v44 }
  0x9e   :  { %659 = vmatpush.msra.mxu2 %v3977_v30 }
  0x9f   :  { %679 = vmatpush.msra.mxu3 %v4009_v38 }
  0xa0   :  { %660 = vmatpush.msra.mxu2 %v3983_v31 }
  0xa1   :  { %680 = vmatpush.msra.mxu3 %v4014_v39 }
  0xa2   :  { %661 = vmatpush.msra.mxu2 %v3987_v32 }
  0xa3   :  { %3247 = vmatmul.msk.f32.gmra.mxu0 %vm187_vm0, %v3239_v57  ;;  %3255 = vmatmul.msk.f32.gmra.mxu1 %vm187_vm0, %v3239_v57 }
  0xa4   :  { %681 = vmatpush.msra.mxu3 %v4017_v40  ;;  %662 = vmatpush.msra.mxu2 %v3990_v33 }
  0xa6   :  { %682 = vmatpush.msra.mxu3 %v4022_v41  ;;  %663 = vmatpush.msra.mxu2 %v3995_v35 }
  0xa8   :  { %683 = vmatpush.msra.mxu3 %v4030_v43  ;;  %664 = vmatpush.msra.mxu2 %v4003_v36 }
  0xaa   :  { %684 = vmatpush.msra.mxu3 %v4035_v44 }
  0xab   :  { %3248 = vmatmul.msk.f32.gmra.mxu0 %vm187_vm0, %v3240_v60  ;;  %3256 = vmatmul.msk.f32.gmra.mxu1 %vm187_vm0, %v3240_v60 }
  0xb3   :  { %3249 = vmatmul.msk.f32.gmra.mxu0 %vm187_vm0, %v3241_v62  ;;  %3257 = vmatmul.msk.f32.gmra.mxu1 %vm187_vm0, %v3241_v62 }
  0xbb   :  { %3250 = vmatmul.msk.f32.gmra.mxu0 %vm187_vm0, %v3242_v1  ;;  %3258 = vmatmul.msk.f32.gmra.mxu1 %vm187_vm0, %v3242_v1 }
  0xc3   :  { %3251 = vmatmul.msk.f32.gmra.mxu0 %vm187_vm0, %v3243_v3  ;;  %3259 = vmatmul.msk.f32.gmra.mxu1 %vm187_vm0, %v3243_v3 }
 0x108   :  { %v229_v4 = vpop.f32.mrf.mxu0  ;;  %v4130_v5 = vpop.f32.mrf.mxu1 }
 0x109   :  { %v230_v15 = vadd.f32 %v229_v4, %v4142_v11 }
 0x110   :  { %v4137_v8 = vpop.f32.mrf.mxu0  ;;  %v273_v9 = vpop.f32.mrf.mxu1 }
 0x111   :  { %v4140_v10 = vadd.f32 %v273_v9, %v4135_v7 }
 0x118   :  { %v4144_v12 = vpop.f32.mrf.mxu0  ;;  %v276_v13 = vpop.f32.mrf.mxu1 }
 0x119   :  { %v4147_v14 = vadd.f32 %v276_v13, %v4135_v7 }
 0x11c   :  { %v343_v16 = vpop.f32.mrf.mxu2  ;;  %v363_v52 = vpop.f32.mrf.mxu3 }
 0x11d   :  { %v344_v17 = vadd.f32 %v343_v16, %v230_v15 }
 0x11f   :  { %3403 = vtanh.f32 %v344_v17  ;;  %v3264_v56 = vmul.f32 -1.442695, %v344_v17 }
 0x120   :  { %v4150_v18 = vpop.f32.mrf.mxu0  ;;  %v279_v19 = vpop.f32.mrf.mxu1 }
 0x121   :  { %v4153_v20 = vadd.f32 %v279_v19, %v4135_v7 }
 0x125   :  { %v3404_v22 = vpop.eup %3403 }
 0x126   :  { %412 = vrot.lane.b32.xlu0 %v3404_v22, %s3804_s3 }
 0x128   :  { %v4156_v23 = vpop.f32.mrf.mxu0  ;;  %v282_v24 = vpop.f32.mrf.mxu1 }
 0x129   :  { %v4159_v25 = vadd.f32 %v282_v24, %v4135_v7 }
 0x12e   :  { %446 = vrot.lane.b32.xlu0 %v3261_v26, %s3802_s29 }
 0x130   :  { %v4165_v27 = vpop.f32.mrf.mxu0  ;;  %v285_v42 = vpop.f32.mrf.mxu1 }
 0x131   :  { %v4168_v45 = vadd.f32 %v285_v42, %v4135_v7 }
 0x138   :  { %v247_v46 = vpop.f32.mrf.mxu0  ;;  %v288_v47 = vpop.f32.mrf.mxu1 }
 0x139   :  { %v4171_v48 = vadd.f32 %v247_v46, %v4142_v11  ;;  %v4174_v49 = vadd.f32 %v288_v47, %v4135_v7 }
 0x140   :  { %v291_v50 = vpop.f32.mrf.mxu1 }
 0x141   :  { %v292_v51 = vadd.f32 %v291_v50, %v4135_v7 }
 0x143   :  { %v364_v54 = vadd.f32 %v363_v52, %v292_v51 }
 0x145   :  { %3405 = vtanh.f32 %v364_v54  ;;  %v3265_v63 = vmul.f32 -1.442695, %v364_v54 }
 0x146   :  { %3407 = vpow2.f32 %v3264_v56  ;;  %v4182_v56 = vld [vmem:[%s5504_s1] sm:$0xff] }
 0x147   :  { %vm427_vm4 = vcmp.gt.s32.totalorder %v4182_v56, 0  ;;  %vm466_vm6 = vcmp.gt.s32.totalorder %v4182_v56, 7 }
 0x14b   :  { %v3406_v55 = vpop.eup %3405 }
 0x14c   :  { %451 = vrot.lane.b32.xlu1 %v3406_v55, %s3804_s3  ;;  %v3408_v57 = vpop.eup %3407 }
 0x14d   :  { %v372_v58 = vadd.f32 1.0, %v3408_v57  ;;  %v428_v57 = vsel %vm427_vm4, 1, %v3801_v0 }
 0x14f   :  { %3409 = vrcp.f32 %v372_v58  ;;  %v385_v2 = vand.u32 2147483648, %v372_v58  ;;  %vm379_vm12 = vweird.f32 %v372_v58  ;;  %v383_v3 = vand.u32 2147483647, %v372_v58 }
 0x150   :  { %3411 = vpow2.f32 %v3265_v63 }
 0x151   :  { %v386_v6 = vor.u32 1.1754944e-38, %v385_v2  ;;  %vm384_vm14 = vcmp.eq.f32.partialorder %v383_v3, 8.507059e+37  ;;  %v467_v3 = vsel %vm466_vm6, 1, %v3801_v0 }
 0x155   :  { %v3410_v59 = vpop.eup %3409 }
 0x156   :  { %v375_v60 = vmul.f32 %v3410_v59, %v372_v58  ;;  %vm380_vm11 = vweird.f32 %v3410_v59  ;;  %v3412_v16 = vpop.eup %3411  ;;  %v4189_v58 = vpop.permute.xlu2 %407 }
 0x157   :  { %vm381_vm13 = vmor %vm379_vm12, %vm380_vm11  ;;  %v373_v17 = vadd.f32 1.0, %v3412_v16 }
 0x158   :  { %v376_v61 = vsub.f32 1.0, %v375_v60 }
 0x159   :  { %3413 = vrcp.f32 %v373_v17  ;;  %v400_v46 = vand.u32 2147483648, %v373_v17  ;;  %vm394_vm0 = vweird.f32 %v373_v17  ;;  %v398_v47 = vand.u32 2147483647, %v373_v17 }
 0x15a   :  { %v377_v62 = vmul.f32 %v3410_v59, %v376_v61 }
 0x15b   :  { %v401_v51 = vor.u32 1.1754944e-38, %v400_v46  ;;  %vm399_vm2 = vcmp.eq.f32.partialorder %v398_v47, 8.507059e+37 }
 0x15c   :  { %v378_v1 = vadd.f32 %v3410_v59, %v377_v62 }
 0x15e   :  { %v382_v4 = vsel %vm381_vm13, %v3410_v59, %v378_v1 }
 0x15f   :  { %v387_v9 = vsel %vm384_vm14, %v386_v6, %v382_v4  ;;  %v3414_v19 = vpop.eup %3413 }
 0x160   :  { %v390_v22 = vmul.f32 %v3414_v19, %v373_v17  ;;  %vm395_vm15 = vweird.f32 %v3414_v19  ;;  %v410_v59 = vmul.f32 %v4189_v58, %v387_v9 }
 0x161   :  { %vm396_vm1 = vmor %vm394_vm0, %vm395_vm15 }
 0x162   :  { %v391_v24 = vsub.f32 1.0, %v390_v22 }
 0x164   :  { %v392_v26 = vmul.f32 %v3414_v19, %v391_v24 }
 0x166   :  { %v393_v42 = vadd.f32 %v3414_v19, %v392_v26 }
 0x168   :  { %v397_v50 = vsel %vm396_vm1, %v3414_v19, %v393_v42  ;;  %vm592_vm1 = vcmp.gt.s32.totalorder %v4182_v56, 1 }
 0x169   :  { %v402_v52 = vsel %vm399_vm2, %v401_v51, %v397_v50  ;;  %vm623_vm2 = vcmp.gt.s32.totalorder %v4182_v56, 6 }
 0x198   :  { %v413_v13 = vpop.permute.xlu0 %412 }
 0x199   :  { %v415_v15 = vmul.f32 %v413_v13, %v387_v9 }
 0x19b   :  { %417 = vrot.lane.b32.xlu1 %v415_v15, %s3802_s29 }
 0x1a0   :  { %v4195_v63 = vpop.permute.xlu0 %446 }
 0x1a1   :  { %v449_v1 = vmul.f32 %v4195_v63, %v402_v52 }
 0x1be   :  { %v452_v54 = vpop.permute.xlu1 %451 }
 0x1bf   :  { %v454_v55 = vmul.f32 %v452_v54, %v402_v52 }
 0x1c1   :  { %456 = vrot.lane.b32.xlu2 %v454_v55, %s3802_s29 }
 0x1c9   :  { %430 = vperm.xlu2 %3401, %v428_v57  }
 0x1d1   :  { %472 = vrot.lane.b32.xlu2 %v3949_v21, %s3805_s22 }
 0x20d   :  { %v418_v60 = vpop.permute.xlu1 %417 }
 0x20e   :  { %v4192_v61 = vadd.f32 %v418_v60, %v410_v59 }
 0x210   :  { %3415 = vtanh.f32 %v4192_v61 }
 0x216   :  { %v3416_v62 = vpop.eup %3415 }
 0x217   :  { %423 = vrot.lane.b32.xlu0 %v3416_v62, %s3804_s3 }
 0x21b   :  { %v457_v2 = vpop.permute.xlu2 %456 }
 0x21c   :  { %v4200_v21 = vadd.f32 %v457_v2, %v449_v1 }
 0x21e   :  { %3417 = vtanh.f32 %v4200_v21 }
 0x21f   :  { %469 = vperm.xlu0 %3399, %v467_v3  }
 0x223   :  { %v4207_v13 = vpop.permute.xlu2 %430 }
 0x224   :  { %v3418_v4 = vpop.eup %3417  ;;  %vm5516_vm8 = vcmp.eq.s32.totalorder %v4207_v13, 1 }
 0x225   :  { %462 = vrot.lane.b32.xlu1 %v3418_v4, %s3804_s3 }
 0x22b   :  { %v473_v17 = vpop.permute.xlu2 %472 }
 0x22d   :  { %434 = vrot.lane.b32.xlu1 %v4073_v53, %s3805_s22 }
 0x289   :  { %v424_v6 = vpop.permute.xlu0 %423 }
 0x28a   :  { %v4221_v53 = vmul.f32 %v424_v6, %v387_v9  ;;  %v233_v9 = vadd.f32 %v4137_v8, %v4142_v11 }
 0x291   :  { %v4209_v15 = vpop.permute.xlu0 %469 }
 0x292   :  { %vm5517_vm7 = vcmp.eq.s32.totalorder %v4209_v15, 1 }
 0x297   :  { %v463_v16 = vpop.permute.xlu1 %462 }
 0x298   :  { %v4211_v19 = vmul.f32 %v463_v16, %v402_v52 }
 0x29a   :  { %v4217_v22 = vsel %vm5517_vm7, %v4211_v19, %v473_v17 }
 0x29b   :  { %488 = vrot.lane.b32.xlu1 %v4217_v22, %s3804_s3 }
 0x29f   :  { %v435_v24 = vpop.permute.xlu1 %434 }
 0x2a0   :  { %v4227_v26 = vsel %vm5516_vm8, %v4221_v53, %v435_v24 }
 0x2a1   :  { %484 = vrot.lane.b32.xlu0 %v4227_v26, %s3802_s29 }
 0x30d   :  { %v489_v42 = vpop.permute.xlu1 %488 }
 0x313   :  { %v485_v46 = vpop.permute.xlu0 %484 }
 0x314   :  { %v491_v47 = vsel %vm320_vm3, %v485_v46, %v489_v42 }
 0x315   :  { %3266 = vmatmul.msk.f32.vlgmr.msrb.gmra.mxu2 %vm322_vm5, %v491_v47  ;;  %3267 = vmatmul.msk.f32.vlgmr.msrb.gmra.mxu3 %vm322_vm5, %v491_v47 }
 0x316   :  { %811 = vmatpush.msrb.mxu2 %v3971_v28  ;;  %831 = vmatpush.msrb.mxu3 %v3992_v34 }
 0x318   :  { %812 = vmatpush.msrb.mxu2 %v3974_v29  ;;  %832 = vmatpush.msrb.mxu3 %v4005_v37 }
 0x31a   :  { %813 = vmatpush.msrb.mxu2 %v3977_v30  ;;  %833 = vmatpush.msrb.mxu3 %v4009_v38 }
 0x31c   :  { %814 = vmatpush.msrb.mxu2 %v3983_v31  ;;  %834 = vmatpush.msrb.mxu3 %v4014_v39 }
 0x31e   :  { %815 = vmatpush.msrb.mxu2 %v3987_v32  ;;  %835 = vmatpush.msrb.mxu3 %v4017_v40 }
 0x320   :  { %816 = vmatpush.msrb.mxu2 %v3990_v33  ;;  %836 = vmatpush.msrb.mxu3 %v4022_v41 }
 0x322   :  { %817 = vmatpush.msrb.mxu2 %v3995_v35  ;;  %837 = vmatpush.msrb.mxu3 %v4030_v43 }
 0x324   :  { %818 = vmatpush.msrb.mxu2 %v4003_v36  ;;  %838 = vmatpush.msrb.mxu3 %v4035_v44 }
 0x398   :  { %v512_v50 = vpop.f32.mrf.mxu2  ;;  %v532_v51 = vpop.f32.mrf.mxu3 }
 0x399   :  { %v513_v52 = vadd.f32 %v512_v50, %v233_v9  ;;  %v533_v54 = vadd.f32 %v532_v51, %v4174_v49 }
 0x39b   :  { %3419 = vtanh.f32 %v513_v52  ;;  %v3268_v59 = vmul.f32 -1.442695, %v513_v52  ;;  %v3269_v8 = vmul.f32 -1.442695, %v533_v54 }
 0x39c   :  { %3421 = vtanh.f32 %v533_v54 }
 0x39d   :  { %3423 = vpow2.f32 %v3268_v59 }
 0x3a1   :  { %v3420_v55 = vpop.eup %3419 }
 0x3a2   :  { %v3422_v57 = vpop.eup %3421  ;;  %577 = vrot.lane.b32.xlu2 %v3420_v55, %s3804_s3 }
 0x3a3   :  { %608 = vrot.lane.b32.xlu0 %v3422_v57, %s3804_s3  ;;  %v3424_v60 = vpop.eup %3423 }
 0x3a4   :  { %v541_v62 = vadd.f32 1.0, %v3424_v60 }
 0x3a6   :  { %3425 = vrcp.f32 %v541_v62  ;;  %v554_v17 = vand.u32 2147483648, %v541_v62  ;;  %vm548_vm10 = vweird.f32 %v541_v62  ;;  %v552_v24 = vand.u32 2147483647, %v541_v62 }
 0x3a7   :  { %3427 = vpow2.f32 %v3269_v8 }
 0x3a8   :  { %v555_v46 = vor.u32 1.1754944e-38, %v554_v17  ;;  %vm553_vm12 = vcmp.eq.f32.partialorder %v552_v24, 8.507059e+37 }
 0x3ac   :  { %v3426_v1 = vpop.eup %3425 }
 0x3ad   :  { %v544_v2 = vmul.f32 %v3426_v1, %v541_v62  ;;  %v3428_v49 = vpop.eup %3427  ;;  %vm549_vm9 = vweird.f32 %v3426_v1 }
 0x3ae   :  { %v542_v6 = vadd.f32 1.0, %v3428_v49  ;;  %vm550_vm11 = vmor %vm548_vm10, %vm549_vm9  ;;  %v4263_v49 = vsel %vm5516_vm8, %v4192_v61, %v4189_v58 }
 0x3af   :  { %v545_v3 = vsub.f32 1.0, %v544_v2 }
 0x3b0   :  { %3429 = vrcp.f32 %v542_v6  ;;  %v569_v59 = vand.u32 2147483648, %v542_v6  ;;  %vm563_vm14 = vweird.f32 %v542_v6  ;;  %v567_v60 = vand.u32 2147483647, %v542_v6 }
 0x3b1   :  { %v546_v4 = vmul.f32 %v3426_v1, %v545_v3 }
 0x3b2   :  { %v570_v8 = vor.u32 1.1754944e-38, %v569_v59  ;;  %vm568_vm0 = vcmp.eq.f32.partialorder %v567_v60, 8.507059e+37 }
 0x3b3   :  { %v547_v16 = vadd.f32 %v3426_v1, %v546_v4  ;;  %v593_v4 = vsel %vm592_vm1, 1, %v3801_v0  ;;  %vm746_vm1 = vcmp.gt.s32.totalorder %v4182_v56, 2 }
 0x3b5   :  { %v551_v42 = vsel %vm550_vm11, %v3426_v1, %v547_v16 }
 0x3b6   :  { %v556_v9 = vsel %vm553_vm12, %v555_v46, %v551_v42  ;;  %v3430_v51 = vpop.eup %3429 }
 0x3b7   :  { %v559_v52 = vmul.f32 %v3430_v51, %v542_v6  ;;  %vm564_vm13 = vweird.f32 %v3430_v51  ;;  %v4269_v6 = vsel %vm5517_vm7, %v4200_v21, %v4195_v63  ;;  %v575_v16 = vmul.f32 %v556_v9, %v4263_v49 }
 0x3b8   :  { %vm565_vm15 = vmor %vm563_vm14, %vm564_vm13  ;;  %v624_v63 = vsel %vm623_vm2, 1, %v3801_v0  ;;  %vm777_vm2 = vcmp.gt.s32.totalorder %v4182_v56, 5 }
 0x3b9   :  { %v560_v54 = vsub.f32 1.0, %v559_v52 }
 0x3bb   :  { %v561_v55 = vmul.f32 %v3430_v51, %v560_v54 }
 0x3bd   :  { %v562_v57 = vadd.f32 %v3430_v51, %v561_v55 }
 0x3bf   :  { %v566_v62 = vsel %vm565_vm15, %v3430_v51, %v562_v57 }
 0x3c0   :  { %v571_v2 = vsel %vm568_vm0, %v570_v8, %v566_v62 }
 0x3c1   :  { %v606_v17 = vmul.f32 %v571_v2, %v4269_v6 }
 0x3fc   :  { %v578_v47 = vpop.permute.xlu2 %577 }
 0x3fd   :  { %v580_v50 = vmul.f32 %v578_v47, %v556_v9 }
 0x3ff   :  { %582 = vrot.lane.b32.xlu1 %v580_v50, %s3802_s29 }
 0x415   :  { %v609_v1 = vpop.permute.xlu0 %608 }
 0x416   :  { %v611_v3 = vmul.f32 %v609_v1, %v571_v2 }
 0x418   :  { %613 = vrot.lane.b32.xlu2 %v611_v3, %s3802_s29 }
 0x420   :  { %595 = vperm.xlu2 %3401, %v593_v4  }
 0x471   :  { %v583_v24 = vpop.permute.xlu1 %582 }
 0x472   :  { %v614_v42 = vpop.permute.xlu2 %613  ;;  %v4273_v46 = vadd.f32 %v583_v24, %v575_v16 }
 0x473   :  { %v4275_v47 = vadd.f32 %v614_v42, %v606_v17 }
 0x474   :  { %3431 = vtanh.f32 %v4273_v46 }
 0x475   :  { %3433 = vtanh.f32 %v4275_v47 }
 0x47a   :  { %v3432_v58 = vpop.eup %3431  ;;  %v4283_v21 = vpop.permute.xlu2 %595 }
 0x47b   :  { %v3434_v61 = vpop.eup %3433  ;;  %588 = vrot.lane.b32.xlu0 %v3432_v58, %s3804_s3  ;;  %vm597_vm4 = vcmp.eq.s32.totalorder %v4283_v21, 1 }
 0x47c   :  { %619 = vrot.lane.b32.xlu1 %v3434_v61, %s3804_s3 }
 0x483   :  { %626 = vperm.xlu0 %3399, %v624_v63  }
 0x4ed   :  { %v589_v50 = vpop.permute.xlu0 %588 }
 0x4ee   :  { %v4285_v51 = vmul.f32 %v589_v50, %v556_v9  ;;  %v620_v54 = vpop.permute.xlu1 %619 }
 0x4ef   :  { %v4296_v55 = vmul.f32 %v620_v54, %v571_v2 }
 0x4f0   :  { %v4292_v52 = vsel %vm597_vm4, %v4285_v51, %v4227_v26 }
 0x4f1   :  { %638 = vrot.lane.b32.xlu1 %v4292_v52, %s3802_s29 }
 0x4f5   :  { %v4298_v57 = vpop.permute.xlu0 %626 }
 0x4f6   :  { %vm628_vm6 = vcmp.eq.s32.totalorder %v4298_v57, 1 }
 0x4f7   :  { %v4305_v9 = vsel %vm628_vm6, %v4296_v55, %v4217_v22  ;;  %v236_v22 = vadd.f32 %v4144_v12, %v4142_v11 }
 0x4f8   :  { %642 = vrot.lane.b32.xlu2 %v4305_v9, %s3804_s3 }
 0x552   :  { %v643_v26 = vpop.permute.xlu2 %642 }
 0x563   :  { %v639_v59 = vpop.permute.xlu1 %638 }
 0x564   :  { %v645_v60 = vsel %vm320_vm3, %v639_v59, %v643_v26 }
 0x565   :  { %3270 = vmatmul.msk.f32.vlgmr.msra.gmra.mxu2 %vm322_vm5, %v645_v60  ;;  %3271 = vmatmul.msk.f32.vlgmr.msra.gmra.mxu3 %vm322_vm5, %v645_v60 }
 0x566   :  { %965 = vmatpush.msra.mxu2 %v3971_v28  ;;  %985 = vmatpush.msra.mxu3 %v3992_v34 }
 0x568   :  { %966 = vmatpush.msra.mxu2 %v3974_v29  ;;  %986 = vmatpush.msra.mxu3 %v4005_v37 }
 0x56a   :  { %967 = vmatpush.msra.mxu2 %v3977_v30  ;;  %987 = vmatpush.msra.mxu3 %v4009_v38 }
 0x56c   :  { %968 = vmatpush.msra.mxu2 %v3983_v31  ;;  %988 = vmatpush.msra.mxu3 %v4014_v39 }
 0x56e   :  { %969 = vmatpush.msra.mxu2 %v3987_v32  ;;  %989 = vmatpush.msra.mxu3 %v4017_v40 }
 0x570   :  { %970 = vmatpush.msra.mxu2 %v3990_v33  ;;  %990 = vmatpush.msra.mxu3 %v4022_v41 }
 0x572   :  { %971 = vmatpush.msra.mxu2 %v3995_v35  ;;  %991 = vmatpush.msra.mxu3 %v4030_v43 }
 0x574   :  { %972 = vmatpush.msra.mxu2 %v4003_v36  ;;  %992 = vmatpush.msra.mxu3 %v4035_v44 }
 0x5e8   :  { %v666_v62 = vpop.f32.mrf.mxu2  ;;  %v686_v8 = vpop.f32.mrf.mxu3 }
 0x5e9   :  { %v667_v1 = vadd.f32 %v666_v62, %v236_v22  ;;  %v687_v2 = vadd.f32 %v686_v8, %v4168_v45 }
 0x5eb   :  { %3435 = vtanh.f32 %v667_v1  ;;  %v3272_v16 = vmul.f32 -1.442695, %v667_v1  ;;  %v3273_v17 = vmul.f32 -1.442695, %v687_v2 }
 0x5ec   :  { %3437 = vtanh.f32 %v687_v2 }
 0x5ed   :  { %3439 = vpow2.f32 %v3272_v16 }
 0x5ee   :  { %3441 = vpow2.f32 %v3273_v17 }
 0x5f1   :  { %v3436_v3 = vpop.eup %3435 }
 0x5f2   :  { %v3438_v4 = vpop.eup %3437  ;;  %731 = vrot.lane.b32.xlu0 %v3436_v3, %s3804_s3 }
 0x5f3   :  { %762 = vrot.lane.b32.xlu1 %v3438_v4, %s3804_s3  ;;  %v3440_v24 = vpop.eup %3439 }
 0x5f4   :  { %v3442_v42 = vpop.eup %3441  ;;  %v695_v12 = vadd.f32 1.0, %v3440_v24 }
 0x5f5   :  { %v696_v58 = vadd.f32 1.0, %v3442_v42 }
 0x5f6   :  { %3443 = vrcp.f32 %v695_v12  ;;  %v708_v8 = vand.u32 2147483648, %v695_v12  ;;  %vm702_vm11 = vweird.f32 %v695_v12  ;;  %v706_v2 = vand.u32 2147483647, %v695_v12 }
 0x5f7   :  { %3445 = vrcp.f32 %v696_v58  ;;  %v723_v1 = vand.u32 2147483648, %v696_v58  ;;  %vm717_vm12 = vweird.f32 %v696_v58  ;;  %v721_v3 = vand.u32 2147483647, %v696_v58 }
 0x5f8   :  { %v709_v17 = vor.u32 1.1754944e-38, %v708_v8  ;;  %vm707_vm15 = vcmp.eq.f32.partialorder %v706_v2, 8.507059e+37 }
 0x5f9   :  { %v724_v24 = vor.u32 1.1754944e-38, %v723_v1  ;;  %vm722_vm0 = vcmp.eq.f32.partialorder %v721_v3, 8.507059e+37 }
 0x5fc   :  { %v3444_v61 = vpop.eup %3443 }
 0x5fd   :  { %v3446_v45 = vpop.eup %3445  ;;  %v698_v63 = vmul.f32 %v3444_v61, %v695_v12  ;;  %vm703_vm9 = vweird.f32 %v3444_v61  ;;  %v747_v12 = vsel %vm746_vm1, 1, %v3801_v0 }
 0x5fe   :  { %v713_v50 = vmul.f32 %v3446_v45, %v696_v58  ;;  %vm718_vm10 = vweird.f32 %v3446_v45  ;;  %vm704_vm13 = vmor %vm702_vm11, %vm703_vm9  ;;  %v4341_v58 = vsel %vm597_vm4, %v4273_v46, %v4263_v49  ;;  %v4354_v49 = vsel %vm628_vm6, %v4275_v47, %v4269_v6 }
 0x5ff   :  { %v699_v54 = vsub.f32 1.0, %v698_v63  ;;  %vm719_vm14 = vmor %vm717_vm12, %vm718_vm10 }
 0x600   :  { %v714_v26 = vsub.f32 1.0, %v713_v50 }
 0x601   :  { %v700_v59 = vmul.f32 %v3444_v61, %v699_v54 }
 0x602   :  { %v715_v60 = vmul.f32 %v3446_v45, %v714_v26 }
 0x603   :  { %v701_v22 = vadd.f32 %v3444_v61, %v700_v59 }
 0x604   :  { %v716_v62 = vadd.f32 %v3446_v45, %v715_v60 }
 0x605   :  { %v705_v4 = vsel %vm704_vm13, %v3444_v61, %v701_v22 }
 0x606   :  { %v720_v16 = vsel %vm719_vm14, %v3446_v45, %v716_v62  ;;  %v710_v63 = vsel %vm707_vm15, %v709_v17, %v705_v4  ;;  %v778_v62 = vsel %vm777_vm2, 1, %v3801_v0  ;;  %vm900_vm15 = vcmp.gt.s32.totalorder %v4182_v56, 3 }
 0x607   :  { %v725_v54 = vsel %vm722_vm0, %v724_v24, %v720_v16  ;;  %v729_v61 = vmul.f32 %v710_v63, %v4341_v58 }
 0x608   :  { %v760_v46 = vmul.f32 %v725_v54, %v4354_v49 }
 0x664   :  { %v732_v42 = vpop.permute.xlu0 %731 }
 0x665   :  { %v763_v50 = vpop.permute.xlu1 %762  ;;  %v734_v26 = vmul.f32 %v732_v42, %v710_v63 }
 0x666   :  { %v765_v59 = vmul.f32 %v763_v50, %v725_v54 }
 0x667   :  { %736 = vrot.lane.b32.xlu2 %v734_v26, %s3802_s29 }
 0x668   :  { %767 = vrot.lane.b32.xlu0 %v765_v59, %s3802_s29 }
 0x670   :  { %749 = vperm.xlu0 %3399, %v747_v12  }
 0x6c1   :  { %v737_v45 = vpop.permute.xlu2 %736 }
 0x6c2   :  { %v4344_v60 = vadd.f32 %v737_v45, %v729_v61 }
 0x6c4   :  { %3447 = vtanh.f32 %v4344_v60 }
 0x6ca   :  { %v3448_v22 = vpop.eup %3447 }
 0x6cb   :  { %742 = vrot.lane.b32.xlu1 %v3448_v22, %s3804_s3 }
 0x6d3   :  { %780 = vperm.xlu1 %3400, %v778_v62  }
 0x6da   :  { %v768_v8 = vpop.permute.xlu0 %767 }
 0x6db   :  { %v4357_v1 = vadd.f32 %v768_v8, %v760_v46  ;;  %v901_v46 = vsel %vm900_vm15, 1, %v3801_v0 }
 0x6dd   :  { %3449 = vtanh.f32 %v4357_v1 }
 0x6e2   :  { %v4361_v3 = vpop.permute.xlu0 %749 }
 0x6e3   :  { %v3450_v2 = vpop.eup %3449  ;;  %vm751_vm9 = vcmp.eq.s32.totalorder %v4361_v3, 1 }
 0x6e4   :  { %773 = vrot.lane.b32.xlu2 %v3450_v2, %s3804_s3 }
 0x73d   :  { %v743_v4 = vpop.permute.xlu1 %742 }
 0x73e   :  { %v4363_v16 = vmul.f32 %v743_v4, %v710_v63  ;;  %v774_v47 = vpop.permute.xlu2 %773 }
 0x73f   :  { %v4374_v17 = vmul.f32 %v774_v47, %v725_v54 }
 0x740   :  { %v4370_v6 = vsel %vm751_vm9, %v4363_v16, %v4292_v52 }
 0x741   :  { %792 = vrot.lane.b32.xlu2 %v4370_v6, %s3802_s29 }
 0x745   :  { %v4376_v24 = vpop.permute.xlu1 %780 }
 0x746   :  { %vm782_vm10 = vcmp.eq.s32.totalorder %v4376_v24, 1 }
 0x747   :  { %v4383_v42 = vsel %vm782_vm10, %v4374_v17, %v4305_v9 }
 0x748   :  { %796 = vrot.lane.b32.xlu0 %v4383_v42, %s3804_s3 }
 0x79b   :  { %v793_v52 = vpop.permute.xlu2 %792 }
 0x7ba   :  { %v797_v63 = vpop.permute.xlu0 %796 }
 0x7bb   :  { %v799_v50 = vsel %vm320_vm3, %v793_v52, %v797_v63 }
 0x7bc   :  { %3274 = vmatmul.msk.f32.vlgmr.msrb.gmra.mxu2 %vm322_vm5, %v799_v50  ;;  %3275 = vmatmul.msk.f32.vlgmr.msrb.gmra.mxu3 %vm322_vm5, %v799_v50 }
 0x7bd   :  { %1249 = vmatpush.msrb.mxu2 %v3971_v28  ;;  %1269 = vmatpush.msrb.mxu3 %v3992_v34  ;;  %v239_v28 = vadd.f32 %v4150_v18, %v4142_v11 }
 0x7bf   :  { %1250 = vmatpush.msrb.mxu2 %v3974_v29  ;;  %1270 = vmatpush.msrb.mxu3 %v4005_v37 }
 0x7c1   :  { %1251 = vmatpush.msrb.mxu2 %v3977_v30  ;;  %1271 = vmatpush.msrb.mxu3 %v4009_v38 }
 0x7c3   :  { %1252 = vmatpush.msrb.mxu2 %v3983_v31  ;;  %1272 = vmatpush.msrb.mxu3 %v4014_v39 }
 0x7c5   :  { %1253 = vmatpush.msrb.mxu2 %v3987_v32  ;;  %1273 = vmatpush.msrb.mxu3 %v4017_v40 }
 0x7c7   :  { %1254 = vmatpush.msrb.mxu2 %v3990_v33  ;;  %1274 = vmatpush.msrb.mxu3 %v4022_v41 }
 0x7c9   :  { %1255 = vmatpush.msrb.mxu2 %v3995_v35  ;;  %1275 = vmatpush.msrb.mxu3 %v4030_v43 }
 0x7cb   :  { %1256 = vmatpush.msrb.mxu2 %v4003_v36  ;;  %1276 = vmatpush.msrb.mxu3 %v4035_v44 }
 0x83f   :  { %v820_v29 = vpop.f32.mrf.mxu2  ;;  %v840_v30 = vpop.f32.mrf.mxu3 }
 0x840   :  { %v821_v31 = vadd.f32 %v820_v29, %v239_v28  ;;  %v841_v32 = vadd.f32 %v840_v30, %v4159_v25 }
 0x842   :  { %3451 = vtanh.f32 %v821_v31  ;;  %v3277_v35 = vmul.f32 -1.442695, %v841_v32  ;;  %v3276_v39 = vmul.f32 -1.442695, %v821_v31  ;;  %v4419_v31 = vsel %vm782_vm10, %v4357_v1, %v4354_v49 }
 0x843   :  { %3453 = vtanh.f32 %v841_v32 }
 0x844   :  { %3455 = vpow2.f32 %v3277_v35 }
 0x848   :  { %v3452_v33 = vpop.eup %3451 }
 0x849   :  { %v3454_v34 = vpop.eup %3453  ;;  %885 = vrot.lane.b32.xlu1 %v3452_v33, %s3804_s3 }
 0x84a   :  { %916 = vrot.lane.b32.xlu2 %v3454_v34, %s3804_s3  ;;  %v3456_v36 = vpop.eup %3455 }
 0x84b   :  { %v850_v37 = vadd.f32 1.0, %v3456_v36  ;;  %v4430_v36 = vsel %vm751_vm9, %v4344_v60, %v4341_v58 }
 0x84d   :  { %3457 = vrcp.f32 %v850_v37  ;;  %v877_v9 = vand.u32 2147483648, %v850_v37  ;;  %vm871_vm12 = vweird.f32 %v850_v37  ;;  %v875_v54 = vand.u32 2147483647, %v850_v37 }
 0x84e   :  { %3459 = vpow2.f32 %v3276_v39 }
 0x84f   :  { %v878_v59 = vor.u32 1.1754944e-38, %v877_v9  ;;  %vm876_vm14 = vcmp.eq.f32.partialorder %v875_v54, 8.507059e+37  ;;  %v242_v9 = vadd.f32 %v4156_v23, %v4142_v11 }
 0x853   :  { %v3458_v38 = vpop.eup %3457 }
 0x854   :  { %v867_v40 = vmul.f32 %v3458_v38, %v850_v37  ;;  %v3460_v43 = vpop.eup %3459  ;;  %vm872_vm11 = vweird.f32 %v3458_v38 }
 0x855   :  { %v849_v18 = vadd.f32 1.0, %v3460_v43  ;;  %vm873_vm13 = vmor %vm871_vm12, %vm872_vm11  ;;  %vm931_vm12 = vcmp.gt.s32.totalorder %v4182_v56, 4 }
 0x856   :  { %v868_v41 = vsub.f32 1.0, %v867_v40  ;;  %v932_v39 = vsel %vm931_vm12, 1, %v3801_v0 }
 0x857   :  { %3461 = vrcp.f32 %v849_v18  ;;  %v862_v47 = vand.u32 2147483648, %v849_v18  ;;  %vm856_vm1 = vweird.f32 %v849_v18  ;;  %v860_v52 = vand.u32 2147483647, %v849_v18 }
 0x858   :  { %v869_v44 = vmul.f32 %v3458_v38, %v868_v41 }
 0x859   :  { %v863_v50 = vor.u32 1.1754944e-38, %v862_v47  ;;  %vm861_vm11 = vcmp.eq.f32.partialorder %v860_v52, 8.507059e+37 }
 0x85a   :  { %v870_v25 = vadd.f32 %v3458_v38, %v869_v44 }
 0x85c   :  { %v874_v26 = vsel %vm873_vm13, %v3458_v38, %v870_v25 }
 0x85d   :  { %v879_v61 = vsel %vm876_vm14, %v878_v59, %v874_v26  ;;  %v3462_v45 = vpop.eup %3461 }
 0x85e   :  { %v852_v62 = vmul.f32 %v3462_v45, %v849_v18  ;;  %vm857_vm0 = vweird.f32 %v3462_v45  ;;  %v914_v32 = vmul.f32 %v879_v61, %v4419_v31 }
 0x85f   :  { %vm858_vm2 = vmor %vm856_vm1, %vm857_vm0 }
 0x860   :  { %v853_v8 = vsub.f32 1.0, %v852_v62 }
 0x862   :  { %v854_v2 = vmul.f32 %v3462_v45, %v853_v8 }
 0x864   :  { %v855_v4 = vadd.f32 %v3462_v45, %v854_v2 }
 0x866   :  { %v859_v63 = vsel %vm858_vm2, %v3462_v45, %v855_v4 }
 0x867   :  { %v864_v29 = vsel %vm861_vm11, %v863_v50, %v859_v63 }
 0x868   :  { %v883_v37 = vmul.f32 %v864_v29, %v4430_v36 }
 0x8a4   :  { %v917_v12 = vpop.permute.xlu2 %916 }
 0x8a5   :  { %v919_v22 = vmul.f32 %v917_v12, %v879_v61 }
 0x8a7   :  { %921 = vrot.lane.b32.xlu1 %v919_v22, %s3802_s29 }
 0x8af   :  { %903 = vperm.xlu1 %3400, %v901_v46  }
 0x8bb   :  { %v886_v28 = vpop.permute.xlu1 %885 }
 0x8bc   :  { %v888_v30 = vmul.f32 %v886_v28, %v864_v29 }
 0x8be   :  { %890 = vrot.lane.b32.xlu0 %v888_v30, %s3802_s29 }
 0x919   :  { %v922_v33 = vpop.permute.xlu1 %921 }
 0x91a   :  { %v4422_v34 = vadd.f32 %v922_v33, %v914_v32 }
 0x91c   :  { %3463 = vtanh.f32 %v4422_v34 }
 0x921   :  { %v4439_v40 = vpop.permute.xlu1 %903 }
 0x922   :  { %v3464_v35 = vpop.eup %3463  ;;  %vm905_vm13 = vcmp.eq.s32.totalorder %v4439_v40, 1  ;;  %v2962_v40 = vld [vmem:[#allocation9 + $0x20] sm:$0xff] }
 0x923   :  { %927 = vrot.lane.b32.xlu0 %v3464_v35, %s3804_s3 }
 0x930   :  { %v891_v49 = vpop.permute.xlu0 %890 }
 0x931   :  { %v4433_v1 = vadd.f32 %v891_v49, %v883_v37 }
 0x933   :  { %3465 = vtanh.f32 %v4433_v1 }
 0x939   :  { %v3466_v38 = vpop.eup %3465 }
 0x93a   :  { %896 = vrot.lane.b32.xlu2 %v3466_v38, %s3804_s3 }
 0x942   :  { %934 = vperm.xlu2 %3401, %v932_v39  }
 0x994   :  { %v897_v41 = vpop.permute.xlu2 %896 }
 0x995   :  { %v4441_v58 = vmul.f32 %v897_v41, %v864_v29  ;;  %v928_v56 = vpop.permute.xlu0 %927 }
 0x996   :  { %v4452_v43 = vmul.f32 %v928_v56, %v879_v61 }
 0x997   :  { %v4448_v60 = vsel %vm905_vm13, %v4441_v58, %v4370_v6 }
 0x998   :  { %946 = vrot.lane.b32.xlu0 %v4448_v60, %s3802_s29 }
 0x99c   :  { %v4454_v0 = vpop.permute.xlu2 %934 }
 0x99d   :  { %vm936_vm14 = vcmp.eq.s32.totalorder %v4454_v0, 1 }
 0x99e   :  { %v4461_v44 = vsel %vm936_vm14, %v4452_v43, %v4383_v42 }
 0x99f   :  { %950 = vrot.lane.b32.xlu1 %v4461_v44, %s3804_s3 }
 0xa0a   :  { %v947_v6 = vpop.permute.xlu0 %946 }
 0xa11   :  { %v951_v18 = vpop.permute.xlu1 %950 }
 0xa12   :  { %v953_v25 = vsel %vm320_vm3, %v947_v6, %v951_v18 }
 0xa13   :  { %3278 = vmatmul.msk.f32.vlgmr.msra.gmra.mxu2 %vm322_vm5, %v953_v25  ;;  %3279 = vmatmul.msk.f32.vlgmr.msra.gmra.mxu3 %vm322_vm5, %v953_v25 }
 0xa96   :  { %v974_v54 = vpop.f32.mrf.mxu2  ;;  %v994_v26 = vpop.f32.mrf.mxu3 }
 0xa97   :  { %v975_v59 = vadd.f32 %v974_v54, %v242_v9  ;;  %v995_v42 = vadd.f32 %v994_v26, %v4153_v20  ;;  %v4479_v26 = vsel %vm905_vm13, %v4433_v1, %v4430_v36 }
 0xa99   :  { %3467 = vtanh.f32 %v975_v59  ;;  %v3280_v45 = vmul.f32 -1.442695, %v975_v59  ;;  %v3281_v23 = vmul.f32 -1.442695, %v995_v42  ;;  %v4485_v59 = vsel %vm936_vm14, %v4422_v34, %v4419_v31 }
 0xa9a   :  { %3469 = vtanh.f32 %v995_v42 }
 0xa9b   :  { %3471 = vpow2.f32 %v3280_v45 }
 0xa9f   :  { %v3468_v12 = vpop.eup %3467 }
 0xaa0   :  { %v3470_v61 = vpop.eup %3469  ;;  %1039 = vrot.lane.b32.xlu2 %v3468_v12, %s3804_s3 }
 0xaa1   :  { %1064 = vrot.lane.b32.xlu0 %v3470_v61, %s3804_s3  ;;  %v3472_v22 = vpop.eup %3471 }
 0xaa2   :  { %v1003_v62 = vadd.f32 1.0, %v3472_v22 }
 0xaa4   :  { %3473 = vrcp.f32 %v1003_v62  ;;  %v1016_v63 = vand.u32 2147483648, %v1003_v62  ;;  %vm1010_vm0 = vweird.f32 %v1003_v62  ;;  %v1014_v50 = vand.u32 2147483647, %v1003_v62 }
 0xaa5   :  { %3475 = vpow2.f32 %v3281_v23 }
 0xaa6   :  { %v1017_v29 = vor.u32 1.1754944e-38, %v1016_v63  ;;  %vm1015_vm2 = vcmp.eq.f32.partialorder %v1014_v50, 8.507059e+37 }
 0xaaa   :  { %v3474_v46 = vpop.eup %3473 }
 0xaab   :  { %v1006_v8 = vmul.f32 %v3474_v46, %v1003_v62  ;;  %v3476_v20 = vpop.eup %3475  ;;  %vm1011_vm15 = vweird.f32 %v3474_v46 }
 0xaac   :  { %v1004_v47 = vadd.f32 1.0, %v3476_v20  ;;  %vm1012_vm1 = vmor %vm1010_vm0, %vm1011_vm15 }
 0xaad   :  { %v1007_v2 = vsub.f32 1.0, %v1006_v8 }
 0xaae   :  { %3477 = vrcp.f32 %v1004_v47  ;;  %v1031_v41 = vand.u32 2147483648, %v1004_v47  ;;  %vm1025_vm12 = vweird.f32 %v1004_v47  ;;  %v1029_v56 = vand.u32 2147483647, %v1004_v47 }
 0xaaf   :  { %v1008_v4 = vmul.f32 %v3474_v46, %v1007_v2 }
 0xab0   :  { %v1032_v18 = vor.u32 1.1754944e-38, %v1031_v41  ;;  %vm1030_vm15 = vcmp.eq.f32.partialorder %v1029_v56, 8.507059e+37 }
 0xab1   :  { %v1009_v52 = vadd.f32 %v3474_v46, %v1008_v4 }
 0xab3   :  { %v1013_v28 = vsel %vm1012_vm1, %v3474_v46, %v1009_v52 }
 0xab4   :  { %v1018_v32 = vsel %vm1015_vm2, %v1017_v29, %v1013_v28  ;;  %v3478_v35 = vpop.eup %3477 }
 0xab5   :  { %v1021_v37 = vmul.f32 %v3478_v35, %v1004_v47  ;;  %vm1026_vm11 = vweird.f32 %v3478_v35  ;;  %v1037_v42 = vmul.f32 %v1018_v32, %v4479_v26 }
 0xab6   :  { %vm1027_vm8 = vmor %vm1025_vm12, %vm1026_vm11 }
 0xab7   :  { %v1022_v49 = vsub.f32 1.0, %v1021_v37 }
 0xab9   :  { %v1023_v38 = vmul.f32 %v3478_v35, %v1022_v49 }
 0xabb   :  { %v1024_v39 = vadd.f32 %v3478_v35, %v1023_v38 }
 0xabd   :  { %v1028_v6 = vsel %vm1027_vm8, %v3478_v35, %v1024_v39 }
 0xabe   :  { %v1033_v9 = vsel %vm1030_vm15, %v1032_v18, %v1028_v6 }
 0xabf   :  { %v1062_v12 = vmul.f32 %v1033_v9, %v4485_v59 }
 0xafa   :  { %v1040_v30 = vpop.permute.xlu2 %1039 }
 0xafb   :  { %v1042_v33 = vmul.f32 %v1040_v30, %v1018_v32 }
 0xafd   :  { %1044 = vrot.lane.b32.xlu1 %v1042_v33, %s3802_s29 }
 0xb13   :  { %v1065_v25 = vpop.permute.xlu0 %1064 }
 0xb14   :  { %v1067_v54 = vmul.f32 %v1065_v25, %v1033_v9 }
 0xb16   :  { %1069 = vrot.lane.b32.xlu2 %v1067_v54, %s3802_s29 }
 0xb6f   :  { %v1045_v61 = vpop.permute.xlu1 %1044 }
 0xb70   :  { %v1070_v45 = vpop.permute.xlu2 %1069  ;;  %v4489_v22 = vadd.f32 %v1045_v61, %v1037_v42 }
 0xb71   :  { %v4491_v62 = vadd.f32 %v1070_v45, %v1062_v12 }
 0xb72   :  { %3479 = vtanh.f32 %v4489_v22 }
 0xb73   :  { %3481 = vtanh.f32 %v4491_v62 }
 0xb78   :  { %v3480_v36 = vpop.eup %3479 }
 0xb79   :  { %v3482_v1 = vpop.eup %3481  ;;  %1050 = vrot.lane.b32.xlu0 %v3480_v36, %s3804_s3 }
 0xb7a   :  { %1075 = vrot.lane.b32.xlu1 %v3482_v1, %s3804_s3 }
 0xbeb   :  { %v1051_v31 = vpop.permute.xlu0 %1050 }
 0xbec   :  { %v1076_v34 = vpop.permute.xlu1 %1075  ;;  %v4497_v46 = vmul.f32 %v1051_v31, %v1018_v32 }
 0xbed   :  { %v4499_v23 = vmul.f32 %v1076_v34, %v1033_v9 }
 0xbee   :  { %v4505_v8 = vsel %vm936_vm14, %v4497_v46, %v4448_v60  ;;  %v4520_v60 = vpop.f32.mrf.mxu0 }
 0xbef   :  { %v4511_v2 = vsel %vm905_vm13, %v4499_v23, %v4461_v44  ;;  %1088 = vrot.lane.b32.xlu2 %v4505_v8, %s3802_s29  ;;  %v245_v44 = vadd.f32 %v4165_v27, %v4142_v11 }
 0xbf0   :  { %1092 = vrot.lane.b32.xlu0 %v4511_v2, %s3804_s3 }
 0xc49   :  { %v1089_v4 = vpop.permute.xlu2 %1088 }
 0xc62   :  { %v1093_v20 = vpop.permute.xlu0 %1092 }
 0xc63   :  { %v1095_v47 = vsel %vm320_vm3, %v1089_v4, %v1093_v20 }
 0xc64   :  { %3282 = vmatmul.msk.f32.vlgmr.msrb.gmra.mxu0 %vm322_vm5, %v1095_v47  ;;  %3283 = vmatmul.msk.f32.vlgmr.msrb.gmra.mxu1 %vm322_vm5, %v1095_v47 }
 0xce1   :  { %v1116_v52 = vpop.f32.mrf.mxu0  ;;  %v1136_v63 = vpop.f32.mrf.mxu1 }
 0xce2   :  { %v1117_v50 = vadd.f32 %v1116_v52, %v245_v44  ;;  %v1137_v28 = vadd.f32 %v1136_v63, %v4147_v14 }
 0xce4   :  { %3483 = vtanh.f32 %v1117_v50  ;;  %v3285_v32 = vmul.f32 -1.442695, %v1137_v28  ;;  %v3284_v27 = vmul.f32 -1.442695, %v1117_v50  ;;  %v4533_v50 = vsel %vm905_vm13, %v4491_v62, %v4485_v59 }
 0xce5   :  { %3485 = vtanh.f32 %v1137_v28 }
 0xce6   :  { %3487 = vpow2.f32 %v3285_v32 }
 0xcea   :  { %v3484_v29 = vpop.eup %3483 }
 0xceb   :  { %v3486_v30 = vpop.eup %3485  ;;  %1181 = vrot.lane.b32.xlu1 %v3484_v29, %s3804_s3 }
 0xcec   :  { %1206 = vrot.lane.b32.xlu2 %v3486_v30, %s3804_s3  ;;  %v3488_v33 = vpop.eup %3487 }
 0xced   :  { %v1146_v35 = vadd.f32 1.0, %v3488_v33  ;;  %v4544_v33 = vsel %vm936_vm14, %v4489_v22, %v4479_v26 }
 0xcef   :  { %3489 = vrcp.f32 %v1146_v35  ;;  %v1173_v6 = vand.u32 2147483648, %v1146_v35  ;;  %vm1167_vm0 = vweird.f32 %v1146_v35  ;;  %v1171_v18 = vand.u32 2147483647, %v1146_v35 }
 0xcf0   :  { %3491 = vpow2.f32 %v3284_v27 }
 0xcf1   :  { %v1174_v9 = vor.u32 1.1754944e-38, %v1173_v6  ;;  %vm1172_vm2 = vcmp.eq.f32.partialorder %v1171_v18, 8.507059e+37 }
 0xcf5   :  { %v3490_v37 = vpop.eup %3489 }
 0xcf6   :  { %v1163_v49 = vmul.f32 %v3490_v37, %v1146_v35  ;;  %v3492_v39 = vpop.eup %3491  ;;  %vm1168_vm8 = vweird.f32 %v3490_v37 }
 0xcf7   :  { %v1145_v41 = vadd.f32 1.0, %v3492_v39  ;;  %vm1169_vm1 = vmor %vm1167_vm0, %vm1168_vm8 }
 0xcf8   :  { %v1164_v38 = vsub.f32 1.0, %v1163_v49 }
 0xcf9   :  { %3493 = vrcp.f32 %v1145_v41  ;;  %v1158_v34 = vand.u32 2147483648, %v1145_v41  ;;  %vm1152_vm12 = vweird.f32 %v1145_v41  ;;  %v1156_v4 = vand.u32 2147483647, %v1145_v41 }
 0xcfa   :  { %v1165_v14 = vmul.f32 %v3490_v37, %v1164_v38 }
 0xcfb   :  { %v1159_v47 = vor.u32 1.1754944e-38, %v1158_v34  ;;  %vm1157_vm8 = vcmp.eq.f32.partialorder %v1156_v4, 8.507059e+37 }
 0xcfc   :  { %v1166_v56 = vadd.f32 %v3490_v37, %v1165_v14 }
 0xcfe   :  { %v1170_v25 = vsel %vm1169_vm1, %v3490_v37, %v1166_v56 }
 0xcff   :  { %v1175_v42 = vsel %vm1172_vm2, %v1174_v9, %v1170_v25  ;;  %v3494_v12 = vpop.eup %3493 }
 0xd00   :  { %v1148_v45 = vmul.f32 %v3494_v12, %v1145_v41  ;;  %vm1153_vm11 = vweird.f32 %v3494_v12  ;;  %v1204_v28 = vmul.f32 %v1175_v42, %v4533_v50 }
 0xd01   :  { %vm1154_vm15 = vmor %vm1152_vm12, %vm1153_vm11 }
 0xd02   :  { %v1149_v36 = vsub.f32 1.0, %v1148_v45 }
 0xd04   :  { %v1150_v1 = vmul.f32 %v3494_v12, %v1149_v36 }
 0xd06   :  { %v1151_v31 = vadd.f32 %v3494_v12, %v1150_v1 }
 0xd08   :  { %v1155_v20 = vsel %vm1154_vm15, %v3494_v12, %v1151_v31 }
 0xd09   :  { %v1160_v52 = vsel %vm1157_vm8, %v1159_v47, %v1155_v20 }
 0xd0a   :  { %v1179_v35 = vmul.f32 %v1160_v52, %v4544_v33 }
 0xd46   :  { %v1207_v54 = vpop.permute.xlu2 %1206 }
 0xd47   :  { %v1209_v61 = vmul.f32 %v1207_v54, %v1175_v42 }
 0xd49   :  { %1211 = vrot.lane.b32.xlu1 %v1209_v61, %s3802_s29 }
 0xd5d   :  { %v1182_v44 = vpop.permute.xlu1 %1181 }
 0xd5e   :  { %v1184_v63 = vmul.f32 %v1182_v44, %v1160_v52 }
 0xd60   :  { %1186 = vrot.lane.b32.xlu0 %v1184_v63, %s3802_s29 }
 0xdbb   :  { %v1212_v29 = vpop.permute.xlu1 %1211 }
 0xdbc   :  { %v4536_v30 = vadd.f32 %v1212_v29, %v1204_v28 }
 0xdbe   :  { %3495 = vtanh.f32 %v4536_v30 }
 0xdc4   :  { %v3496_v32 = vpop.eup %3495 }
 0xdc5   :  { %1217 = vrot.lane.b32.xlu0 %v3496_v32, %s3804_s3 }
 0xdd2   :  { %v1187_v59 = vpop.permute.xlu0 %1186 }
 0xdd3   :  { %v4547_v62 = vadd.f32 %v1187_v59, %v1179_v35 }
 0xdd5   :  { %3497 = vtanh.f32 %v4547_v62 }
 0xddb   :  { %v3498_v37 = vpop.eup %3497 }
 0xddc   :  { %1192 = vrot.lane.b32.xlu2 %v3498_v37, %s3804_s3 }
 0xe36   :  { %v1193_v27 = vpop.permute.xlu2 %1192 }
 0xe37   :  { %v1218_v49 = vpop.permute.xlu0 %1217  ;;  %v4551_v38 = vmul.f32 %v1193_v27, %v1160_v52 }
 0xe38   :  { %v4553_v39 = vmul.f32 %v1218_v49, %v1175_v42 }
 0xe39   :  { %v4559_v26 = vsel %vm782_vm10, %v4551_v38, %v4505_v8 }
 0xe3a   :  { %v4565_v22 = vsel %vm751_vm9, %v4553_v39, %v4511_v2  ;;  %1230 = vrot.lane.b32.xlu1 %v4559_v26, %s3802_s29 }
 0xe3b   :  { %1234 = vrot.lane.b32.xlu2 %v4565_v22, %s3804_s3 }
 0xe95   :  { %v1235_v14 = vpop.permute.xlu2 %1234 }
 0xeac   :  { %v1231_v41 = vpop.permute.xlu1 %1230 }
 0xead   :  { %v1237_v56 = vsel %vm320_vm3, %v1231_v41, %v1235_v14 }
 0xeae   :  { %3286 = vmatmul.msk.f32.vlgmr.msrb.gmra.mxu2 %vm322_vm5, %v1237_v56  ;;  %3287 = vmatmul.msk.f32.vlgmr.msrb.gmra.mxu3 %vm322_vm5, %v1237_v56 }
 0xf31   :  { %v1258_v8 = vpop.f32.mrf.mxu2  ;;  %v1278_v6 = vpop.f32.mrf.mxu3 }
 0xf32   :  { %v1259_v18 = vadd.f32 %v1258_v8, %v4171_v48  ;;  %v1279_v2 = vadd.f32 %v1278_v6, %v4140_v10 }
 0xf34   :  { %3499 = vtanh.f32 %v1259_v18  ;;  %v3288_v54 = vmul.f32 -1.442695, %v1259_v18  ;;  %v3289_v42 = vmul.f32 -1.442695, %v1279_v2  ;;  %v4584_v18 = vsel %vm782_vm10, %v4547_v62, %v4544_v33 }
 0xf35   :  { %3501 = vtanh.f32 %v1279_v2 }
 0xf36   :  { %3503 = vpow2.f32 %v3288_v54 }
 0xf37   :  { %3505 = vpow2.f32 %v3289_v42  ;;  %v4595_v42 = vsel %vm751_vm9, %v4536_v30, %v4533_v50 }
 0xf3a   :  { %v3500_v25 = vpop.eup %3499 }
 0xf3b   :  { %v3502_v9 = vpop.eup %3501  ;;  %1323 = vrot.lane.b32.xlu0 %v3500_v25, %s3804_s3 }
 0xf3c   :  { %1348 = vrot.lane.b32.xlu1 %v3502_v9, %s3804_s3  ;;  %v3504_v12 = vpop.eup %3503 }
 0xf3d   :  { %v3506_v61 = vpop.eup %3505  ;;  %v1287_v45 = vadd.f32 1.0, %v3504_v12 }
 0xf3e   :  { %v1288_v36 = vadd.f32 1.0, %v3506_v61 }
 0xf3f   :  { %3507 = vrcp.f32 %v1287_v45  ;;  %v1300_v63 = vand.u32 2147483648, %v1287_v45  ;;  %vm1294_vm2 = vweird.f32 %v1287_v45  ;;  %v1298_v29 = vand.u32 2147483647, %v1287_v45 }
 0xf40   :  { %3509 = vrcp.f32 %v1288_v36  ;;  %v1315_v28 = vand.u32 2147483648, %v1288_v36  ;;  %vm1309_vm11 = vweird.f32 %v1288_v36  ;;  %v1313_v32 = vand.u32 2147483647, %v1288_v36 }
 0xf41   :  { %v1301_v37 = vor.u32 1.1754944e-38, %v1300_v63  ;;  %vm1299_vm8 = vcmp.eq.f32.partialorder %v1298_v29, 8.507059e+37 }
 0xf42   :  { %v1316_v27 = vor.u32 1.1754944e-38, %v1315_v28  ;;  %vm1314_vm7 = vcmp.eq.f32.partialorder %v1313_v32, 8.507059e+37 }
 0xf45   :  { %v3508_v48 = vpop.eup %3507 }
 0xf46   :  { %v3510_v10 = vpop.eup %3509  ;;  %v1290_v1 = vmul.f32 %v3508_v48, %v1287_v45  ;;  %vm1295_vm0 = vweird.f32 %v3508_v48 }
 0xf47   :  { %v1305_v31 = vmul.f32 %v3510_v10, %v1288_v36  ;;  %vm1310_vm1 = vweird.f32 %v3510_v10  ;;  %vm1296_vm12 = vmor %vm1294_vm2, %vm1295_vm0 }
 0xf48   :  { %v1291_v34 = vsub.f32 1.0, %v1290_v1  ;;  %vm1311_vm15 = vmor %vm1309_vm11, %vm1310_vm1 }
 0xf49   :  { %v1306_v4 = vsub.f32 1.0, %v1305_v31 }
 0xf4a   :  { %v1292_v20 = vmul.f32 %v3508_v48, %v1291_v34 }
 0xf4b   :  { %v1307_v47 = vmul.f32 %v3510_v10, %v1306_v4  ;;  %v251_v4 = vadd.f32 %v4520_v60, %v4142_v11 }
 0xf4c   :  { %v1293_v44 = vadd.f32 %v3508_v48, %v1292_v20 }
 0xf4d   :  { %v1308_v52 = vadd.f32 %v3510_v10, %v1307_v47 }
 0xf4e   :  { %v1297_v35 = vsel %vm1296_vm12, %v3508_v48, %v1293_v44 }
 0xf4f   :  { %v1312_v59 = vsel %vm1311_vm15, %v3510_v10, %v1308_v52  ;;  %v1302_v14 = vsel %vm1299_vm8, %v1301_v37, %v1297_v35 }
 0xf50   :  { %v1317_v56 = vsel %vm1314_vm7, %v1316_v27, %v1312_v59  ;;  %v1321_v2 = vmul.f32 %v1302_v14, %v4584_v18 }
 0xf51   :  { %v1346_v12 = vmul.f32 %v1317_v56, %v4595_v42 }
 0xfad   :  { %v1324_v49 = vpop.permute.xlu0 %1323 }
 0xfae   :  { %v1349_v41 = vpop.permute.xlu1 %1348  ;;  %v1326_v8 = vmul.f32 %v1324_v49, %v1302_v14 }
 0xfaf   :  { %v1351_v6 = vmul.f32 %v1349_v41, %v1317_v56 }
 0xfb0   :  { %1328 = vrot.lane.b32.xlu2 %v1326_v8, %s3802_s29 }
 0xfb1   :  { %1353 = vrot.lane.b32.xlu0 %v1351_v6, %s3802_s29 }
0x100a   :  { %v1329_v25 = vpop.permute.xlu2 %1328 }
0x100b   :  { %v4587_v9 = vadd.f32 %v1329_v25, %v1321_v2 }
0x100d   :  { %3511 = vtanh.f32 %v4587_v9 }
0x1013   :  { %v3512_v54 = vpop.eup %3511 }
0x1014   :  { %1334 = vrot.lane.b32.xlu1 %v3512_v54, %s3804_s3 }
0x1023   :  { %v1354_v33 = vpop.permute.xlu0 %1353 }
0x1024   :  { %v4598_v62 = vadd.f32 %v1354_v33, %v1346_v12 }
0x1026   :  { %3513 = vtanh.f32 %v4598_v62 }
0x102c   :  { %v3514_v61 = vpop.eup %3513 }
0x102d   :  { %1359 = vrot.lane.b32.xlu2 %v3514_v61, %s3804_s3 }
0x1086   :  { %v1335_v45 = vpop.permute.xlu1 %1334 }
0x1087   :  { %v1360_v36 = vpop.permute.xlu2 %1359  ;;  %v4602_v48 = vmul.f32 %v1335_v45, %v1302_v14 }
0x1088   :  { %v4604_v10 = vmul.f32 %v1360_v36, %v1317_v56 }
0x1089   :  { %v1338_v50 = vsel %vm628_vm6, %v4602_v48, %v4559_v26  ;;  %v271_v26 = vadd.f32 %v4130_v5, %v4135_v7 }
0x108a   :  { %v1363_v30 = vsel %vm597_vm4, %v4604_v10, %v4565_v22  ;;  %1372 = vrot.lane.b32.xlu0 %v1338_v50, %s3802_s29 }
0x108b   :  { %1376 = vrot.lane.b32.xlu1 %v1363_v30, %s3804_s3 }
0x10fc   :  { %v1373_v1 = vpop.permute.xlu0 %1372 }
0x10fd   :  { %v1377_v31 = vpop.permute.xlu1 %1376 }
0x10fe   :  { %v1379_v34 = vsel %vm320_vm3, %v1373_v1, %v1377_v31 }
0x10ff   :  { %3290 = vmatmul.msk.f32.vlgmr.msra.gmra.mxu0 %vm322_vm5, %v1379_v34  ;;  %3291 = vmatmul.msk.f32.vlgmr.msra.gmra.mxu1 %vm322_vm5, %v1379_v34 }
0x117c   :  { %v1400_v20 = vpop.f32.mrf.mxu0  ;;  %v1420_v22 = vpop.f32.mrf.mxu1 }
0x117d   :  { %v1401_v47 = vadd.f32 %v1400_v20, %v251_v4  ;;  %v1421_v44 = vadd.f32 %v1420_v22, %v271_v26  ;;  %v1223_v26 = vsel %vm751_vm9, %v4553_v39, 0.0  ;;  %v1081_v4 = vsel %vm905_vm13, %v4499_v23, 0.0 }
0x117e   :  { %v939_v20 = vsel %vm936_vm14, %v4452_v43, 0.0  ;;  %v1056_v22 = vsel %vm936_vm14, %v4497_v46, 0.0  ;;  %v1364_v23 = vsel %vm597_vm4, %v4598_v62, %v4595_v42  ;;  %v1540_v46 = vld [vmem:[#allocation6 + $0x78] sm:$0xff]  ;;  %v1533_v42 = vld [vmem:[#allocation6 + $0x40] sm:$0xff]  ;;  %v1534_v62 = vld [vmem:[#allocation6 + $0x48] sm:$0xff] }
0x117f   :  { %3515 = vtanh.f32 %v1401_v47  ;;  %v3293_v28 = vmul.f32 -1.442695, %v1421_v44  ;;  %v3292_v7 = vmul.f32 -1.442695, %v1401_v47  ;;  %3382 = vmatpush.msra.mxu3 %v1540_v46  ;;  %1618 = vmatpush.msrb.mxu1 %v1540_v46 }
0x1180   :  { %3517 = vtanh.f32 %v1421_v44 }
0x1181   :  { %3519 = vpow2.f32 %v3293_v28  ;;  %v1538_v28 = vld [vmem:[#allocation6 + $0x68] sm:$0xff] }
0x1182   :  { %3383 = vmatpush.msra.mxu3 %v1538_v28  ;;  %1619 = vmatpush.msrb.mxu1 %v1538_v28 }
0x1185   :  { %v3516_v52 = vpop.eup %3515 }
0x1186   :  { %v3518_v63 = vpop.eup %3517  ;;  %1465 = vrot.lane.b32.xlu1 %v3516_v52, %s3804_s3  ;;  %v1539_v52 = vld [vmem:[#allocation6 + $0x70] sm:$0xff] }
0x1187   :  { %1488 = vrot.lane.b32.xlu2 %v3518_v63, %s3804_s3  ;;  %v3520_v29 = vpop.eup %3519  ;;  %3378 = vmatpush.msra.mxu2 %v1539_v52 }
0x1188   :  { %v1430_v32 = vadd.f32 1.0, %v3520_v29  ;;  %v1535_v29 = vld [vmem:[#allocation6 + $0x50] sm:$0xff]  ;;  %1577 = vmatpush.msrb.mxu0 %v1539_v52 }
0x118a   :  { %3521 = vrcp.f32 %v1430_v32  ;;  %v1457_v49 = vand.u32 2147483648, %v1430_v32  ;;  %vm1451_vm0 = vweird.f32 %v1430_v32  ;;  %v1455_v14 = vand.u32 2147483647, %v1430_v32 }
0x118b   :  { %3523 = vpow2.f32 %v3292_v7  ;;  %v1339_v7 = vsel %vm628_vm6, %v4587_v9, %v4584_v18  ;;  %v785_v9 = vsel %vm782_vm10, %v4374_v17, 0.0 }
0x118c   :  { %v1458_v56 = vor.u32 1.1754944e-38, %v1457_v49  ;;  %vm1456_vm2 = vcmp.eq.f32.partialorder %v1455_v14, 8.507059e+37 }
0x1190   :  { %v3522_v5 = vpop.eup %3521 }
0x1191   :  { %v1447_v11 = vmul.f32 %v3522_v5, %v1430_v32  ;;  %v3524_v35 = vpop.eup %3523  ;;  %vm1452_vm7 = vweird.f32 %v3522_v5  ;;  %v1536_v32 = vld [vmem:[#allocation6 + $0x58] sm:$0xff] }
0x1192   :  { %v1429_v37 = vadd.f32 1.0, %v3524_v35  ;;  %vm1453_vm1 = vmor %vm1451_vm0, %vm1452_vm7  ;;  %vm5521_vm7 = vcmp.eq.s32.totalorder %v4209_v15, 1  ;;  %3384 = vmatpush.msra.mxu3 %v1536_v32  ;;  %1620 = vmatpush.msrb.mxu1 %v1536_v32  ;;  %vm5522_vm0 = vcmp.eq.s32.totalorder %v4207_v13, 1  ;;  %v4763_v32 = vld [vmem:[#allocation8] sm:$0xff] }
0x1193   :  { %v1448_v60 = vsub.f32 1.0, %v1447_v11  ;;  %v477_v39 = vsel %vm5521_vm7, %v4211_v19, 0.0  ;;  %v1537_v19 = vld [vmem:[#allocation6 + $0x60] sm:$0xff] }
0x1194   :  { %3525 = vrcp.f32 %v1429_v37  ;;  %v1442_v45 = vand.u32 2147483648, %v1429_v37  ;;  %vm1436_vm12 = vweird.f32 %v1429_v37  ;;  %v1440_v36 = vand.u32 2147483647, %v1429_v37  ;;  %3379 = vmatpush.msra.mxu2 %v1537_v19  ;;  %1578 = vmatpush.msrb.mxu0 %v1537_v19  ;;  %v4750_v19 = vld [vmem:[#allocation8 + $0x30] sm:$0xff] }
0x1195   :  { %v1449_v59 = vmul.f32 %v3522_v5, %v1448_v60  ;;  %3385 = vmatpush.msra.mxu3 %v1534_v62  ;;  %1621 = vmatpush.msrb.mxu1 %v1534_v62 }
0x1196   :  { %v1443_v30 = vor.u32 1.1754944e-38, %v1442_v45  ;;  %vm1441_vm8 = vcmp.eq.f32.partialorder %v1440_v36, 8.507059e+37  ;;  %3380 = vmatpush.msra.mxu2 %v1535_v29  ;;  %1579 = vmatpush.msrb.mxu0 %v1535_v29  ;;  %v4755_v29 = vld [vmem:[#allocation8 + $0x20] sm:$0xff] }
0x1197   :  { %v1450_v27 = vadd.f32 %v3522_v5, %v1449_v59  ;;  %v600_v59 = vsel %vm597_vm4, %v4285_v51, 0.0 }
0x1198   :  { %3381 = vmatpush.msra.mxu2 %v1533_v42  ;;  %1580 = vmatpush.msrb.mxu0 %v1533_v42 }
0x1199   :  { %v1454_v41 = vsel %vm1453_vm1, %v3522_v5, %v1450_v27  ;;  %v1365_v5 = vsel %vm597_vm4, %v4604_v10, 0.0  ;;  %v754_v10 = vsel %vm751_vm9, %v4363_v16, 0.0  ;;  %v1198_v16 = vsel %vm782_vm10, %v4551_v38, 0.0  ;;  %vm5523_vm1 = vmmov %vm5522_vm0 }
0x119a   :  { %v4625_v6 = vsel %vm1456_vm2, %v1458_v56, %v1454_v41  ;;  %v3526_v2 = vpop.eup %3525  ;;  %vm5524_vm2 = vmmov %vm5521_vm7 }
0x119b   :  { %v1432_v54 = vmul.f32 %v3526_v2, %v1429_v37  ;;  %vm1437_vm11 = vweird.f32 %v3526_v2  ;;  %v1486_v43 = vmul.f32 %v4625_v6, %v1364_v23  ;;  %v4732_v23 = vld [vmem:[#allocation8 + $0x70] sm:$0xff] }
0x119c   :  { %vm1438_vm15 = vmor %vm1436_vm12, %vm1437_vm11  ;;  %1815 = vmatpush.msrb.mxu2 %v4732_v23 }
0x119d   :  { %v1433_v12 = vsub.f32 1.0, %v1432_v54 }
0x119f   :  { %v1434_v33 = vmul.f32 %v3526_v2, %v1433_v12 }
0x11a1   :  { %v1435_v61 = vadd.f32 %v3526_v2, %v1434_v33 }
0x11a3   :  { %v1439_v50 = vsel %vm1438_vm15, %v3526_v2, %v1435_v61  ;;  %v439_v2 = vsel %vm5523_vm1, %v4221_v53, 0.0  ;;  %v908_v53 = vsel %vm905_vm13, %v4441_v58, 0.0  ;;  %v631_v61 = vsel %vm628_vm6, %v4296_v55, 0.0  ;;  %v1530_v55 = vld [vmem:[#allocation6 + $0x28] sm:$0xff] }
0x11a4   :  { %v4629_v31 = vsel %vm1441_vm8, %v1443_v30, %v1439_v50  ;;  %v1340_v58 = vsel %vm628_vm6, %v4602_v48, 0.0  ;;  %v1531_v50 = vld [vmem:[#allocation6 + $0x30] sm:$0xff]  ;;  %v1532_v30 = vld [vmem:[#allocation6 + $0x38] sm:$0xff] }
0x11a5   :  { %v1463_v11 = vmul.f32 %v4629_v31, %v1339_v7  ;;  %1683 = vmatpush.msra.mxu0 %v1531_v50  ;;  %1724 = vmatpush.msra.mxu1 %v1532_v30 }
0x11a7   :  { %1725 = vmatpush.msra.mxu1 %v1530_v55 }
0x11e1   :  { %v1489_v8 = vpop.permute.xlu2 %1488 }
0x11e2   :  { %v1491_v25 = vmul.f32 %v1489_v8, %v4625_v6 }
0x11e4   :  { %1493 = vrot.lane.b32.xlu0 %v1491_v25, %s3802_s29  ;;  %v4705_v25 = vld [vmem:[%s5511_s8 + $0x18] sm:$0xff] }
0x11f8   :  { %v1466_v1 = vpop.permute.xlu1 %1465 }
0x11f9   :  { %v1468_v34 = vmul.f32 %v1466_v1, %v4629_v31  ;;  %v1529_v1 = vld [vmem:[#allocation6 + $0x20] sm:$0xff] }
0x11fa   :  { %1684 = vmatpush.msra.mxu0 %v1529_v1 }
0x11fb   :  { %1470 = vrot.lane.b32.xlu0 %v1468_v34, %s3802_s29  ;;  %v1527_v34 = vld [vmem:[#allocation6 + $0x10] sm:$0xff] }
0x11fc   :  { %1685 = vmatpush.msra.mxu0 %v1527_v34 }
0x1203   :  { %1225 = vrot.lane.b32.xlu0 %v1223_v26, %s3802_s29  ;;  %v1528_v26 = vld [vmem:[#allocation6 + $0x18] sm:$0xff] }
0x1204   :  { %1726 = vmatpush.msra.mxu1 %v1528_v26 }
0x120b   :  { %1083 = vrot.lane.b32.xlu0 %v1081_v4, %s3802_s29  ;;  %v1525_v4 = vld [vmem:[#allocation6] sm:$0xff] }
0x120c   :  { %1686 = vmatpush.msra.mxu0 %v1525_v4 }
0x1213   :  { %941 = vrot.lane.b32.xlu0 %v939_v20, %s3802_s29  ;;  %v1526_v20 = vld [vmem:[#allocation6 + $0x8] sm:$0xff] }
0x1214   :  { %1727 = vmatpush.msra.mxu1 %v1526_v20 }
0x121b   :  { %1058 = vrot.lane.b32.xlu0 %v1056_v22, %s3802_s29 }
0x1223   :  { %479 = vrot.lane.b32.xlu0 %v477_v39, %s3802_s29 }
0x122b   :  { %1800 = vrot.lane.b32.xlu0 %v4705_v25, %s3802_s29 }
0x1256   :  { %v1494_v47 = vpop.permute.xlu0 %1493 }
0x1257   :  { %v1496_v44 = vadd.f32 %v1494_v47, %v1486_v43  ;;  %v4734_v43 = vld [vmem:[#allocation8 + $0x60] sm:$0xff]  ;;  %v4738_v47 = vld [vmem:[#allocation8 + $0x50] sm:$0xff] }
0x1258   :  { %1816 = vmatpush.msrb.mxu2 %v4734_v43 }
0x1259   :  { %3527 = vtanh.f32 %v1496_v44  ;;  %v4743_v44 = vld [vmem:[#allocation8 + $0x40] sm:$0xff] }
0x125a   :  { %1817 = vmatpush.msrb.mxu2 %v4738_v47 }
0x125c   :  { %1818 = vmatpush.msrb.mxu2 %v4743_v44 }
0x125e   :  { %1819 = vmatpush.msrb.mxu2 %v4750_v19 }
0x125f   :  { %v3528_v63 = vpop.eup %3527 }
0x1260   :  { %1499 = vrot.lane.b32.xlu2 %v3528_v63, %s3804_s3  ;;  %1820 = vmatpush.msrb.mxu2 %v4755_v29 }
0x1268   :  { %1367 = vrot.lane.b32.xlu2 %v1365_v5, %s3802_s29 }
0x126d   :  { %v1471_v60 = vpop.permute.xlu0 %1470 }
0x126e   :  { %v1473_v35 = vadd.f32 %v1471_v60, %v1463_v11  ;;  %v4779_v11 = vld [vmem:[#allocation8 + $0x78] sm:$0xff] }
0x126f   :  { %1835 = vmatpush.msrb.mxu3 %v4779_v11 }
0x1270   :  { %602 = vrot.lane.b32.xlu2 %v600_v59, %s3802_s29  ;;  %3529 = vtanh.f32 %v1473_v35 }
0x1275   :  { %v1226_v37 = vpop.permute.xlu0 %1225 }
0x1276   :  { %1228 = vst.msk [vmem:[#allocation3 + $0x10] sm:$0xff] %vm320_vm3, %v1226_v37  ;;  %v3530_v54 = vpop.eup %3529  ;;  %v4796_v37 = vld [vmem:[#allocation8 + $0x68] sm:$0xff] }
0x1277   :  { %1836 = vmatpush.msrb.mxu3 %v4796_v37 }
0x1278   :  { %756 = vrot.lane.b32.xlu2 %v754_v10, %s3802_s29  ;;  %v4798_v10 = vld [vmem:[#allocation8 + $0x58] sm:$0xff] }
0x1279   :  { %1837 = vmatpush.msrb.mxu3 %v4798_v10 }
0x127d   :  { %v1084_v18 = vpop.permute.xlu0 %1083  ;;  %v1519_v62 = vld [vmem:[#allocation3 + $0x10] sm:$0xff] }
0x127e   :  { %1086 = vst.msk [vmem:[#allocation3 + $0x18] sm:$0xff] %vm320_vm3, %v1084_v18  ;;  %v4802_v18 = vld [vmem:[#allocation8 + $0x48] sm:$0xff] }
0x127f   :  { %1838 = vmatpush.msrb.mxu3 %v4802_v18 }
0x1280   :  { %787 = vrot.lane.b32.xlu2 %v785_v9, %s3802_s29 }
0x1285   :  { %v942_v51 = vpop.permute.xlu0 %941  ;;  %v1520_v27 = vld [vmem:[#allocation3 + $0x18] sm:$0xff] }
0x1286   :  { %944 = vst.msk [vmem:[#allocation3 + $0x20] sm:$0xff] %vm320_vm3, %v942_v51  ;;  %3297 = vmatmul.msk.f32.vlgmr.msra.gmra.mxu2 %vm320_vm3, %v1520_v27  ;;  %3305 = vmatmul.msk.f32.vlgmr.msra.gmra.mxu3 %vm320_vm3, %v1520_v27  ;;  %v4811_v51 = vld [vmem:[#allocation8 + $0x38] sm:$0xff] }
0x1287   :  { %1839 = vmatpush.msrb.mxu3 %v4811_v51 }
0x1288   :  { %1200 = vrot.lane.b32.xlu2 %v1198_v16, %s3802_s29  ;;  %v4818_v16 = vld [vmem:[#allocation8 + $0x28] sm:$0xff] }
0x1289   :  { %1840 = vmatpush.msrb.mxu3 %v4818_v16 }
0x128d   :  { %v1059_v49 = vpop.permute.xlu0 %1058  ;;  %v1521_v14 = vld [vmem:[#allocation3 + $0x20] sm:$0xff] }
0x128e   :  { %1061 = vst.msk [vmem:[#allocation2 + $0x20] sm:$0xff] %vm320_vm3, %v1059_v49  ;;  %3298 = vmatmul.msk.f32.gmra.mxu2 %vm320_vm3, %v1521_v14  ;;  %3306 = vmatmul.msk.f32.gmra.mxu3 %vm320_vm3, %v1521_v14  ;;  %v4823_v49 = vld [vmem:[%s5511_s8 + $0x10] sm:$0xff] }
0x1295   :  { %v480_v17 = vpop.permute.xlu0 %479 }
0x1296   :  { %482 = vst.msk [vmem:[#allocation3 + $0x38] sm:$0xff] %vm320_vm3, %v480_v17  ;;  %v3328_v17 = vld [vmem:[%s5512_s9 + $0x10] sm:$0xff] }
0x1297   :  { %1888 = vrot.lane.b32.xlu0 %v3328_v17, %s3802_s29 }
0x129d   :  { %v1524_v9 = vld [vmem:[#allocation3 + $0x38] sm:$0xff]  ;;  %v1801_v14 = vpop.permute.xlu0 %1800 }
0x12ba   :  { %v1500_v41 = vpop.permute.xlu2 %1499 }
0x12bb   :  { %v1502_v56 = vmul.f32 %v1500_v41, %v4625_v6  ;;  %v4830_v41 = vld [vmem:[#allocation8 + $0x18] sm:$0xff] }
0x12bc   :  { %1841 = vmatpush.msrb.mxu3 %v4830_v41 }
0x12bd   :  { %v1503_v8 = vsel %vm5522_vm0, %v1502_v56, 0.0  ;;  %v1803_v56 = vsel %vm320_vm3, %v4823_v49, %v1801_v14 }
0x12be   :  { %1505 = vrot.lane.b32.xlu1 %v1503_v8, %s3802_s29  ;;  %v4838_v8 = vld [vmem:[#allocation8 + $0x8] sm:$0xff] }
0x12bf   :  { %1842 = vmatpush.msrb.mxu3 %v4838_v8 }
0x12c1   :  { %2134 = vmatpush.msra.mxu3 %v4779_v11 }
0x12c2   :  { %v1368_v38 = vpop.permute.xlu2 %1367 }
0x12c3   :  { %1370 = vst.msk [vmem:[#allocation3 + $0x8] sm:$0xff] %vm320_vm3, %v1368_v38  ;;  %2135 = vmatpush.msra.mxu3 %v4796_v37 }
0x12c5   :  { %2136 = vmatpush.msra.mxu3 %v4798_v10 }
0x12c6   :  { %441 = vrot.lane.b32.xlu1 %v439_v2, %s3802_s29  ;;  %v1513_v2 = vld [vmem:[#allocation2 + $0x20] sm:$0xff] }
0x12c7   :  { %2137 = vmatpush.msra.mxu3 %v4802_v18 }
0x12c9   :  { %2138 = vmatpush.msra.mxu3 %v4811_v51 }
0x12ca   :  { %v603_v6 = vpop.permute.xlu2 %602  ;;  %v1518_v46 = vld [vmem:[#allocation3 + $0x8] sm:$0xff] }
0x12cb   :  { %605 = vst.msk [vmem:[#allocation2 + $0x8] sm:$0xff] %vm320_vm3, %v603_v6  ;;  %2139 = vmatpush.msra.mxu3 %v4818_v16 }
0x12cd   :  { %2140 = vmatpush.msra.mxu3 %v4830_v41 }
0x12ce   :  { %1476 = vrot.lane.b32.xlu1 %v3530_v54, %s3804_s3 }
0x12cf   :  { %2141 = vmatpush.msra.mxu3 %v4838_v8 }
0x12d2   :  { %v757_v12 = vpop.permute.xlu2 %756  ;;  %v1510_v59 = vld [vmem:[#allocation2 + $0x8] sm:$0xff] }
0x12d3   :  { %759 = vst.msk [vmem:[#allocation2 + $0x10] sm:$0xff] %vm320_vm3, %v757_v12 }
0x12d6   :  { %910 = vrot.lane.b32.xlu1 %v908_v53, %s3802_s29 }
0x12da   :  { %v788_v33 = vpop.permute.xlu2 %787  ;;  %v1511_v27 = vld [vmem:[#allocation2 + $0x10] sm:$0xff] }
0x12db   :  { %790 = vst.msk [vmem:[#allocation3 + $0x28] sm:$0xff] %vm320_vm3, %v788_v33 }
0x12de   :  { %633 = vrot.lane.b32.xlu1 %v631_v61, %s3802_s29 }
0x12e2   :  { %v1201_v45 = vpop.permute.xlu2 %1200  ;;  %v1522_v36 = vld [vmem:[#allocation3 + $0x28] sm:$0xff] }
0x12e3   :  { %1203 = vst.msk [vmem:[#allocation2 + $0x28] sm:$0xff] %vm320_vm3, %v1201_v45  ;;  %3299 = vmatmul.msk.f32.gmra.mxu2 %vm320_vm3, %v1522_v36  ;;  %3307 = vmatmul.msk.f32.gmra.mxu3 %vm320_vm3, %v1522_v36 }
0x12e6   :  { %1342 = vrot.lane.b32.xlu1 %v1340_v58, %s3802_s29 }
0x12ea   :  { %v1514_v6 = vld [vmem:[#allocation2 + $0x28] sm:$0xff] }
0x1309   :  { %v4891_v58 = vpop.f32.mrf.mxu2 }
0x1311   :  { %v4893_v1 = vpop.f32.mrf.mxu2 }
0x1330   :  { %v1506_v22 = vpop.permute.xlu1 %1505 }
0x1331   :  { %1508 = vst.msk [vmem:[#allocation3] sm:$0xff] %vm320_vm3, %v1506_v22 }
0x1338   :  { %v442_v48 = vpop.permute.xlu1 %441  ;;  %v1517_v39 = vld [vmem:[#allocation3] sm:$0xff] }
0x1339   :  { %444 = vst.msk [vmem:[#allocation2] sm:$0xff] %vm320_vm3, %v442_v48  ;;  %3294 = vmatmul.msk.f32.vlgmr.msrb.gmra.mxu0 %vm320_vm3, %v1517_v39  ;;  %3302 = vmatmul.msk.f32.vlgmr.msrb.gmra.mxu1 %vm320_vm3, %v1517_v39 }
0x133a   :  { %1972 = vmatpush.msrb.mxu0 %v4732_v23  ;;  %1992 = vmatpush.msrb.mxu1 %v4779_v11 }
0x133c   :  { %1973 = vmatpush.msrb.mxu0 %v4734_v43  ;;  %1993 = vmatpush.msrb.mxu1 %v4796_v37 }
0x133e   :  { %1974 = vmatpush.msrb.mxu0 %v4738_v47  ;;  %1994 = vmatpush.msrb.mxu1 %v4798_v10 }
0x1340   :  { %v1477_v52 = vpop.permute.xlu1 %1476  ;;  %1975 = vmatpush.msrb.mxu0 %v4743_v44  ;;  %v1509_v7 = vld [vmem:[#allocation2] sm:$0xff]  ;;  %1995 = vmatpush.msrb.mxu1 %v4802_v18 }
0x1341   :  { %v1479_v63 = vmul.f32 %v1477_v52, %v4629_v31  ;;  %3295 = vmatmul.msk.f32.gmra.mxu0 %vm320_vm3, %v1518_v46  ;;  %3303 = vmatmul.msk.f32.gmra.mxu1 %vm320_vm3, %v1518_v46  ;;  %v4761_v31 = vld [vmem:[#allocation8 + $0x10] sm:$0xff] }
0x1342   :  { %1976 = vmatpush.msrb.mxu0 %v4750_v19  ;;  %1821 = vmatpush.msrb.mxu2 %v4761_v31 }
0x1343   :  { %v1480_v28 = vsel %vm5524_vm2, %v1479_v63, 0.0  ;;  %1996 = vmatpush.msrb.mxu1 %v4811_v51 }
0x1344   :  { %1482 = vrot.lane.b32.xlu2 %v1480_v28, %s3802_s29  ;;  %1977 = vmatpush.msrb.mxu0 %v4755_v29 }
0x1345   :  { %1822 = vmatpush.msrb.mxu2 %v4763_v32  ;;  %1997 = vmatpush.msrb.mxu1 %v4818_v16 }
0x1346   :  { %1978 = vmatpush.msrb.mxu0 %v4761_v31 }
0x1347   :  { %2114 = vmatpush.msra.mxu2 %v4732_v23  ;;  %1998 = vmatpush.msrb.mxu1 %v4830_v41 }
0x1348   :  { %v911_v42 = vpop.permute.xlu1 %910  ;;  %1979 = vmatpush.msrb.mxu0 %v4763_v32 }
0x1349   :  { %913 = vst.msk [vmem:[#allocation2 + $0x18] sm:$0xff] %vm320_vm3, %v911_v42  ;;  %3296 = vmatmul.msk.f32.gmra.mxu0 %vm320_vm3, %v1519_v62  ;;  %3304 = vmatmul.msk.f32.gmra.mxu1 %vm320_vm3, %v1519_v62  ;;  %v4905_v42 = vpop.f32.mrf.mxu3 }
0x134a   :  { %2115 = vmatpush.msra.mxu2 %v4734_v43  ;;  %1999 = vmatpush.msrb.mxu1 %v4838_v8 }
0x134c   :  { %2116 = vmatpush.msra.mxu2 %v4738_v47 }
0x134e   :  { %2117 = vmatpush.msra.mxu2 %v4743_v44 }
0x1350   :  { %v634_v5 = vpop.permute.xlu1 %633  ;;  %2118 = vmatpush.msra.mxu2 %v4750_v19  ;;  %v1512_v38 = vld [vmem:[#allocation2 + $0x18] sm:$0xff] }
0x1351   :  { %636 = vst.msk [vmem:[#allocation3 + $0x30] sm:$0xff] %vm320_vm3, %v634_v5  ;;  %3310 = vmatmul.msk.f32.vlgmr.msra.gmra.mxu0 %vm320_vm3, %v1509_v7  ;;  %3318 = vmatmul.msk.f32.vlgmr.msra.gmra.mxu1 %vm320_vm3, %v1509_v7  ;;  %v1753_v5 = vld [vmem:[%s5509_s6] sm:$0x3]  ;;  %v4919_v17 = vpop.f32.mrf.mxu3 }
0x1352   :  { %2256 = vmatpush.msra.mxu0 %v4732_v23  ;;  %2119 = vmatpush.msra.mxu2 %v4755_v29 }
0x1353   :  { %2276 = vmatpush.msra.mxu1 %v4779_v11 }
0x1354   :  { %2257 = vmatpush.msra.mxu0 %v4734_v43  ;;  %2120 = vmatpush.msra.mxu2 %v4761_v31 }
0x1355   :  { %2277 = vmatpush.msra.mxu1 %v4796_v37 }
0x1356   :  { %2258 = vmatpush.msra.mxu0 %v4738_v47  ;;  %2121 = vmatpush.msra.mxu2 %v4763_v32 }
0x1357   :  { %2278 = vmatpush.msra.mxu1 %v4798_v10 }
0x1358   :  { %v1343_v60 = vpop.permute.xlu1 %1342  ;;  %v1523_v35 = vld [vmem:[#allocation3 + $0x30] sm:$0xff]  ;;  %2259 = vmatpush.msra.mxu0 %v4743_v44 }
0x1359   :  { %1345 = vst.msk [vmem:[#allocation2 + $0x30] sm:$0xff] %vm320_vm3, %v1343_v60  ;;  %3300 = vmatmul.msk.f32.gmra.mxu2 %vm320_vm3, %v1523_v35  ;;  %3308 = vmatmul.msk.f32.gmra.mxu3 %vm320_vm3, %v1523_v35 }
0x135a   :  { %3311 = vmatmul.msk.f32.gmra.mxu0 %vm320_vm3, %v1510_v59  ;;  %3319 = vmatmul.msk.f32.gmra.mxu1 %vm320_vm3, %v1510_v59  ;;  %v4916_v59 = vperm.slane %v1753_v5, 0 }
0x135b   :  { %2260 = vmatpush.msra.mxu0 %v4750_v19  ;;  %2279 = vmatpush.msra.mxu1 %v4802_v18 }
0x135d   :  { %2261 = vmatpush.msra.mxu0 %v4755_v29  ;;  %2280 = vmatpush.msra.mxu1 %v4811_v51 }
0x135f   :  { %2262 = vmatpush.msra.mxu0 %v4761_v31  ;;  %2281 = vmatpush.msra.mxu1 %v4818_v16 }
0x1360   :  { %v1515_v54 = vld [vmem:[#allocation2 + $0x30] sm:$0xff] }
0x1361   :  { %3301 = vmatmul.msk.f32.gmra.mxu2 %vm320_vm3, %v1524_v9  ;;  %3309 = vmatmul.msk.f32.gmra.mxu3 %vm320_vm3, %v1524_v9 }
0x1362   :  { %3312 = vmatmul.msk.f32.gmra.mxu0 %vm320_vm3, %v1511_v27  ;;  %3320 = vmatmul.msk.f32.gmra.mxu1 %vm320_vm3, %v1511_v27 }
0x1363   :  { %2263 = vmatpush.msra.mxu0 %v4763_v32  ;;  %2282 = vmatpush.msra.mxu1 %v4830_v41 }
0x1365   :  { %2283 = vmatpush.msra.mxu1 %v4838_v8 }
0x1366   :  { %v1597_v4 = vpop.f32.mrf.mxu2 }
0x1369   :  { %3330 = vmatmul.msk.f32.vlgmr.msrb.gmra.mxu2 %vm322_vm5, %v1803_v56  ;;  %3331 = vmatmul.msk.f32.vlgmr.msrb.gmra.mxu3 %vm322_vm5, %v1803_v56 }
0x136a   :  { %3313 = vmatmul.msk.f32.gmra.mxu0 %vm320_vm3, %v1512_v38  ;;  %3321 = vmatmul.msk.f32.gmra.mxu1 %vm320_vm3, %v1512_v38 }
0x136b   :  { %2398 = vmatpush.msrb.mxu2 %v4732_v23  ;;  %2418 = vmatpush.msrb.mxu3 %v4779_v11 }
0x136d   :  { %2399 = vmatpush.msrb.mxu2 %v4734_v43  ;;  %2419 = vmatpush.msrb.mxu3 %v4796_v37 }
0x136f   :  { %2400 = vmatpush.msrb.mxu2 %v4738_v47  ;;  %2420 = vmatpush.msrb.mxu3 %v4798_v10 }
0x1371   :  { %2401 = vmatpush.msrb.mxu2 %v4743_v44  ;;  %2421 = vmatpush.msrb.mxu3 %v4802_v18 }
0x1372   :  { %3314 = vmatmul.msk.f32.gmra.mxu0 %vm320_vm3, %v1513_v2  ;;  %3322 = vmatmul.msk.f32.gmra.mxu1 %vm320_vm3, %v1513_v2 }
0x1373   :  { %2402 = vmatpush.msrb.mxu2 %v4750_v19  ;;  %2422 = vmatpush.msrb.mxu3 %v4811_v51 }
0x1375   :  { %2403 = vmatpush.msrb.mxu2 %v4755_v29  ;;  %2423 = vmatpush.msrb.mxu3 %v4818_v16 }
0x1377   :  { %2404 = vmatpush.msrb.mxu2 %v4761_v31  ;;  %2424 = vmatpush.msrb.mxu3 %v4830_v41 }
0x1379   :  { %2405 = vmatpush.msrb.mxu2 %v4763_v32  ;;  %2425 = vmatpush.msrb.mxu3 %v4838_v8 }
0x137a   :  { %3315 = vmatmul.msk.f32.gmra.mxu0 %vm320_vm3, %v1514_v6  ;;  %3323 = vmatmul.msk.f32.gmra.mxu1 %vm320_vm3, %v1514_v6  ;;  %v1638_v6 = vpop.f32.mrf.mxu3 }
0x1382   :  { %3316 = vmatmul.msk.f32.gmra.mxu0 %vm320_vm3, %v1515_v54  ;;  %3324 = vmatmul.msk.f32.gmra.mxu1 %vm320_vm3, %v1515_v54 }
0x139e   :  { %v1483_v12 = vpop.permute.xlu2 %1482 }
0x139f   :  { %1485 = vst.msk [vmem:[#allocation2 + $0x38] sm:$0xff] %vm320_vm3, %v1483_v12 }
0x13a6   :  { %v1516_v53 = vld [vmem:[#allocation2 + $0x38] sm:$0xff] }
0x13a7   :  { %3317 = vmatmul.msk.f32.gmra.mxu0 %vm320_vm3, %v1516_v53  ;;  %3325 = vmatmul.msk.f32.gmra.mxu1 %vm320_vm3, %v1516_v53 }
0x13b6   :  { %v1582_v33 = vpop.f32.mrf.mxu0  ;;  %v1623_v61 = vpop.f32.mrf.mxu1 }
0x13be   :  { %v4889_v45 = vpop.f32.mrf.mxu0  ;;  %v1626_v36 = vpop.f32.mrf.mxu1 }
0x13c6   :  { %v1588_v50 = vpop.f32.mrf.mxu0  ;;  %v1629_v30 = vpop.f32.mrf.mxu1 }
0x13ce   :  { %v1688_v55 = vpop.f32.mrf.mxu0  ;;  %v1729_v34 = vpop.f32.mrf.mxu1 }
0x13cf   :  { %v4895_v26 = vadd.f32 %v1729_v34, %v1623_v61  ;;  %v1689_v7 = vadd.f32 %v1688_v55, %v1582_v33  ;;  %v3329_v61 = vld [vmem:[%s5512_s9 + $0x18] sm:$0xff] }
0x13d1   :  { %5525 = vst [vmem:[#allocation14_spill] sm:$0xff] %v4895_v26  ;;  %v1759_v9 = vadd.f32 %v4916_v59, %v1689_v7 }
0x13d7   :  { %v4897_v20 = vpop.f32.mrf.mxu0  ;;  %v1732_v22 = vpop.f32.mrf.mxu1 }
0x13d8   :  { %v4899_v48 = vadd.f32 %v1732_v22, %v1626_v36 }
0x13da   :  { %5526 = vst [vmem:[#allocation15_spill] sm:$0xff] %v4899_v48 }
0x13dc   :  { %v1600_v39 = vpop.f32.mrf.mxu2  ;;  %v1641_v36 = vpop.f32.mrf.mxu3 }
0x13df   :  { %v1694_v52 = vpop.f32.mrf.mxu0  ;;  %v1735_v46 = vpop.f32.mrf.mxu1 }
0x13e0   :  { %v4901_v63 = vadd.f32 %v1694_v52, %v1588_v50  ;;  %v4903_v28 = vadd.f32 %v1735_v46, %v1629_v30 }
0x13e4   :  { %v4907_v62 = vpop.f32.mrf.mxu2  ;;  %v1644_v22 = vpop.f32.mrf.mxu3 }
0x13e5   :  { %5527 = vst [vmem:[#allocation16_spill] sm:$0xff] %v4907_v62 }
0x13e7   :  { %v4912_v60 = vpop.f32.mrf.mxu0  ;;  %v4914_v35 = vpop.f32.mrf.mxu1 }
0x13ec   :  { %v1824_v27 = vpop.f32.mrf.mxu2 }
0x13ed   :  { %v1825_v14 = vadd.f32 %v1824_v27, %v1759_v9  ;;  %v1844_v9 = vpop.f32.mrf.mxu3 }
0x13ef   :  { %3531 = vtanh.f32 %v1825_v14  ;;  %v4921_v56 = vpop.f32.mrf.mxu0  ;;  %v4923_v38 = vpop.f32.mrf.mxu1 }
0x13f5   :  { %v3532_v2 = vpop.eup %3531 }
0x13f6   :  { %1893 = vrot.lane.b32.xlu1 %v3532_v2, %s3804_s3 }
0x13f7   :  { %v1703_v54 = vpop.f32.mrf.mxu0  ;;  %v1744_v12 = vpop.f32.mrf.mxu1 }
0x13f8   :  { %v4926_v53 = vadd.f32 %v1703_v54, %v1597_v4  ;;  %v4928_v33 = vadd.f32 %v1744_v12, %v1638_v6  ;;  %v4938_v4 = vperm.slane %v1753_v5, 1  ;;  %v3332_v6 = vmul.f32 -1.442695, %v1825_v14 }
0x13fe   :  { %1921 = vrot.lane.b32.xlu1 %v3329_v61, %s3802_s29 }
0x13ff   :  { %v1706_v50 = vpop.f32.mrf.mxu0  ;;  %v1747_v30 = vpop.f32.mrf.mxu1 }
0x1400   :  { %v4934_v55 = vadd.f32 %v1706_v50, %v1600_v39  ;;  %v4936_v34 = vadd.f32 %v1747_v30, %v1641_v36 }
0x1424   :  { %v1750_v52 = vpop.f32.mrf.mxu1 }
0x1425   :  { %v1751_v46 = vadd.f32 %v1750_v52, %v1644_v22 }
0x1427   :  { %v1774_v7 = vadd.f32 %v4938_v4, %v1751_v46 }
0x1429   :  { %v1845_v27 = vadd.f32 %v1844_v9, %v1774_v7 }
0x142b   :  { %3533 = vtanh.f32 %v1845_v27  ;;  %v3333_v30 = vmul.f32 -1.442695, %v1845_v27 }
0x142c   :  { %3535 = vpow2.f32 %v3332_v6 }
0x1431   :  { %v3534_v2 = vpop.eup %3533 }
0x1432   :  { %1926 = vrot.lane.b32.xlu2 %v3534_v2, %s3804_s3  ;;  %v3536_v54 = vpop.eup %3535 }
0x1433   :  { %v1853_v39 = vadd.f32 1.0, %v3536_v54 }
0x1435   :  { %3537 = vrcp.f32 %v1853_v39  ;;  %v1866_v22 = vand.u32 2147483648, %v1853_v39  ;;  %vm1860_vm12 = vweird.f32 %v1853_v39  ;;  %v1864_v52 = vand.u32 2147483647, %v1853_v39 }
0x1436   :  { %3539 = vpow2.f32 %v3333_v30 }
0x1437   :  { %v1867_v7 = vor.u32 1.1754944e-38, %v1866_v22  ;;  %vm1865_vm8 = vcmp.eq.f32.partialorder %v1864_v52, 8.507059e+37 }
0x143b   :  { %v3538_v12 = vpop.eup %3537 }
0x143c   :  { %v1856_v61 = vmul.f32 %v3538_v12, %v1853_v39  ;;  %vm1861_vm11 = vweird.f32 %v3538_v12  ;;  %v3540_v2 = vpop.eup %3539 }
0x143d   :  { %vm1862_vm15 = vmor %vm1860_vm12, %vm1861_vm11  ;;  %v1854_v54 = vadd.f32 1.0, %v3540_v2  ;;  %vm5529_vm11 = vcmp.eq.s32.totalorder %v4207_v13, 1  ;;  %vm5531_vm12 = vcmp.eq.s32.totalorder %v4209_v15, 1 }
0x143e   :  { %v1857_v36 = vsub.f32 1.0, %v1856_v61 }
0x143f   :  { %3541 = vrcp.f32 %v1854_v54  ;;  %v1881_v39 = vand.u32 2147483648, %v1854_v54  ;;  %vm1875_vm0 = vweird.f32 %v1854_v54  ;;  %v1879_v30 = vand.u32 2147483647, %v1854_v54 }
0x1440   :  { %v1858_v50 = vmul.f32 %v3538_v12, %v1857_v36 }
0x1441   :  { %vm1880_vm2 = vcmp.eq.f32.partialorder %v1879_v30, 8.507059e+37 }
0x1442   :  { %v1859_v5 = vadd.f32 %v3538_v12, %v1858_v50 }
0x1444   :  { %v1863_v46 = vsel %vm1862_vm15, %v3538_v12, %v1859_v5  ;;  %v1882_v5 = vor.u32 1.1754944e-38, %v1881_v39 }
0x1445   :  { %v1868_v14 = vsel %vm1865_vm8, %v1867_v7, %v1863_v46  ;;  %v3542_v61 = vpop.eup %3541  ;;  %v4946_v7 = vpop.permute.xlu0 %1888 }
0x1446   :  { %v1871_v27 = vmul.f32 %v3542_v61, %v1854_v54  ;;  %vm1876_vm7 = vweird.f32 %v3542_v61 }
0x1447   :  { %vm1877_vm1 = vmor %vm1875_vm0, %vm1876_vm7 }
0x1448   :  { %v1872_v36 = vsub.f32 1.0, %v1871_v27 }
0x144a   :  { %v1873_v50 = vmul.f32 %v3542_v61, %v1872_v36 }
0x144c   :  { %v1874_v26 = vadd.f32 %v3542_v61, %v1873_v50 }
0x144e   :  { %v1878_v12 = vsel %vm1877_vm1, %v3542_v61, %v1874_v26 }
0x144f   :  { %v1883_v22 = vsel %vm1880_vm2, %v1882_v5, %v1878_v12 }
0x1468   :  { %v1894_v9 = vpop.permute.xlu1 %1893 }
0x1469   :  { %v1896_v6 = vmul.f32 %v1894_v9, %v1868_v14  ;;  %v1891_v9 = vmul.f32 %v4946_v7, %v1868_v14 }
0x146b   :  { %1898 = vrot.lane.b32.xlu2 %v1896_v6, %s3802_s29 }
0x1470   :  { %v4955_v54 = vpop.permute.xlu1 %1921 }
0x1471   :  { %v1924_v61 = vmul.f32 %v4955_v54, %v1883_v22 }
0x148c   :  { %v1927_v52 = vpop.permute.xlu2 %1926 }
0x148d   :  { %v1929_v46 = vmul.f32 %v1927_v52, %v1883_v22 }
0x148f   :  { %1931 = vrot.lane.b32.xlu0 %v1929_v46, %s3802_s29 }
0x1497   :  { %1909 = vrot.lane.b32.xlu0 %v4823_v49, %s3805_s22 }
0x14c5   :  { %v1899_v2 = vpop.permute.xlu2 %1898 }
0x14c6   :  { %v4949_v6 = vadd.f32 %v1899_v2, %v1891_v9 }
0x14c8   :  { %3543 = vtanh.f32 %v4949_v6 }
0x14ce   :  { %v3544_v26 = vpop.eup %3543 }
0x14cf   :  { %1904 = vrot.lane.b32.xlu1 %v3544_v26, %s3804_s3  ;;  %v1692_v26 = vadd.f32 %v4897_v20, %v4889_v45 }
0x14d7   :  { %1941 = vrot.lane.b32.xlu1 %v4705_v25, %s3805_s22 }
0x1501   :  { %v1932_v49 = vpop.permute.xlu0 %1931 }
0x1502   :  { %v4958_v27 = vadd.f32 %v1932_v49, %v1924_v61  ;;  %v1761_v61 = vadd.f32 %v4916_v59, %v1692_v26  ;;  %v1772_v49 = vadd.f32 %v4938_v4, %v4936_v34 }
0x1504   :  { %3545 = vtanh.f32 %v4958_v27 }
0x1509   :  { %v1910_v39 = vpop.permute.xlu0 %1909 }
0x150a   :  { %v3546_v36 = vpop.eup %3545 }
0x150b   :  { %1937 = vrot.lane.b32.xlu2 %v3546_v36, %s3804_s3 }
0x1541   :  { %v1905_v50 = vpop.permute.xlu1 %1904 }
0x1542   :  { %v4962_v30 = vmul.f32 %v1905_v50, %v1868_v14 }
0x1544   :  { %5528 = vst [vmem:[#allocation17_spill] sm:$0xff] %v4962_v30  ;;  %v4967_v25 = vsel %vm5529_vm11, %v4962_v30, %v1910_v39 }
0x1545   :  { %1953 = vrot.lane.b32.xlu2 %v4967_v25, %s3802_s29 }
0x1549   :  { %v1942_v5 = vpop.permute.xlu1 %1941 }
0x1565   :  { %v1938_v12 = vpop.permute.xlu2 %1937 }
0x1566   :  { %v4971_v52 = vmul.f32 %v1938_v12, %v1883_v22  ;;  %v4999_v22 = vpop.f32.mrf.mxu0 }
0x1567   :  { %5532 = vst [vmem:[#allocation19_spill] sm:$0xff] %v4999_v22 }
0x1568   :  { %5530 = vst [vmem:[#allocation18_spill] sm:$0xff] %v4971_v52  ;;  %v4976_v46 = vsel %vm5531_vm12, %v4971_v52, %v1942_v5 }
0x1569   :  { %1957 = vrot.lane.b32.xlu0 %v4976_v46, %s3804_s3 }
0x159f   :  { %v1954_v14 = vpop.permute.xlu2 %1953 }
0x15db   :  { %v1958_v9 = vpop.permute.xlu0 %1957 }
0x15dc   :  { %v1960_v2 = vsel %vm320_vm3, %v1954_v14, %v1958_v9 }
0x15dd   :  { %3334 = vmatmul.msk.f32.vlgmr.msrb.gmra.mxu0 %vm322_vm5, %v1960_v2  ;;  %3335 = vmatmul.msk.f32.vlgmr.msrb.gmra.mxu1 %vm322_vm5, %v1960_v2 }
0x15de   :  { %2540 = vmatpush.msrb.mxu0 %v4732_v23  ;;  %2560 = vmatpush.msrb.mxu1 %v4779_v11 }
0x15e0   :  { %2541 = vmatpush.msrb.mxu0 %v4734_v43  ;;  %2561 = vmatpush.msrb.mxu1 %v4796_v37 }
0x15e2   :  { %2542 = vmatpush.msrb.mxu0 %v4738_v47  ;;  %2562 = vmatpush.msrb.mxu1 %v4798_v10 }
0x15e4   :  { %2543 = vmatpush.msrb.mxu0 %v4743_v44  ;;  %2563 = vmatpush.msrb.mxu1 %v4802_v18 }
0x15e6   :  { %2544 = vmatpush.msrb.mxu0 %v4750_v19  ;;  %2564 = vmatpush.msrb.mxu1 %v4811_v51 }
0x15e8   :  { %2545 = vmatpush.msrb.mxu0 %v4755_v29  ;;  %2565 = vmatpush.msrb.mxu1 %v4818_v16 }
0x15ea   :  { %2546 = vmatpush.msrb.mxu0 %v4761_v31  ;;  %2566 = vmatpush.msrb.mxu1 %v4830_v41 }
0x15ec   :  { %2547 = vmatpush.msrb.mxu0 %v4763_v32  ;;  %2567 = vmatpush.msrb.mxu1 %v4838_v8 }
0x165a   :  { %v1981_v36 = vpop.f32.mrf.mxu0  ;;  %v2001_v50 = vpop.f32.mrf.mxu1 }
0x165b   :  { %v1982_v39 = vadd.f32 %v1981_v36, %v1761_v61  ;;  %v2002_v12 = vadd.f32 %v2001_v50, %v1772_v49 }
0x165d   :  { %3547 = vtanh.f32 %v1982_v39  ;;  %v3337_v9 = vmul.f32 -1.442695, %v2002_v12  ;;  %v3336_v26 = vmul.f32 -1.442695, %v1982_v39 }
0x165e   :  { %3549 = vtanh.f32 %v2002_v12 }
0x165f   :  { %3551 = vpow2.f32 %v3337_v9 }
0x1663   :  { %v3548_v5 = vpop.eup %3547 }
0x1664   :  { %v3550_v14 = vpop.eup %3549  ;;  %2046 = vrot.lane.b32.xlu1 %v3548_v5, %s3804_s3 }
0x1665   :  { %2071 = vrot.lane.b32.xlu2 %v3550_v14, %s3804_s3  ;;  %v3552_v45 = vpop.eup %3551 }
0x1666   :  { %v2011_v20 = vadd.f32 1.0, %v3552_v45 }
0x1668   :  { %3553 = vrcp.f32 %v2011_v20  ;;  %v2038_v30 = vand.u32 2147483648, %v2011_v20  ;;  %vm2032_vm8 = vweird.f32 %v2011_v20  ;;  %v2036_v5 = vand.u32 2147483647, %v2011_v20 }
0x1669   :  { %3555 = vpow2.f32 %v3336_v26 }
0x166a   :  { %v2039_v14 = vor.u32 1.1754944e-38, %v2038_v30  ;;  %vm2037_vm0 = vcmp.eq.f32.partialorder %v2036_v5, 8.507059e+37 }
0x166e   :  { %v3554_v2 = vpop.eup %3553 }
0x166f   :  { %v2028_v34 = vmul.f32 %v3554_v2, %v2011_v20  ;;  %v3556_v61 = vpop.eup %3555  ;;  %vm2033_vm15 = vweird.f32 %v3554_v2 }
0x1670   :  { %v2010_v36 = vadd.f32 1.0, %v3556_v61  ;;  %vm2034_vm7 = vmor %vm2032_vm8, %vm2033_vm15  ;;  %vm5533_vm15 = vcmp.eq.s32.totalorder %v4209_v15, 1  ;;  %vm5534_vm8 = vcmp.eq.s32.totalorder %v4207_v13, 1 }
0x1671   :  { %v2029_v52 = vsub.f32 1.0, %v2028_v34  ;;  %v5014_v5 = vsel %vm5533_vm15, %v4958_v27, %v4955_v54 }
0x1672   :  { %3557 = vrcp.f32 %v2010_v36  ;;  %vm2017_vm2 = vweird.f32 %v2010_v36  ;;  %v2021_v62 = vand.u32 2147483647, %v2010_v36 }
0x1673   :  { %v2030_v49 = vmul.f32 %v3554_v2, %v2029_v52 }
0x1674   :  { %vm2022_vm12 = vcmp.eq.f32.partialorder %v2021_v62, 8.507059e+37 }
0x1675   :  { %v2031_v50 = vadd.f32 %v3554_v2, %v2030_v49  ;;  %v2023_v49 = vand.u32 2147483648, %v2010_v36 }
0x1677   :  { %v2035_v12 = vsel %vm2034_vm7, %v3554_v2, %v2031_v50  ;;  %v2024_v48 = vor.u32 1.1754944e-38, %v2023_v49 }
0x1678   :  { %v2040_v45 = vsel %vm2037_vm0, %v2039_v14, %v2035_v12  ;;  %v3558_v22 = vpop.eup %3557 }
0x1679   :  { %v2013_v26 = vmul.f32 %v3558_v22, %v2010_v36  ;;  %vm2018_vm1 = vweird.f32 %v3558_v22  ;;  %v2069_v12 = vmul.f32 %v2040_v45, %v5014_v5 }
0x167a   :  { %vm2019_vm11 = vmor %vm2017_vm2, %vm2018_vm1 }
0x167b   :  { %v2014_v34 = vsub.f32 1.0, %v2013_v26 }
0x167d   :  { %v2015_v52 = vmul.f32 %v3558_v22, %v2014_v34 }
0x167f   :  { %v2016_v61 = vadd.f32 %v3558_v22, %v2015_v52 }
0x1681   :  { %v2020_v20 = vsel %vm2019_vm11, %v3558_v22, %v2016_v61 }
0x1682   :  { %v2025_v2 = vsel %vm2022_vm12, %v2024_v48, %v2020_v20  ;;  %v5025_v48 = vsel %vm5534_vm8, %v4949_v6, %v4946_v7 }
0x1683   :  { %v2044_v62 = vmul.f32 %v2025_v2, %v5025_v48 }
0x16bf   :  { %v2072_v9 = vpop.permute.xlu2 %2071 }
0x16c0   :  { %v2074_v39 = vmul.f32 %v2072_v9, %v2040_v45 }
0x16c2   :  { %2076 = vrot.lane.b32.xlu1 %v2074_v39, %s3802_s29 }
0x16d6   :  { %v2047_v30 = vpop.permute.xlu1 %2046 }
0x16d7   :  { %v2049_v50 = vmul.f32 %v2047_v30, %v2025_v2 }
0x16d9   :  { %2051 = vrot.lane.b32.xlu0 %v2049_v50, %s3802_s29 }
0x1734   :  { %v2077_v14 = vpop.permute.xlu1 %2076 }
0x1735   :  { %v5017_v9 = vadd.f32 %v2077_v14, %v2069_v12 }
0x1737   :  { %3559 = vtanh.f32 %v5017_v9 }
0x173d   :  { %v3560_v22 = vpop.eup %3559 }
0x173e   :  { %2082 = vrot.lane.b32.xlu0 %v3560_v22, %s3804_s3 }
0x174b   :  { %v2052_v54 = vpop.permute.xlu0 %2051 }
0x174c   :  { %v5028_v27 = vadd.f32 %v2052_v54, %v2044_v62 }
0x174e   :  { %3561 = vtanh.f32 %v5028_v27 }
0x1754   :  { %v3562_v36 = vpop.eup %3561 }
0x1755   :  { %2057 = vrot.lane.b32.xlu2 %v3562_v36, %s3804_s3 }
0x17af   :  { %v2058_v39 = vpop.permute.xlu2 %2057 }
0x17b0   :  { %v2083_v26 = vpop.permute.xlu0 %2082  ;;  %v5032_v34 = vmul.f32 %v2058_v39, %v2025_v2 }
0x17b1   :  { %v5034_v52 = vmul.f32 %v2083_v26, %v2040_v45 }
0x17b2   :  { %v5040_v7 = vsel %vm597_vm4, %v5032_v34, %v4967_v25  ;;  %v1763_v25 = vadd.f32 %v4916_v59, %v4901_v63 }
0x17b3   :  { %5535 = vst [vmem:[#allocation20_spill] sm:$0xff] %v5034_v52  ;;  %v5046_v6 = vsel %vm628_vm6, %v5034_v52, %v4976_v46  ;;  %2095 = vrot.lane.b32.xlu1 %v5040_v7, %s3802_s29  ;;  %v1770_v46 = vadd.f32 %v4938_v4, %v4928_v33 }
0x17b4   :  { %2099 = vrot.lane.b32.xlu2 %v5046_v6, %s3804_s3 }
0x180e   :  { %v2100_v45 = vpop.permute.xlu2 %2099 }
0x1825   :  { %v2096_v61 = vpop.permute.xlu1 %2095 }
0x1826   :  { %v2102_v49 = vsel %vm320_vm3, %v2096_v61, %v2100_v45 }
0x1827   :  { %3338 = vmatmul.msk.f32.vlgmr.msra.gmra.mxu2 %vm322_vm5, %v2102_v49  ;;  %3339 = vmatmul.msk.f32.vlgmr.msra.gmra.mxu3 %vm322_vm5, %v2102_v49 }
0x1828   :  { %2682 = vmatpush.msra.mxu2 %v4732_v23  ;;  %2702 = vmatpush.msra.mxu3 %v4779_v11 }
0x182a   :  { %2683 = vmatpush.msra.mxu2 %v4734_v43  ;;  %2703 = vmatpush.msra.mxu3 %v4796_v37 }
0x182c   :  { %2684 = vmatpush.msra.mxu2 %v4738_v47  ;;  %2704 = vmatpush.msra.mxu3 %v4798_v10 }
0x182e   :  { %2685 = vmatpush.msra.mxu2 %v4743_v44  ;;  %2705 = vmatpush.msra.mxu3 %v4802_v18 }
0x1830   :  { %2686 = vmatpush.msra.mxu2 %v4750_v19  ;;  %2706 = vmatpush.msra.mxu3 %v4811_v51 }
0x1832   :  { %2687 = vmatpush.msra.mxu2 %v4755_v29  ;;  %2707 = vmatpush.msra.mxu3 %v4818_v16 }
0x1834   :  { %2688 = vmatpush.msra.mxu2 %v4761_v31  ;;  %2708 = vmatpush.msra.mxu3 %v4830_v41 }
0x1836   :  { %2689 = vmatpush.msra.mxu2 %v4763_v32  ;;  %2709 = vmatpush.msra.mxu3 %v4838_v8 }
0x18aa   :  { %v2123_v20 = vpop.f32.mrf.mxu2  ;;  %v2143_v30 = vpop.f32.mrf.mxu3 }
0x18ab   :  { %v2124_v2 = vadd.f32 %v2123_v20, %v1763_v25  ;;  %v2144_v50 = vadd.f32 %v2143_v30, %v1770_v46 }
0x18ad   :  { %3563 = vtanh.f32 %v2124_v2  ;;  %v3340_v22 = vmul.f32 -1.442695, %v2124_v2  ;;  %v3341_v62 = vmul.f32 -1.442695, %v2144_v50 }
0x18ae   :  { %3565 = vtanh.f32 %v2144_v50 }
0x18af   :  { %3567 = vpow2.f32 %v3340_v22 }
0x18b0   :  { %3569 = vpow2.f32 %v3341_v62 }
0x18b3   :  { %v3564_v12 = vpop.eup %3563 }
0x18b4   :  { %v3566_v14 = vpop.eup %3565  ;;  %2188 = vrot.lane.b32.xlu0 %v3564_v12, %s3804_s3 }
0x18b5   :  { %2213 = vrot.lane.b32.xlu1 %v3566_v14, %s3804_s3  ;;  %v3568_v63 = vpop.eup %3567 }
0x18b6   :  { %v3570_v54 = vpop.eup %3569  ;;  %v2152_v36 = vadd.f32 1.0, %v3568_v63 }
0x18b7   :  { %v2153_v33 = vadd.f32 1.0, %v3570_v54 }
0x18b8   :  { %3571 = vrcp.f32 %v2152_v36  ;;  %v2165_v50 = vand.u32 2147483648, %v2152_v36  ;;  %vm2159_vm1 = vweird.f32 %v2152_v36  ;;  %v2163_v14 = vand.u32 2147483647, %v2152_v36 }
0x18b9   :  { %3573 = vrcp.f32 %v2153_v33  ;;  %v2180_v12 = vand.u32 2147483648, %v2153_v33  ;;  %vm2174_vm2 = vweird.f32 %v2153_v33  ;;  %v2178_v22 = vand.u32 2147483647, %v2153_v33 }
0x18ba   :  { %v2166_v54 = vor.u32 1.1754944e-38, %v2165_v50  ;;  %vm2164_vm15 = vcmp.eq.f32.partialorder %v2163_v14, 8.507059e+37 }
0x18bb   :  { %v2181_v52 = vor.u32 1.1754944e-38, %v2180_v12  ;;  %vm2179_vm8 = vcmp.eq.f32.partialorder %v2178_v22, 8.507059e+37 }
0x18be   :  { %v3572_v39 = vpop.eup %3571 }
0x18bf   :  { %v3574_v26 = vpop.eup %3573  ;;  %v2155_v45 = vmul.f32 %v3572_v39, %v2152_v36  ;;  %vm2160_vm7 = vweird.f32 %v3572_v39  ;;  %v5083_v36 = vsel %vm597_vm4, %v5028_v27, %v5025_v48 }
0x18c0   :  { %v2170_v61 = vmul.f32 %v3574_v26, %v2153_v33  ;;  %vm2175_vm0 = vweird.f32 %v3574_v26  ;;  %vm2161_vm11 = vmor %vm2159_vm1, %vm2160_vm7 }
0x18c1   :  { %v2156_v49 = vsub.f32 1.0, %v2155_v45  ;;  %vm2176_vm12 = vmor %vm2174_vm2, %vm2175_vm0 }
0x18c2   :  { %v2171_v25 = vsub.f32 1.0, %v2170_v61 }
0x18c3   :  { %v2157_v46 = vmul.f32 %v3572_v39, %v2156_v49 }
0x18c4   :  { %v2172_v20 = vmul.f32 %v3574_v26, %v2171_v25 }
0x18c5   :  { %v2158_v30 = vadd.f32 %v3572_v39, %v2157_v46 }
0x18c6   :  { %v2173_v2 = vadd.f32 %v3574_v26, %v2172_v20 }
0x18c7   :  { %v2162_v62 = vsel %vm2161_vm11, %v3572_v39, %v2158_v30  ;;  %v5094_v30 = vsel %vm628_vm6, %v5017_v9, %v5014_v5 }
0x18c8   :  { %v2177_v63 = vsel %vm2176_vm12, %v3574_v26, %v2173_v2  ;;  %v2167_v61 = vsel %vm2164_vm15, %v2166_v54, %v2162_v62 }
0x18c9   :  { %v2182_v25 = vsel %vm2179_vm8, %v2181_v52, %v2177_v63  ;;  %v2186_v33 = vmul.f32 %v2167_v61, %v5083_v36 }
0x18ca   :  { %v2211_v2 = vmul.f32 %v2182_v25, %v5094_v30 }
0x1926   :  { %v2189_v45 = vpop.permute.xlu0 %2188 }
0x1927   :  { %v2214_v49 = vpop.permute.xlu1 %2213  ;;  %v2191_v46 = vmul.f32 %v2189_v45, %v2167_v61 }
0x1928   :  { %v2216_v20 = vmul.f32 %v2214_v49, %v2182_v25 }
0x1929   :  { %2193 = vrot.lane.b32.xlu2 %v2191_v46, %s3802_s29 }
0x192a   :  { %2218 = vrot.lane.b32.xlu0 %v2216_v20, %s3802_s29 }
0x1983   :  { %v2194_v39 = vpop.permute.xlu2 %2193 }
0x1984   :  { %v5086_v26 = vadd.f32 %v2194_v39, %v2186_v33 }
0x1986   :  { %3575 = vtanh.f32 %v5086_v26 }
0x198c   :  { %v3576_v52 = vpop.eup %3575 }
0x198d   :  { %2199 = vrot.lane.b32.xlu1 %v3576_v52, %s3804_s3 }
0x199c   :  { %v2219_v48 = vpop.permute.xlu0 %2218 }
0x199d   :  { %v5097_v27 = vadd.f32 %v2219_v48, %v2211_v2 }
0x199f   :  { %3577 = vtanh.f32 %v5097_v27 }
0x19a5   :  { %v3578_v50 = vpop.eup %3577 }
0x19a6   :  { %2224 = vrot.lane.b32.xlu2 %v3578_v50, %s3804_s3 }
0x19ff   :  { %v2200_v12 = vpop.permute.xlu1 %2199 }
0x1a00   :  { %v2225_v14 = vpop.permute.xlu2 %2224  ;;  %v5101_v22 = vmul.f32 %v2200_v12, %v2167_v61 }
0x1a01   :  { %v5103_v62 = vmul.f32 %v2225_v14, %v2182_v25 }
0x1a02   :  { %v5109_v5 = vsel %vm751_vm9, %v5101_v22, %v5040_v7 }
0x1a03   :  { %v5115_v9 = vsel %vm782_vm10, %v5103_v62, %v5046_v6  ;;  %2237 = vrot.lane.b32.xlu0 %v5109_v5, %s3802_s29 }
0x1a04   :  { %2241 = vrot.lane.b32.xlu1 %v5115_v9, %s3804_s3 }
0x1a75   :  { %v2238_v63 = vpop.permute.xlu0 %2237 }
0x1a76   :  { %v2242_v54 = vpop.permute.xlu1 %2241 }
0x1a77   :  { %v2244_v45 = vsel %vm320_vm3, %v2238_v63, %v2242_v54 }
0x1a78   :  { %3342 = vmatmul.msk.f32.vlgmr.msra.gmra.mxu0 %vm322_vm5, %v2244_v45  ;;  %3343 = vmatmul.msk.f32.vlgmr.msra.gmra.mxu1 %vm322_vm5, %v2244_v45 }
0x1a79   :  { %2824 = vmatpush.msra.mxu0 %v4732_v23  ;;  %2844 = vmatpush.msra.mxu1 %v4779_v11  ;;  %v1698_v23 = vadd.f32 %v4912_v60, %v4891_v58 }
0x1a7b   :  { %2825 = vmatpush.msra.mxu0 %v4734_v43  ;;  %2845 = vmatpush.msra.mxu1 %v4796_v37  ;;  %v1742_v43 = vadd.f32 %v4923_v38, %v4919_v17 }
0x1a7d   :  { %2826 = vmatpush.msra.mxu0 %v4738_v47  ;;  %2846 = vmatpush.msra.mxu1 %v4798_v10  ;;  %v1765_v47 = vadd.f32 %v4916_v59, %v1698_v23 }
0x1a7f   :  { %2827 = vmatpush.msra.mxu0 %v4743_v44  ;;  %2847 = vmatpush.msra.mxu1 %v4802_v18  ;;  %v1768_v44 = vadd.f32 %v4938_v4, %v1742_v43 }
0x1a81   :  { %2828 = vmatpush.msra.mxu0 %v4750_v19  ;;  %2848 = vmatpush.msra.mxu1 %v4811_v51 }
0x1a83   :  { %2829 = vmatpush.msra.mxu0 %v4755_v29  ;;  %2849 = vmatpush.msra.mxu1 %v4818_v16 }
0x1a85   :  { %2830 = vmatpush.msra.mxu0 %v4761_v31  ;;  %2850 = vmatpush.msra.mxu1 %v4830_v41 }
0x1a87   :  { %2831 = vmatpush.msra.mxu0 %v4763_v32  ;;  %2851 = vmatpush.msra.mxu1 %v4838_v8 }
0x1af5   :  { %v2265_v19 = vpop.f32.mrf.mxu0  ;;  %v2285_v29 = vpop.f32.mrf.mxu1 }
0x1af6   :  { %v2266_v11 = vadd.f32 %v2265_v19, %v1765_v47  ;;  %v2286_v31 = vadd.f32 %v2285_v29, %v1768_v44  ;;  %v5154_v47 = vsel %vm751_vm9, %v5086_v26, %v5083_v36  ;;  %v5160_v44 = vsel %vm782_vm10, %v5097_v27, %v5094_v30 }
0x1af8   :  { %3579 = vtanh.f32 %v2266_v11  ;;  %v3344_v10 = vmul.f32 -1.442695, %v2266_v11  ;;  %v3345_v41 = vmul.f32 -1.442695, %v2286_v31 }
0x1af9   :  { %3581 = vtanh.f32 %v2286_v31 }
0x1afa   :  { %3583 = vpow2.f32 %v3344_v10 }
0x1afe   :  { %v3580_v37 = vpop.eup %3579 }
0x1aff   :  { %v3582_v32 = vpop.eup %3581  ;;  %2330 = vrot.lane.b32.xlu2 %v3580_v37, %s3804_s3 }
0x1b00   :  { %2355 = vrot.lane.b32.xlu0 %v3582_v32, %s3804_s3  ;;  %v3584_v18 = vpop.eup %3583 }
0x1b01   :  { %v2294_v51 = vadd.f32 1.0, %v3584_v18 }
0x1b03   :  { %3585 = vrcp.f32 %v2294_v51  ;;  %v2307_v6 = vand.u32 2147483648, %v2294_v51  ;;  %vm2301_vm0 = vweird.f32 %v2294_v51  ;;  %v2305_v61 = vand.u32 2147483647, %v2294_v51 }
0x1b04   :  { %3587 = vpow2.f32 %v3345_v41 }
0x1b05   :  { %v2308_v25 = vor.u32 1.1754944e-38, %v2307_v6  ;;  %vm2306_vm2 = vcmp.eq.f32.partialorder %v2305_v61, 8.507059e+37 }
0x1b09   :  { %v3586_v16 = vpop.eup %3585 }
0x1b0a   :  { %v2297_v8 = vmul.f32 %v3586_v16, %v2294_v51  ;;  %v3588_v17 = vpop.eup %3587  ;;  %vm2302_vm7 = vweird.f32 %v3586_v16 }
0x1b0b   :  { %v2295_v38 = vadd.f32 1.0, %v3588_v17  ;;  %vm2303_vm1 = vmor %vm2301_vm0, %vm2302_vm7 }
0x1b0c   :  { %v2298_v58 = vsub.f32 1.0, %v2297_v8 }
0x1b0d   :  { %3589 = vrcp.f32 %v2295_v38  ;;  %v2322_v12 = vand.u32 2147483648, %v2295_v38  ;;  %vm2316_vm12 = vweird.f32 %v2295_v38  ;;  %v2320_v14 = vand.u32 2147483647, %v2295_v38 }
0x1b0e   :  { %v2299_v60 = vmul.f32 %v3586_v16, %v2298_v58 }
0x1b0f   :  { %v2323_v54 = vor.u32 1.1754944e-38, %v2322_v12  ;;  %vm2321_vm8 = vcmp.eq.f32.partialorder %v2320_v14, 8.507059e+37 }
0x1b10   :  { %v2300_v7 = vadd.f32 %v3586_v16, %v2299_v60 }
0x1b12   :  { %v2304_v49 = vsel %vm2303_vm1, %v3586_v16, %v2300_v7 }
0x1b13   :  { %v2309_v20 = vsel %vm2306_vm2, %v2308_v25, %v2304_v49  ;;  %v3590_v39 = vpop.eup %3589 }
0x1b14   :  { %v2312_v52 = vmul.f32 %v3590_v39, %v2295_v38  ;;  %vm2317_vm11 = vweird.f32 %v3590_v39  ;;  %v2328_v19 = vmul.f32 %v2309_v20, %v5154_v47 }
0x1b15   :  { %vm2318_vm15 = vmor %vm2316_vm12, %vm2317_vm11 }
0x1b16   :  { %v2313_v2 = vsub.f32 1.0, %v2312_v52 }
0x1b18   :  { %v2314_v48 = vmul.f32 %v3590_v39, %v2313_v2 }
0x1b1a   :  { %v2315_v50 = vadd.f32 %v3590_v39, %v2314_v48 }
0x1b1c   :  { %v2319_v63 = vsel %vm2318_vm15, %v3590_v39, %v2315_v50 }
0x1b1d   :  { %v2324_v23 = vsel %vm2321_vm8, %v2323_v54, %v2319_v63 }
0x1b1e   :  { %v2353_v29 = vmul.f32 %v2324_v23, %v5160_v44 }
0x1b59   :  { %v2331_v46 = vpop.permute.xlu2 %2330 }
0x1b5a   :  { %v2333_v33 = vmul.f32 %v2331_v46, %v2309_v20 }
0x1b5c   :  { %2335 = vrot.lane.b32.xlu1 %v2333_v33, %s3802_s29 }
0x1b72   :  { %v2356_v45 = vpop.permute.xlu0 %2355 }
0x1b73   :  { %v2358_v43 = vmul.f32 %v2356_v45, %v2324_v23 }
0x1b75   :  { %2360 = vrot.lane.b32.xlu2 %v2358_v43, %s3802_s29 }
0x1bce   :  { %v2336_v11 = vpop.permute.xlu1 %2335 }
0x1bcf   :  { %v2361_v31 = vpop.permute.xlu2 %2360  ;;  %v5164_v37 = vadd.f32 %v2336_v11, %v2328_v19 }
0x1bd0   :  { %v5166_v32 = vadd.f32 %v2361_v31, %v2353_v29 }
0x1bd1   :  { %3591 = vtanh.f32 %v5164_v37 }
0x1bd2   :  { %3593 = vtanh.f32 %v5166_v32 }
0x1bd7   :  { %v3592_v36 = vpop.eup %3591 }
0x1bd8   :  { %v3594_v26 = vpop.eup %3593  ;;  %2341 = vrot.lane.b32.xlu0 %v3592_v36, %s3804_s3 }
0x1bd9   :  { %2366 = vrot.lane.b32.xlu1 %v3594_v26, %s3804_s3 }
0x1c4a   :  { %v2342_v30 = vpop.permute.xlu0 %2341 }
0x1c4b   :  { %v2367_v27 = vpop.permute.xlu1 %2366  ;;  %v5172_v10 = vmul.f32 %v2342_v30, %v2309_v20 }
0x1c4c   :  { %v5174_v18 = vmul.f32 %v2367_v27, %v2324_v23 }
0x1c4d   :  { %v5180_v51 = vsel %vm905_vm13, %v5172_v10, %v5109_v5  ;;  %v1739_v5 = vadd.f32 %v4914_v35, %v4905_v42 }
0x1c4e   :  { %v5186_v16 = vsel %vm936_vm14, %v5174_v18, %v5115_v9  ;;  %2379 = vrot.lane.b32.xlu2 %v5180_v51, %s3802_s29  ;;  %v1701_v9 = vadd.f32 %v4921_v56, %v4893_v1 }
0x1c4f   :  { %2383 = vrot.lane.b32.xlu0 %v5186_v16, %s3804_s3  ;;  %v1766_v17 = vadd.f32 %v4938_v4, %v1739_v5  ;;  %v5209_v5 = vsel %vm936_vm14, %v5166_v32, %v5160_v44 }
0x1c50   :  { %v1767_v60 = vadd.f32 %v4916_v59, %v1701_v9 }
0x1ca8   :  { %v2380_v41 = vpop.permute.xlu2 %2379 }
0x1cc1   :  { %v2384_v8 = vpop.permute.xlu0 %2383 }
0x1cc2   :  { %v2386_v58 = vsel %vm320_vm3, %v2380_v41, %v2384_v8 }
0x1cc3   :  { %3346 = vmatmul.msk.f32.vlgmr.msrb.gmra.mxu2 %vm322_vm5, %v2386_v58  ;;  %3347 = vmatmul.msk.f32.vlgmr.msrb.gmra.mxu3 %vm322_vm5, %v2386_v58 }
0x1d46   :  { %v2407_v38 = vpop.f32.mrf.mxu2  ;;  %v2427_v7 = vpop.f32.mrf.mxu3 }
0x1d47   :  { %v2408_v6 = vadd.f32 %v2407_v38, %v1767_v60  ;;  %v2428_v61 = vadd.f32 %v2427_v7, %v1766_v17  ;;  %v5220_v7 = vsel %vm905_vm13, %v5164_v37, %v5154_v47 }
0x1d49   :  { %3595 = vtanh.f32 %v2408_v6  ;;  %v3349_v42 = vmul.f32 -1.442695, %v2428_v61  ;;  %v3348_v46 = vmul.f32 -1.442695, %v2408_v6 }
0x1d4a   :  { %3597 = vtanh.f32 %v2428_v61 }
0x1d4b   :  { %3599 = vpow2.f32 %v3349_v42 }
0x1d4f   :  { %v3596_v49 = vpop.eup %3595 }
0x1d50   :  { %v3598_v25 = vpop.eup %3597  ;;  %2472 = vrot.lane.b32.xlu1 %v3596_v49, %s3804_s3 }
0x1d51   :  { %2497 = vrot.lane.b32.xlu2 %v3598_v25, %s3804_s3  ;;  %v3600_v35 = vpop.eup %3599 }
0x1d52   :  { %v2437_v1 = vadd.f32 1.0, %v3600_v35 }
0x1d54   :  { %3601 = vrcp.f32 %v2437_v1  ;;  %v2464_v50 = vand.u32 2147483648, %v2437_v1  ;;  %vm2458_vm0 = vweird.f32 %v2437_v1  ;;  %v2462_v12 = vand.u32 2147483647, %v2437_v1 }
0x1d55   :  { %3603 = vpow2.f32 %v3348_v46 }
0x1d56   :  { %v2465_v63 = vor.u32 1.1754944e-38, %v2464_v50  ;;  %vm2463_vm2 = vcmp.eq.f32.partialorder %v2462_v12, 8.507059e+37 }
0x1d5a   :  { %v3602_v56 = vpop.eup %3601 }
0x1d5b   :  { %v2454_v20 = vmul.f32 %v3602_v56, %v2437_v1  ;;  %v3604_v39 = vpop.eup %3603  ;;  %vm2459_vm7 = vweird.f32 %v3602_v56 }
0x1d5c   :  { %v2436_v2 = vadd.f32 1.0, %v3604_v39  ;;  %vm2460_vm1 = vmor %vm2458_vm0, %vm2459_vm7 }
0x1d5d   :  { %v2455_v33 = vsub.f32 1.0, %v2454_v20 }
0x1d5e   :  { %3605 = vrcp.f32 %v2436_v2  ;;  %v2449_v36 = vand.u32 2147483648, %v2436_v2  ;;  %vm2443_vm12 = vweird.f32 %v2436_v2  ;;  %v2447_v26 = vand.u32 2147483647, %v2436_v2 }
0x1d5f   :  { %v2456_v52 = vmul.f32 %v3602_v56, %v2455_v33 }
0x1d60   :  { %v2450_v27 = vor.u32 1.1754944e-38, %v2449_v36  ;;  %vm2448_vm8 = vcmp.eq.f32.partialorder %v2447_v26, 8.507059e+37 }
0x1d61   :  { %v2457_v48 = vadd.f32 %v3602_v56, %v2456_v52 }
0x1d63   :  { %v2461_v14 = vsel %vm2460_vm1, %v3602_v56, %v2457_v48 }
0x1d64   :  { %v2466_v45 = vsel %vm2463_vm2, %v2465_v63, %v2461_v14  ;;  %v3606_v23 = vpop.eup %3605 }
0x1d65   :  { %v2439_v19 = vmul.f32 %v3606_v23, %v2436_v2  ;;  %vm2444_vm11 = vweird.f32 %v3606_v23  ;;  %v2495_v9 = vmul.f32 %v2466_v45, %v5209_v5 }
0x1d66   :  { %vm2445_vm15 = vmor %vm2443_vm12, %vm2444_vm11 }
0x1d67   :  { %v2440_v29 = vsub.f32 1.0, %v2439_v19 }
0x1d69   :  { %v2441_v11 = vmul.f32 %v3606_v23, %v2440_v29 }
0x1d6b   :  { %v2442_v31 = vadd.f32 %v3606_v23, %v2441_v11 }
0x1d6d   :  { %v2446_v30 = vsel %vm2445_vm15, %v3606_v23, %v2442_v31 }
0x1d6e   :  { %v2451_v8 = vsel %vm2448_vm8, %v2450_v27, %v2446_v30 }
0x1d6f   :  { %v2470_v6 = vmul.f32 %v2451_v8, %v5220_v7 }
0x1dab   :  { %v2498_v54 = vpop.permute.xlu2 %2497 }
0x1dac   :  { %v2500_v43 = vmul.f32 %v2498_v54, %v2466_v45 }
0x1dae   :  { %2502 = vrot.lane.b32.xlu1 %v2500_v43, %s3802_s29 }
0x1dc2   :  { %v2473_v41 = vpop.permute.xlu1 %2472 }
0x1dc3   :  { %v2475_v58 = vmul.f32 %v2473_v41, %v2451_v8 }
0x1dc5   :  { %2477 = vrot.lane.b32.xlu0 %v2475_v58, %s3802_s29 }
0x1e20   :  { %v2503_v60 = vpop.permute.xlu1 %2502 }
0x1e21   :  { %v5212_v17 = vadd.f32 %v2503_v60, %v2495_v9 }
0x1e23   :  { %3607 = vtanh.f32 %v5212_v17 }
0x1e29   :  { %v3608_v38 = vpop.eup %3607 }
0x1e2a   :  { %2508 = vrot.lane.b32.xlu0 %v3608_v38, %s3804_s3 }
0x1e37   :  { %v2478_v44 = vpop.permute.xlu0 %2477 }
0x1e38   :  { %v5223_v32 = vadd.f32 %v2478_v44, %v2470_v6 }
0x1e3a   :  { %3609 = vtanh.f32 %v5223_v32 }
0x1e40   :  { %v3610_v61 = vpop.eup %3609 }
0x1e41   :  { %2483 = vrot.lane.b32.xlu2 %v3610_v61, %s3804_s3 }
0x1e9b   :  { %v2484_v49 = vpop.permute.xlu2 %2483 }
0x1e9c   :  { %v2509_v25 = vpop.permute.xlu0 %2508  ;;  %v5227_v42 = vmul.f32 %v2484_v49, %v2451_v8 }
0x1e9d   :  { %v5229_v35 = vmul.f32 %v2509_v25, %v2466_v45 }
0x1e9e   :  { %v5235_v47 = vsel %vm936_vm14, %v5227_v42, %v5180_v51  ;;  %v1769_v51 = vadd.f32 %v4916_v59, %v4926_v53 }
0x1e9f   :  { %v5241_v37 = vsel %vm905_vm13, %v5229_v35, %v5186_v16  ;;  %2521 = vrot.lane.b32.xlu1 %v5235_v47, %s3802_s29  ;;  %v1764_v16 = vadd.f32 %v4938_v4, %v4903_v28 }
0x1ea0   :  { %2525 = vrot.lane.b32.xlu2 %v5241_v37, %s3804_s3 }
0x1efa   :  { %v2526_v1 = vpop.permute.xlu2 %2525 }
0x1f11   :  { %v2522_v56 = vpop.permute.xlu1 %2521 }
0x1f12   :  { %v2528_v46 = vsel %vm320_vm3, %v2522_v56, %v2526_v1  ;;  %v5262_v56 = vsel %vm936_vm14, %v5223_v32, %v5220_v7 }
0x1f13   :  { %3350 = vmatmul.msk.f32.vlgmr.msrb.gmra.mxu0 %vm322_vm5, %v2528_v46  ;;  %3351 = vmatmul.msk.f32.vlgmr.msrb.gmra.mxu1 %vm322_vm5, %v2528_v46 }
0x1f90   :  { %v2549_v20 = vpop.f32.mrf.mxu0  ;;  %v2569_v33 = vpop.f32.mrf.mxu1 }
0x1f91   :  { %v2550_v39 = vadd.f32 %v2549_v20, %v1769_v51  ;;  %v2570_v52 = vadd.f32 %v2569_v33, %v1764_v16  ;;  %v5273_v33 = vsel %vm905_vm13, %v5212_v17, %v5209_v5 }
0x1f93   :  { %3611 = vtanh.f32 %v2550_v39  ;;  %v3352_v50 = vmul.f32 -1.442695, %v2550_v39  ;;  %v3353_v12 = vmul.f32 -1.442695, %v2570_v52 }
0x1f94   :  { %3613 = vtanh.f32 %v2570_v52 }
0x1f95   :  { %3615 = vpow2.f32 %v3352_v50 }
0x1f96   :  { %3617 = vpow2.f32 %v3353_v12 }
0x1f99   :  { %v3612_v2 = vpop.eup %3611 }
0x1f9a   :  { %v3614_v48 = vpop.eup %3613  ;;  %2614 = vrot.lane.b32.xlu0 %v3612_v2, %s3804_s3 }
0x1f9b   :  { %2639 = vrot.lane.b32.xlu1 %v3614_v48, %s3804_s3  ;;  %v3616_v53 = vpop.eup %3615 }
0x1f9c   :  { %v3618_v14 = vpop.eup %3617  ;;  %v2578_v63 = vadd.f32 1.0, %v3616_v53 }
0x1f9d   :  { %v2579_v28 = vadd.f32 1.0, %v3618_v14 }
0x1f9e   :  { %3619 = vrcp.f32 %v2578_v63  ;;  %v2591_v30 = vand.u32 2147483648, %v2578_v63  ;;  %vm2585_vm1 = vweird.f32 %v2578_v63  ;;  %v2589_v41 = vand.u32 2147483647, %v2578_v63 }
0x1f9f   :  { %3621 = vrcp.f32 %v2579_v28  ;;  %v2606_v27 = vand.u32 2147483648, %v2579_v28  ;;  %vm2600_vm2 = vweird.f32 %v2579_v28  ;;  %v2604_v8 = vand.u32 2147483647, %v2579_v28 }
0x1fa0   :  { %v2592_v60 = vor.u32 1.1754944e-38, %v2591_v30  ;;  %vm2590_vm15 = vcmp.eq.f32.partialorder %v2589_v41, 8.507059e+37 }
0x1fa1   :  { %v2607_v38 = vor.u32 1.1754944e-38, %v2606_v27  ;;  %vm2605_vm8 = vcmp.eq.f32.partialorder %v2604_v8, 8.507059e+37 }
0x1fa4   :  { %v3620_v54 = vpop.eup %3619 }
0x1fa5   :  { %v3622_v45 = vpop.eup %3621  ;;  %v2581_v23 = vmul.f32 %v3620_v54, %v2578_v63  ;;  %vm2586_vm7 = vweird.f32 %v3620_v54 }
0x1fa6   :  { %v2596_v43 = vmul.f32 %v3622_v45, %v2579_v28  ;;  %vm2601_vm0 = vweird.f32 %v3622_v45  ;;  %vm2587_vm11 = vmor %vm2585_vm1, %vm2586_vm7  ;;  %v5536_v28 = vld [vmem:[#allocation15_spill] sm:$0xff] }
0x1fa7   :  { %v2582_v19 = vsub.f32 1.0, %v2581_v23  ;;  %vm2602_vm12 = vmor %vm2600_vm2, %vm2601_vm0 }
0x1fa8   :  { %v2597_v29 = vsub.f32 1.0, %v2596_v43 }
0x1fa9   :  { %v2583_v11 = vmul.f32 %v3620_v54, %v2582_v19 }
0x1faa   :  { %v2598_v31 = vmul.f32 %v3622_v45, %v2597_v29 }
0x1fab   :  { %v2584_v36 = vadd.f32 %v3620_v54, %v2583_v11 }
0x1fac   :  { %v2599_v26 = vadd.f32 %v3622_v45, %v2598_v31 }
0x1fad   :  { %v2588_v58 = vsel %vm2587_vm11, %v3620_v54, %v2584_v36 }
0x1fae   :  { %v2603_v9 = vsel %vm2602_vm12, %v3622_v45, %v2599_v26  ;;  %v2593_v44 = vsel %vm2590_vm15, %v2592_v60, %v2588_v58 }
0x1faf   :  { %v2608_v49 = vsel %vm2605_vm8, %v2607_v38, %v2603_v9  ;;  %v2612_v46 = vmul.f32 %v2593_v44, %v5262_v56 }
0x1fb0   :  { %v2637_v39 = vmul.f32 %v2608_v49, %v5273_v33 }
0x200c   :  { %v2615_v6 = vpop.permute.xlu0 %2614 }
0x200d   :  { %v2640_v61 = vpop.permute.xlu1 %2639  ;;  %v2617_v25 = vmul.f32 %v2615_v6, %v2593_v44 }
0x200e   :  { %v2642_v1 = vmul.f32 %v2640_v61, %v2608_v49 }
0x200f   :  { %2619 = vrot.lane.b32.xlu2 %v2617_v25, %s3802_s29 }
0x2010   :  { %2644 = vrot.lane.b32.xlu0 %v2642_v1, %s3802_s29 }
0x2069   :  { %v2620_v51 = vpop.permute.xlu2 %2619 }
0x206a   :  { %v5265_v16 = vadd.f32 %v2620_v51, %v2612_v46 }
0x206c   :  { %3623 = vtanh.f32 %v5265_v16 }
0x2072   :  { %v3624_v20 = vpop.eup %3623 }
0x2073   :  { %2625 = vrot.lane.b32.xlu1 %v3624_v20, %s3804_s3 }
0x2082   :  { %v2645_v7 = vpop.permute.xlu0 %2644 }
0x2083   :  { %v5276_v32 = vadd.f32 %v2645_v7, %v2637_v39 }
0x2085   :  { %3625 = vtanh.f32 %v5276_v32 }
0x208b   :  { %v3626_v52 = vpop.eup %3625 }
0x208c   :  { %2650 = vrot.lane.b32.xlu2 %v3626_v52, %s3804_s3 }
0x20e5   :  { %v2626_v2 = vpop.permute.xlu1 %2625 }
0x20e6   :  { %v2651_v48 = vpop.permute.xlu2 %2650  ;;  %v5280_v50 = vmul.f32 %v2626_v2, %v2593_v44 }
0x20e7   :  { %v5282_v12 = vmul.f32 %v2651_v48, %v2608_v49 }
0x20e8   :  { %v5288_v5 = vsel %vm782_vm10, %v5280_v50, %v5235_v47  ;;  %v1771_v47 = vadd.f32 %v4916_v59, %v4934_v55 }
0x20e9   :  { %v5294_v17 = vsel %vm751_vm9, %v5282_v12, %v5241_v37  ;;  %2663 = vrot.lane.b32.xlu0 %v5288_v5, %s3802_s29  ;;  %v1762_v37 = vadd.f32 %v4938_v4, %v5536_v28  ;;  %v5321_v28 = vsel %vm751_vm9, %v5276_v32, %v5273_v33 }
0x20ea   :  { %2667 = vrot.lane.b32.xlu1 %v5294_v17, %s3804_s3 }
0x215b   :  { %v2664_v53 = vpop.permute.xlu0 %2663 }
0x215c   :  { %v2668_v14 = vpop.permute.xlu1 %2667 }
0x215d   :  { %v2670_v63 = vsel %vm320_vm3, %v2664_v53, %v2668_v14 }
0x215e   :  { %3354 = vmatmul.msk.f32.vlgmr.msra.gmra.mxu2 %vm322_vm5, %v2670_v63  ;;  %3355 = vmatmul.msk.f32.vlgmr.msra.gmra.mxu3 %vm322_vm5, %v2670_v63 }
0x21e1   :  { %v2691_v54 = vpop.f32.mrf.mxu2  ;;  %v2711_v45 = vpop.f32.mrf.mxu3 }
0x21e2   :  { %v2692_v23 = vadd.f32 %v2691_v54, %v1771_v47  ;;  %v2712_v43 = vadd.f32 %v2711_v45, %v1762_v37  ;;  %v5315_v47 = vsel %vm782_vm10, %v5265_v16, %v5262_v56 }
0x21e4   :  { %3627 = vtanh.f32 %v2692_v23  ;;  %v3356_v11 = vmul.f32 -1.442695, %v2692_v23  ;;  %v3357_v26 = vmul.f32 -1.442695, %v2712_v43 }
0x21e5   :  { %3629 = vtanh.f32 %v2712_v43 }
0x21e6   :  { %3631 = vpow2.f32 %v3356_v11 }
0x21ea   :  { %v3628_v19 = vpop.eup %3627 }
0x21eb   :  { %v3630_v29 = vpop.eup %3629  ;;  %2756 = vrot.lane.b32.xlu2 %v3628_v19, %s3804_s3 }
0x21ec   :  { %2781 = vrot.lane.b32.xlu0 %v3630_v29, %s3804_s3  ;;  %v3632_v31 = vpop.eup %3631 }
0x21ed   :  { %v2720_v36 = vadd.f32 1.0, %v3632_v31 }
0x21ef   :  { %3633 = vrcp.f32 %v2720_v36  ;;  %v2733_v60 = vand.u32 2147483648, %v2720_v36  ;;  %vm2727_vm0 = vweird.f32 %v2720_v36  ;;  %v2731_v38 = vand.u32 2147483647, %v2720_v36 }
0x21f0   :  { %3635 = vpow2.f32 %v3357_v26 }
0x21f1   :  { %v2734_v44 = vor.u32 1.1754944e-38, %v2733_v60  ;;  %vm2732_vm2 = vcmp.eq.f32.partialorder %v2731_v38, 8.507059e+37 }
0x21f5   :  { %v3634_v55 = vpop.eup %3633 }
0x21f6   :  { %v2723_v30 = vmul.f32 %v3634_v55, %v2720_v36  ;;  %v3636_v8 = vpop.eup %3635  ;;  %vm2728_vm7 = vweird.f32 %v3634_v55 }
0x21f7   :  { %v2721_v58 = vadd.f32 1.0, %v3636_v8  ;;  %vm2729_vm1 = vmor %vm2727_vm0, %vm2728_vm7  ;;  %vm5543_vm7 = vcmp.eq.s32.totalorder %v4209_v15, 1 }
0x21f8   :  { %v2724_v27 = vsub.f32 1.0, %v2723_v30 }
0x21f9   :  { %3637 = vrcp.f32 %v2721_v58  ;;  %v2748_v7 = vand.u32 2147483648, %v2721_v58  ;;  %vm2742_vm12 = vweird.f32 %v2721_v58  ;;  %v2746_v52 = vand.u32 2147483647, %v2721_v58 }
0x21fa   :  { %v2725_v41 = vmul.f32 %v3634_v55, %v2724_v27  ;;  %v5537_v27 = vld [vmem:[#allocation16_spill] sm:$0xff] }
0x21fb   :  { %v2749_v48 = vor.u32 1.1754944e-38, %v2748_v7  ;;  %vm2747_vm8 = vcmp.eq.f32.partialorder %v2746_v52, 8.507059e+37 }
0x21fc   :  { %v2726_v9 = vadd.f32 %v3634_v55, %v2725_v41  ;;  %v5538_v41 = vld [vmem:[#allocation19_spill] sm:$0xff] }
0x21fd   :  { %v1710_v8 = vadd.f32 %v5538_v41, %v5537_v27 }
0x21fe   :  { %v2730_v6 = vsel %vm2729_vm1, %v3634_v55, %v2726_v9 }
0x21ff   :  { %v2735_v49 = vsel %vm2732_vm2, %v2734_v44, %v2730_v6  ;;  %v3638_v1 = vpop.eup %3637 }
0x2200   :  { %v2738_v46 = vmul.f32 %v3638_v1, %v2721_v58  ;;  %vm2743_vm11 = vweird.f32 %v3638_v1  ;;  %v2754_v37 = vmul.f32 %v2735_v49, %v5315_v47  ;;  %v5539_v58 = vld [vmem:[#allocation14_spill] sm:$0xff] }
0x2201   :  { %vm2744_vm15 = vmor %vm2742_vm12, %vm2743_vm11 }
0x2202   :  { %v2739_v51 = vsub.f32 1.0, %v2738_v46  ;;  %v2631_v46 = vsel %vm782_vm10, %v5280_v50, 0.0 }
0x2204   :  { %v2740_v20 = vmul.f32 %v3638_v1, %v2739_v51  ;;  %v5542_v51 = vld [vmem:[#allocation18_spill] sm:$0xff] }
0x2206   :  { %v2741_v39 = vadd.f32 %v3638_v1, %v2740_v20  ;;  %v1946_v20 = vsel %vm5543_vm7, %v5542_v51, 0.0 }
0x2208   :  { %v2745_v2 = vsel %vm2744_vm15, %v3638_v1, %v2741_v39  ;;  %v2372_v1 = vsel %vm936_vm14, %v5174_v18, 0.0 }
0x2209   :  { %v2750_v14 = vsel %vm2747_vm8, %v2749_v48, %v2745_v2  ;;  %v2961_v48 = vld [vmem:[#allocation9 + $0x18] sm:$0xff] }
0x220a   :  { %v2779_v54 = vmul.f32 %v2750_v14, %v5321_v28  ;;  %3067 = vmatpush.msrb.mxu3 %v2961_v48 }
0x2245   :  { %v2757_v61 = vpop.permute.xlu2 %2756 }
0x2246   :  { %v2759_v25 = vmul.f32 %v2757_v61, %v2735_v49 }
0x2248   :  { %2761 = vrot.lane.b32.xlu1 %v2759_v25, %s3802_s29 }
0x225e   :  { %v2782_v53 = vpop.permute.xlu0 %2781 }
0x225f   :  { %v2784_v63 = vmul.f32 %v2782_v53, %v2750_v14  ;;  %v2960_v53 = vld [vmem:[#allocation9 + $0x10] sm:$0xff] }
0x2260   :  { %3068 = vmatpush.msrb.mxu3 %v2960_v53 }
0x2261   :  { %2786 = vrot.lane.b32.xlu2 %v2784_v63, %s3802_s29 }
0x22ba   :  { %v2762_v45 = vpop.permute.xlu1 %2761 }
0x22bb   :  { %v2787_v23 = vpop.permute.xlu2 %2786  ;;  %v5325_v43 = vadd.f32 %v2762_v45, %v2754_v37  ;;  %v2958_v37 = vld [vmem:[#allocation9] sm:$0xff] }
0x22bc   :  { %v5327_v19 = vadd.f32 %v2787_v23, %v2779_v54 }
0x22bd   :  { %3639 = vtanh.f32 %v5325_v43 }
0x22be   :  { %3641 = vtanh.f32 %v5327_v19 }
0x22c3   :  { %v3640_v56 = vpop.eup %3639 }
0x22c4   :  { %v3642_v16 = vpop.eup %3641  ;;  %2767 = vrot.lane.b32.xlu0 %v3640_v56, %s3804_s3 }
0x22c5   :  { %2792 = vrot.lane.b32.xlu1 %v3642_v16, %s3804_s3 }
0x2336   :  { %v2768_v33 = vpop.permute.xlu0 %2767 }
0x2337   :  { %v2793_v32 = vpop.permute.xlu1 %2792  ;;  %v5333_v29 = vmul.f32 %v2768_v33, %v2735_v49  ;;  %v5540_v49 = vld [vmem:[#allocation17_spill] sm:$0xff] }
0x2338   :  { %v2795_v11 = vmul.f32 %v2793_v32, %v2750_v14  ;;  %v2959_v14 = vld [vmem:[#allocation9 + $0x8] sm:$0xff] }
0x2339   :  { %v2771_v31 = vsel %vm628_vm6, %v5333_v29, %v5288_v5  ;;  %v1773_v5 = vadd.f32 %v4916_v59, %v1710_v8  ;;  %3069 = vmatpush.msrb.mxu3 %v2959_v14  ;;  %v2347_v14 = vsel %vm905_vm13, %v5172_v10, 0.0 }
0x233a   :  { %v2796_v36 = vsel %vm597_vm4, %v2795_v11, %v5294_v17  ;;  %2805 = vrot.lane.b32.xlu2 %v2771_v31, %s3802_s29  ;;  %v1760_v17 = vadd.f32 %v4938_v4, %v5539_v58  ;;  %v2798_v59 = vsel %vm597_vm4, %v2795_v11, 0.0  ;;  %v2656_v4 = vsel %vm751_vm9, %v5282_v12, 0.0 }
0x233b   :  { %2809 = vrot.lane.b32.xlu0 %v2796_v36, %s3804_s3  ;;  %3070 = vmatpush.msrb.mxu3 %v2958_v37 }
0x2394   :  { %v2806_v55 = vpop.permute.xlu2 %2805 }
0x23ad   :  { %v2810_v26 = vpop.permute.xlu0 %2809 }
0x23ae   :  { %v2812_v30 = vsel %vm320_vm3, %v2806_v55, %v2810_v26 }
0x23af   :  { %3358 = vmatmul.msk.f32.vlgmr.msra.gmra.mxu0 %vm322_vm5, %v2812_v30  ;;  %3359 = vmatmul.msk.f32.vlgmr.msra.gmra.mxu1 %vm322_vm5, %v2812_v30  ;;  %vm5541_vm5 = vcmp.eq.s32.totalorder %v4207_v13, 1 }
0x23b0   :  { %v1914_v25 = vsel %vm5541_vm5, %v5540_v49, 0.0  ;;  %v2063_v49 = vsel %vm597_vm4, %v5032_v34, 0.0 }
0x242c   :  { %v2833_v9 = vpop.f32.mrf.mxu0  ;;  %v2853_v60 = vpop.f32.mrf.mxu1 }
0x242d   :  { %v2834_v38 = vadd.f32 %v2833_v9, %v1773_v5  ;;  %v2854_v6 = vadd.f32 %v2853_v60, %v1760_v17 }
0x242f   :  { %3643 = vtanh.f32 %v2834_v38  ;;  %v3361_v12 = vmul.f32 -1.442695, %v2854_v6  ;;  %v3360_v39 = vmul.f32 -1.442695, %v2834_v38 }
0x2430   :  { %3645 = vtanh.f32 %v2854_v6 }
0x2431   :  { %3647 = vpow2.f32 %v3361_v12 }
0x2432   :  { %3649 = vpow2.f32 %v3360_v39 }
0x2435   :  { %v3644_v44 = vpop.eup %3643 }
0x2436   :  { %v3646_v61 = vpop.eup %3645  ;;  %2898 = vrot.lane.b32.xlu0 %v3644_v44, %s3804_s3 }
0x2437   :  { %2921 = vrot.lane.b32.xlu1 %v3646_v61, %s3804_s3  ;;  %v3648_v7 = vpop.eup %3647 }
0x2438   :  { %v2863_v18 = vadd.f32 1.0, %v3648_v7  ;;  %v3650_v52 = vpop.eup %3649 }
0x2439   :  { %v2862_v2 = vadd.f32 1.0, %v3650_v52 }
0x243a   :  { %3651 = vrcp.f32 %v2863_v18  ;;  %v2890_v32 = vand.u32 2147483648, %v2863_v18  ;;  %vm2884_vm1 = vweird.f32 %v2863_v18  ;;  %v2888_v11 = vand.u32 2147483647, %v2863_v18 }
0x243b   :  { %3653 = vrcp.f32 %v2862_v2  ;;  %v2875_v5 = vand.u32 2147483648, %v2862_v2  ;;  %vm2869_vm15 = vweird.f32 %v2862_v2  ;;  %v2873_v58 = vand.u32 2147483647, %v2862_v2 }
0x243c   :  { %v2891_v55 = vor.u32 1.1754944e-38, %v2890_v32  ;;  %vm2889_vm11 = vcmp.eq.f32.partialorder %v2888_v11, 8.507059e+37 }
0x243d   :  { %v2876_v9 = vor.u32 1.1754944e-38, %v2875_v5  ;;  %vm2874_vm5 = vcmp.eq.f32.partialorder %v2873_v58, 8.507059e+37 }
0x243e   :  { %1916 = vrot.lane.b32.xlu0 %v1914_v25, %s3802_s29 }
0x2440   :  { %v3652_v50 = vpop.eup %3651 }
0x2441   :  { %v2880_v63 = vmul.f32 %v3652_v50, %v2863_v18  ;;  %v3654_v45 = vpop.eup %3653  ;;  %vm2885_vm0 = vweird.f32 %v3652_v50 }
0x2442   :  { %v2865_v56 = vmul.f32 %v3654_v45, %v2862_v2  ;;  %vm2886_vm2 = vmor %vm2884_vm1, %vm2885_vm0  ;;  %vm2870_vm12 = vweird.f32 %v3654_v45  ;;  %vm3215_vm0 = vcmask 1047559  }
0x2443   :  { %v2881_v54 = vsub.f32 1.0, %v2880_v63  ;;  %vm2871_vm8 = vmor %vm2869_vm15, %vm2870_vm12  ;;  %v2489_v63 = vsel %vm936_vm14, %v5227_v42, 0.0  ;;  %vm3209_vm14 = vcmask 1045509  }
0x2444   :  { %v2866_v33 = vsub.f32 1.0, %v2865_v56 }
0x2445   :  { %v2882_v23 = vmul.f32 %v3652_v50, %v2881_v54  ;;  %v2965_v54 = vld [vmem:[#allocation9 + $0x38] sm:$0xff] }
0x2446   :  { %2800 = vrot.lane.b32.xlu0 %v2798_v59, %s3802_s29  ;;  %v2867_v36 = vmul.f32 %v3654_v45, %v2866_v33  ;;  %v2205_v59 = vsel %vm751_vm9, %v5101_v22, 0.0  ;;  %v2773_v22 = vsel %vm628_vm6, %v5333_v29, 0.0  ;;  %3002 = vmatpush.msrb.mxu2 %v2965_v54  ;;  %vm3200_vm9 = vcmask 1042434  }
0x2447   :  { %v2883_v16 = vadd.f32 %v3652_v50, %v2882_v23  ;;  %v2963_v23 = vld [vmem:[#allocation9 + $0x28] sm:$0xff] }
0x2448   :  { %v2868_v8 = vadd.f32 %v3654_v45, %v2867_v36 }
0x2449   :  { %v2887_v31 = vsel %vm2886_vm2, %v3652_v50, %v2883_v16 }
0x244a   :  { %v5377_v27 = vsel %vm2889_vm11, %v2891_v55, %v2887_v31  ;;  %v2872_v17 = vsel %vm2871_vm8, %v3654_v45, %v2868_v8  ;;  %v2964_v45 = vld [vmem:[#allocation9 + $0x30] sm:$0xff] }
0x244b   :  { %v5381_v38 = vsel %vm2874_vm5, %v2876_v9, %v2872_v17  ;;  %3003 = vmatpush.msrb.mxu2 %v2964_v45 }
0x244d   :  { %3004 = vmatpush.msrb.mxu2 %v2963_v23 }
0x244e   :  { %2658 = vrot.lane.b32.xlu0 %v2656_v4, %s3802_s29 }
0x244f   :  { %3005 = vmatpush.msrb.mxu2 %v2962_v40 }
0x2456   :  { %2374 = vrot.lane.b32.xlu0 %v2372_v1, %s3802_s29  ;;  %v2514_v1 = vsel %vm905_vm13, %v5229_v35, 0.0  ;;  %v2797_v35 = vsel %vm597_vm4, %v5327_v19, %v5321_v28  ;;  %vm5544_vm4 = vcmp.eq.s32.totalorder %v4207_v13, 1  ;;  %v5545_v13 = vld [vmem:[#allocation20_spill] sm:$0xff]  ;;  %vm3206_vm13 = vcmask 1044484  }
0x2457   :  { %v2919_v51 = vmul.f32 %v5377_v27, %v2797_v35  ;;  %v2088_v37 = vsel %vm628_vm6, %v5545_v13, 0.0 }
0x245e   :  { %2633 = vrot.lane.b32.xlu0 %v2631_v46, %s3802_s29  ;;  %v2230_v46 = vsel %vm782_vm10, %v5103_v62, 0.0  ;;  %vm3203_vm10 = vcmask 1043459  }
0x2466   :  { %1948 = vrot.lane.b32.xlu0 %v1946_v20, %s3802_s29  ;;  %v2772_v20 = vsel %vm628_vm6, %v5325_v43, %v5315_v47  ;;  %vm5546_vm6 = vmmov %vm5543_vm7  ;;  %vm3212_vm7 = vcmask 1046534  }
0x2467   :  { %v2896_v12 = vmul.f32 %v5381_v38, %v2772_v20 }
0x24a8   :  { %v2899_v26 = vpop.permute.xlu0 %2898 }
0x24a9   :  { %v2922_v30 = vpop.permute.xlu1 %2921  ;;  %v2901_v6 = vmul.f32 %v2899_v26, %v5381_v38 }
0x24aa   :  { %v2924_v41 = vmul.f32 %v2922_v30, %v5377_v27 }
0x24ac   :  { %2926 = vrot.lane.b32.xlu2 %v2924_v41, %s3802_s29 }
0x24b0   :  { %v1917_v60 = vpop.permute.xlu0 %1916 }
0x24b1   :  { %1919 = vst.msk [vmem:[#allocation2] sm:$0xff] %vm320_vm3, %v1917_v60  ;;  %v3402_v60 = vld [vmem:[%s5514_s11] ss:$0 sm:$0xff] }
0x24b4   :  { %2903 = vrot.lane.b32.xlu2 %v2901_v6, %s3802_s29 }
0x24b8   :  { %v2801_v44 = vpop.permute.xlu0 %2800  ;;  %v2942_v61 = vld [vmem:[#allocation2] sm:$0xff] }
0x24b9   :  { %2803 = vst.msk [vmem:[#allocation3 + $0x8] sm:$0xff] %vm320_vm3, %v2801_v44  ;;  %3370 = vmatmul.msk.f32.vlgmr.msrb.gmra.mxu3 %vm320_vm3, %v2942_v61 }
0x24bc   :  { %2065 = vrot.lane.b32.xlu2 %v2063_v49, %s3802_s29 }
0x24c0   :  { %v2659_v25 = vpop.permute.xlu0 %2658  ;;  %v2951_v33 = vld [vmem:[#allocation3 + $0x8] sm:$0xff] }
0x24c1   :  { %2661 = vst.msk [vmem:[#allocation3 + $0x10] sm:$0xff] %vm320_vm3, %v2659_v25 }
0x24c4   :  { %2207 = vrot.lane.b32.xlu2 %v2205_v59, %s3802_s29 }
0x24c8   :  { %v2375_v4 = vpop.permute.xlu0 %2374  ;;  %v2952_v11 = vld [vmem:[#allocation3 + $0x10] sm:$0xff] }
0x24c9   :  { %2377 = vst.msk [vmem:[#allocation3 + $0x20] sm:$0xff] %vm320_vm3, %v2375_v4 }
0x24cc   :  { %2516 = vrot.lane.b32.xlu2 %v2514_v1, %s3802_s29 }
0x24d0   :  { %v2634_v34 = vpop.permute.xlu0 %2633  ;;  %v2954_v26 = vld [vmem:[#allocation3 + $0x20] sm:$0xff] }
0x24d1   :  { %2636 = vst.msk [vmem:[#allocation2 + $0x28] sm:$0xff] %vm320_vm3, %v2634_v34 }
0x24d4   :  { %2232 = vrot.lane.b32.xlu2 %v2230_v46, %s3802_s29 }
0x24d8   :  { %v1949_v3 = vpop.permute.xlu0 %1948  ;;  %v2947_v30 = vld [vmem:[#allocation2 + $0x28] sm:$0xff] }
0x24d9   :  { %1951 = vst.msk [vmem:[#allocation3 + $0x38] sm:$0xff] %vm320_vm3, %v1949_v3 }
0x24dc   :  { %2775 = vrot.lane.b32.xlu2 %v2773_v22, %s3802_s29 }
0x24e0   :  { %v2957_v5 = vld [vmem:[#allocation3 + $0x38] sm:$0xff] }
0x2506   :  { %v2927_v24 = vpop.permute.xlu2 %2926 }
0x2507   :  { %v2929_v62 = vadd.f32 %v2927_v24, %v2919_v51 }
0x2509   :  { %3655 = vtanh.f32 %v2929_v62 }
0x250e   :  { %v2904_v29 = vpop.permute.xlu2 %2903 }
0x250f   :  { %v3656_v39 = vpop.eup %3655  ;;  %v2906_v7 = vadd.f32 %v2904_v29, %v2896_v12 }
0x2510   :  { %2932 = vrot.lane.b32.xlu1 %v3656_v39, %s3804_s3 }
0x2511   :  { %3657 = vtanh.f32 %v2906_v7 }
0x2516   :  { %v2066_v18 = vpop.permute.xlu2 %2065 }
0x2517   :  { %2068 = vst.msk [vmem:[#allocation2 + $0x8] sm:$0xff] %vm320_vm3, %v2066_v18  ;;  %v3658_v53 = vpop.eup %3657 }
0x251e   :  { %v2208_v21 = vpop.permute.xlu2 %2207  ;;  %v2943_v28 = vld [vmem:[#allocation2 + $0x8] sm:$0xff] }
0x251f   :  { %2210 = vst.msk [vmem:[#allocation2 + $0x10] sm:$0xff] %vm320_vm3, %v2208_v21  ;;  %3371 = vmatmul.msk.f32.gmra.mxu3 %vm320_vm3, %v2943_v28 }
0x2526   :  { %v2517_v19 = vpop.permute.xlu2 %2516  ;;  %v2944_v52 = vld [vmem:[#allocation2 + $0x10] sm:$0xff] }
0x2527   :  { %2519 = vst.msk [vmem:[#allocation3 + $0x18] sm:$0xff] %vm320_vm3, %v2517_v19  ;;  %3372 = vmatmul.msk.f32.gmra.mxu3 %vm320_vm3, %v2944_v52 }
0x252e   :  { %v2233_v47 = vpop.permute.xlu2 %2232  ;;  %v2953_v15 = vld [vmem:[#allocation3 + $0x18] sm:$0xff] }
0x252f   :  { %2235 = vst.msk [vmem:[#allocation3 + $0x28] sm:$0xff] %vm320_vm3, %v2233_v47 }
0x2536   :  { %v2776_v43 = vpop.permute.xlu2 %2775 }
0x2537   :  { %2778 = vst.msk [vmem:[#allocation2 + $0x30] sm:$0xff] %vm320_vm3, %v2776_v43 }
0x253c   :  { %v3072_v17 = vpop.f32.mrf.mxu3 }
0x253e   :  { %v2948_v41 = vld [vmem:[#allocation2 + $0x30] sm:$0xff] }
0x2582   :  { %v2933_v2 = vpop.permute.xlu1 %2932 }
0x2583   :  { %v2935_v48 = vmul.f32 %v2933_v2, %v5377_v27  ;;  %v2955_v27 = vld [vmem:[#allocation3 + $0x28] sm:$0xff] }
0x2585   :  { %v2936_v50 = vsel %vm5544_vm4, %v2935_v48, 0.0 }
0x2586   :  { %2938 = vrot.lane.b32.xlu1 %v2936_v50, %s3802_s29 }
0x258e   :  { %2909 = vrot.lane.b32.xlu1 %v3658_v53, %s3804_s3 }
0x2596   :  { %2349 = vrot.lane.b32.xlu1 %v2347_v14, %s3802_s29 }
0x259e   :  { %2491 = vrot.lane.b32.xlu1 %v2489_v63, %s3802_s29 }
0x25a6   :  { %2090 = vrot.lane.b32.xlu1 %v2088_v37, %s3802_s29 }
0x25f8   :  { %v2939_v10 = vpop.permute.xlu1 %2938 }
0x25f9   :  { %2941 = vst.msk [vmem:[#allocation3] sm:$0xff] %vm320_vm3, %v2939_v10 }
0x2600   :  { %v2910_v0 = vpop.permute.xlu1 %2909  ;;  %v2950_v42 = vld [vmem:[#allocation3] sm:$0xff] }
0x2601   :  { %v2912_v56 = vmul.f32 %v2910_v0, %v5381_v38  ;;  %3362 = vmatmul.msk.f32.vlgmr.msrb.gmra.mxu2 %vm320_vm3, %v2950_v42  ;;  %v3075_v38 = vpop.f32.mrf.mxu3 }
0x2603   :  { %v2913_v57 = vsel %vm5546_vm6, %v2912_v56, 0.0 }
0x2604   :  { %2915 = vrot.lane.b32.xlu1 %v2913_v57, %s3802_s29 }
0x2608   :  { %v2350_v16 = vpop.permute.xlu1 %2349 }
0x2609   :  { %2352 = vst.msk [vmem:[#allocation2 + $0x18] sm:$0xff] %vm320_vm3, %v2350_v16  ;;  %3363 = vmatmul.msk.f32.gmra.mxu2 %vm320_vm3, %v2951_v33  ;;  %v3078_v59 = vpop.f32.mrf.mxu3 }
0x2610   :  { %v2492_v32 = vpop.permute.xlu1 %2491  ;;  %v2945_v31 = vld [vmem:[#allocation2 + $0x18] sm:$0xff] }
0x2611   :  { %2494 = vst.msk [vmem:[#allocation2 + $0x20] sm:$0xff] %vm320_vm3, %v2492_v32  ;;  %3364 = vmatmul.msk.f32.gmra.mxu2 %vm320_vm3, %v2952_v11  ;;  %3373 = vmatmul.msk.f32.gmra.mxu3 %vm320_vm3, %v2945_v31 }
0x2618   :  { %v2091_v36 = vpop.permute.xlu1 %2090  ;;  %v2946_v55 = vld [vmem:[#allocation2 + $0x20] sm:$0xff] }
0x2619   :  { %2093 = vst.msk [vmem:[#allocation3 + $0x30] sm:$0xff] %vm320_vm3, %v2091_v36  ;;  %3365 = vmatmul.msk.f32.gmra.mxu2 %vm320_vm3, %v2953_v15  ;;  %3374 = vmatmul.msk.f32.gmra.mxu3 %vm320_vm3, %v2946_v55 }
0x2620   :  { %v2956_v8 = vld [vmem:[#allocation3 + $0x30] sm:$0xff] }
0x2621   :  { %3366 = vmatmul.msk.f32.gmra.mxu2 %vm320_vm3, %v2954_v26  ;;  %3375 = vmatmul.msk.f32.gmra.mxu3 %vm320_vm3, %v2947_v30 }
0x2629   :  { %3367 = vmatmul.msk.f32.gmra.mxu2 %vm320_vm3, %v2955_v27  ;;  %3376 = vmatmul.msk.f32.gmra.mxu3 %vm320_vm3, %v2948_v41 }
0x2631   :  { %3368 = vmatmul.msk.f32.gmra.mxu2 %vm320_vm3, %v2956_v8 }
0x2639   :  { %3369 = vmatmul.msk.f32.gmra.mxu2 %vm320_vm3, %v2957_v5 }
0x2676   :  { %v2916_v58 = vpop.permute.xlu1 %2915 }
0x2677   :  { %2918 = vst.msk [vmem:[#allocation2 + $0x38] sm:$0xff] %vm320_vm3, %v2916_v58 }
0x267e   :  { %v2949_v9 = vld [vmem:[#allocation2 + $0x38] sm:$0xff] }
0x267f   :  { %3377 = vmatmul.msk.f32.gmra.mxu3 %vm320_vm3, %v2949_v9  ;;  %vm3197_vm3 = vcmask 1041409  }
0x2684   :  { %v3007_v6 = vpop.f32.mrf.mxu2 }
0x2685   :  { %v3073_v44 = vadd.f32 %v3072_v17, %v3007_v6 }
0x2687   :  { %v3100_v61 = vadd.f32 %v3402_v60, %v3073_v44 }
0x2689   :  { %3108 = vmax.xlane.f32.xlu1 %v3100_v61 }
0x268c   :  { %v3010_v49 = vpop.f32.mrf.mxu2 }
0x268d   :  { %v3076_v25 = vadd.f32 %v3075_v38, %v3010_v49 }
0x268f   :  { %v3101_v4 = vadd.f32 %v3402_v60, %v3076_v25 }
0x2691   :  { %3110 = vmax.xlane.f32.xlu2 %v3101_v4 }
0x2694   :  { %v3013_v1 = vpop.f32.mrf.mxu2  ;;  %v3081_v46 = vpop.f32.mrf.mxu3 }
0x2695   :  { %v3079_v34 = vadd.f32 %v3078_v59, %v3013_v1 }
0x2697   :  { %v3102_v3 = vadd.f32 %v3402_v60, %v3079_v34 }
0x2699   :  { %3112 = vmax.xlane.f32.xlu0 %v3102_v3 }
0x269c   :  { %v3016_v22 = vpop.f32.mrf.mxu2  ;;  %v3084_v24 = vpop.f32.mrf.mxu3 }
0x269d   :  { %v3082_v35 = vadd.f32 %v3081_v46, %v3016_v22 }
0x269f   :  { %v3103_v51 = vadd.f32 %v3402_v60, %v3082_v35 }
0x26a1   :  { %3114 = vmax.xlane.f32.xlu2 %v3103_v51 }
0x26a4   :  { %v3019_v62 = vpop.f32.mrf.mxu2  ;;  %v3087_v29 = vpop.f32.mrf.mxu3 }
0x26a5   :  { %v3085_v20 = vadd.f32 %v3084_v24, %v3019_v62 }
0x26a7   :  { %v3104_v12 = vadd.f32 %v3402_v60, %v3085_v20 }
0x26a9   :  { %3116 = vmax.xlane.f32.xlu2 %v3104_v12 }
0x26ac   :  { %v3022_v39 = vpop.f32.mrf.mxu2  ;;  %v3090_v21 = vpop.f32.mrf.mxu3 }
0x26ad   :  { %v3088_v7 = vadd.f32 %v3087_v29, %v3022_v39 }
0x26af   :  { %v3105_v18 = vadd.f32 %v3402_v60, %v3088_v7 }
0x26b1   :  { %3118 = vmax.xlane.f32.xlu0 %v3105_v18 }
0x26b4   :  { %v3025_v28 = vpop.f32.mrf.mxu2 }
0x26b5   :  { %v3091_v19 = vadd.f32 %v3090_v21, %v3025_v28 }
0x26b7   :  { %v3106_v52 = vadd.f32 %v3402_v60, %v3091_v19 }
0x26b9   :  { %3120 = vmax.xlane.f32.xlu1 %v3106_v52 }
0x26bc   :  { %v3028_v2 = vpop.f32.mrf.mxu2 }
0x26fc   :  { %v3109_v47 = vpop.xlane.xlu1 %3108 }
0x26fd   :  { %v5472_v43 = vsub.f32 %v3100_v61, %v3109_v47 }
0x26ff   :  { %v3132_v53 = vmul.f32 1.442695, %v5472_v43 }
0x2701   :  { %3659 = vpow2.f32 %v3132_v53 }
0x2702   :  { %v3093_v48 = vpop.f32.mrf.mxu3 }
0x2703   :  { %v3094_v50 = vadd.f32 %v3093_v48, %v3028_v2 }
0x2704   :  { %v3111_v14 = vpop.xlane.xlu2 %3110 }
0x2705   :  { %v3107_v63 = vadd.f32 %v3402_v60, %v3094_v50  ;;  %v3125_v13 = vsub.f32 %v3101_v4, %v3111_v14 }
0x2707   :  { %v3134_v37 = vmul.f32 1.442695, %v3125_v13  ;;  %3122 = vmax.xlane.f32.xlu2 %v3107_v63  ;;  %v3660_v23 = vpop.eup %3659 }
0x2709   :  { %3661 = vpow2.f32 %v3134_v37 }
0x270c   :  { %v3113_v54 = vpop.xlane.xlu0 %3112 }
0x270d   :  { %v3126_v45 = vsub.f32 %v3102_v3, %v3113_v54 }
0x270f   :  { %v3662_v40 = vpop.eup %3661  ;;  %v3136_v10 = vmul.f32 1.442695, %v3126_v45  ;;  %3148 = vadd.xlane.f32.xlu2 %v3660_v23 }
0x2710   :  { %3150 = vadd.xlane.f32.xlu0 %v3662_v40 }
0x2711   :  { %3663 = vpow2.f32 %v3136_v10 }
0x2714   :  { %v3115_v0 = vpop.xlane.xlu2 %3114 }
0x2715   :  { %v3127_v42 = vsub.f32 %v3103_v51, %v3115_v0 }
0x2717   :  { %v3664_v56 = vpop.eup %3663  ;;  %v3138_v57 = vmul.f32 1.442695, %v3127_v42 }
0x2718   :  { %3152 = vadd.xlane.f32.xlu1 %v3664_v56 }
0x2719   :  { %3665 = vpow2.f32 %v3138_v57 }
0x271c   :  { %v3117_v16 = vpop.xlane.xlu2 %3116 }
0x271d   :  { %v3128_v33 = vsub.f32 %v3104_v12, %v3117_v16 }
0x271f   :  { %v3666_v32 = vpop.eup %3665  ;;  %v3140_v11 = vmul.f32 1.442695, %v3128_v33 }
0x2720   :  { %3154 = vadd.xlane.f32.xlu0 %v3666_v32 }
0x2721   :  { %3667 = vpow2.f32 %v3140_v11 }
0x2724   :  { %v3119_v31 = vpop.xlane.xlu0 %3118 }
0x2725   :  { %v5475_v36 = vsub.f32 %v3105_v18, %v3119_v31 }
0x2727   :  { %v3668_v15 = vpop.eup %3667  ;;  %v3142_v55 = vmul.f32 1.442695, %v5475_v36 }
0x2728   :  { %3156 = vadd.xlane.f32.xlu1 %v3668_v15 }
0x2729   :  { %3669 = vpow2.f32 %v3142_v55 }
0x272c   :  { %v3121_v26 = vpop.xlane.xlu1 %3120 }
0x272d   :  { %v5478_v30 = vsub.f32 %v3106_v52, %v3121_v26 }
0x272f   :  { %v3670_v27 = vpop.eup %3669  ;;  %v3144_v41 = vmul.f32 1.442695, %v5478_v30 }
0x2730   :  { %3158 = vadd.xlane.f32.xlu2 %v3670_v27 }
0x2731   :  { %3671 = vpow2.f32 %v3144_v41 }
0x2737   :  { %v3672_v8 = vpop.eup %3671 }
0x2738   :  { %3160 = vadd.xlane.f32.xlu0 %v3672_v8 }
0x277a   :  { %v3123_v5 = vpop.xlane.xlu2 %3122 }
0x277b   :  { %v5481_v58 = vsub.f32 %v3107_v63, %v3123_v5 }
0x277d   :  { %v3146_v17 = vmul.f32 1.442695, %v5481_v58 }
0x277f   :  { %3673 = vpow2.f32 %v3146_v17 }
0x2782   :  { %v3149_v9 = vpop.xlane.xlu2 %3148 }
0x2783   :  { %3675 = vlog2.f32 %v3149_v9  ;;  %v3151_v60 = vpop.xlane.xlu0 %3150 }
0x2784   :  { %3677 = vlog2.f32 %v3151_v60 }
0x2785   :  { %v3674_v38 = vpop.eup %3673 }
0x2786   :  { %3162 = vadd.xlane.f32.xlu1 %v3674_v38 }
0x2789   :  { %v3676_v6 = vpop.eup %3675 }
0x278a   :  { %v3678_v44 = vpop.eup %3677  ;;  %v3165_v61 = vmul.f32 0.6931472, %v3676_v6 }
0x278b   :  { %v3167_v49 = vmul.f32 0.6931472, %v3678_v44  ;;  %v3153_v25 = vpop.xlane.xlu1 %3152 }
0x278c   :  { %3679 = vlog2.f32 %v3153_v25  ;;  %v3180_v4 = vsub.f32 %v5472_v43, %v3165_v61 }
0x278d   :  { %v3181_v59 = vsub.f32 %v3125_v13, %v3167_v49 }
0x278f   :  { %v3196_v1 = vrot.slane %v3181_v59, 7 }
0x2791   :  { %v3198_v34 = vsel %vm3197_vm3, %v3196_v1, %v3180_v4  ;;  %v3219_v37 = vsel %vm3200_vm9, %v3196_v1, %v3180_v4 }
0x2792   :  { %v3680_v46 = vpop.eup %3679 }
0x2793   :  { %v3169_v3 = vmul.f32 0.6931472, %v3680_v46  ;;  %v3155_v22 = vpop.xlane.xlu0 %3154 }
0x2794   :  { %3681 = vlog2.f32 %v3155_v22 }
0x2795   :  { %v3182_v35 = vsub.f32 %v3126_v45, %v3169_v3 }
0x2797   :  { %v3199_v51 = vrot.slane %v3182_v35, 6 }
0x2799   :  { %v3201_v24 = vsel %vm3200_vm9, %v3199_v51, %v3198_v34  ;;  %v3220_v54 = vsel %vm3203_vm10, %v3199_v51, %v3219_v37 }
0x279a   :  { %v3682_v62 = vpop.eup %3681 }
0x279b   :  { %v3171_v20 = vmul.f32 0.6931472, %v3682_v62  ;;  %v3157_v12 = vpop.xlane.xlu1 %3156 }
0x279c   :  { %3683 = vlog2.f32 %v3157_v12 }
0x279d   :  { %v3183_v29 = vsub.f32 %v3127_v42, %v3171_v20 }
0x279f   :  { %v3202_v39 = vrot.slane %v3183_v29, 5 }
0x27a1   :  { %v3204_v7 = vsel %vm3203_vm10, %v3202_v39, %v3201_v24  ;;  %v3221_v23 = vsel %vm3206_vm13, %v3202_v39, %v3220_v54 }
0x27a2   :  { %v3684_v18 = vpop.eup %3683 }
0x27a3   :  { %v3173_v21 = vmul.f32 0.6931472, %v3684_v18  ;;  %v3159_v28 = vpop.xlane.xlu2 %3158 }
0x27a4   :  { %3685 = vlog2.f32 %v3159_v28 }
0x27a5   :  { %v3184_v19 = vsub.f32 %v3128_v33, %v3173_v21 }
0x27a7   :  { %v3205_v52 = vrot.slane %v3184_v19, 4 }
0x27a9   :  { %v3207_v47 = vsel %vm3206_vm13, %v3205_v52, %v3204_v7  ;;  %v3222_v40 = vsel %vm3209_vm14, %v3205_v52, %v3221_v23 }
0x27aa   :  { %v3686_v43 = vpop.eup %3685 }
0x27ab   :  { %v3175_v2 = vmul.f32 0.6931472, %v3686_v43  ;;  %v3161_v48 = vpop.xlane.xlu0 %3160 }
0x27ac   :  { %3687 = vlog2.f32 %v3161_v48 }
0x27ad   :  { %v3185_v50 = vsub.f32 %v5475_v36, %v3175_v2 }
0x27af   :  { %v3208_v53 = vrot.slane %v3185_v50, 3 }
0x27b1   :  { %v3210_v14 = vsel %vm3209_vm14, %v3208_v53, %v3207_v47  ;;  %v3223_v0 = vsel %vm3212_vm7, %v3208_v53, %v3222_v40 }
0x27b2   :  { %v3688_v63 = vpop.eup %3687 }
0x27b3   :  { %v3177_v13 = vmul.f32 0.6931472, %v3688_v63 }
0x27b5   :  { %v3186_v45 = vsub.f32 %v5478_v30, %v3177_v13 }
0x27b7   :  { %v3211_v10 = vrot.slane %v3186_v45, 2 }
0x27b9   :  { %v3213_v42 = vsel %vm3212_vm7, %v3211_v10, %v3210_v14  ;;  %v3224_v56 = vsel %vm3215_vm0, %v3211_v10, %v3223_v0 }
0x27ba   :  { %3227 = vst [vmem:[%s5515_s12 + $0x7] sm:$0xfe] %v3224_v56 }
0x27f9   :  { %v3163_v57 = vpop.xlane.xlu1 %3162 }
0x27fa   :  { %3689 = vlog2.f32 %v3163_v57 }
0x2800   :  { %v3690_v16 = vpop.eup %3689 }
0x2801   :  { %v3179_v33 = vmul.f32 0.6931472, %v3690_v16 }
0x2803   :  { %v3187_v32 = vsub.f32 %v5481_v58, %v3179_v33 }
0x2805   :  { %v3214_v11 = vrot.slane %v3187_v32, 1 }
0x2807   :  { %v3216_v31 = vsel %vm3215_vm0, %v3214_v11, %v3213_v42  ;;  %3228 = vst [vmem:[%s5515_s12 + $0xf] sm:$0x1] %v3214_v11 }
0x2808   :  { %3218 = vst [vmem:[%s5515_s12] sm:$0xff] %v3216_v31 }
0x2809   :  { %3233 = vsyncpa [#allocation5], 1 }
0x280a   :  { %3234 = vsyncpa [#allocation7], 1 }
0x280b   :  { %3235 = vsyncpa [#allocation10], 1 }

</bundles_post_ra>
